<compile_context>
chip_gen: v7x
topology: tpu7x:2x2x1
jax: 0.10.0
libtpu: 0.0.40
codegen_flags: <defaults>
</compile_context>

<pallas_src>
import functools

import jax
import jax.numpy as jnp
from jax.experimental import pallas as pl
from jax.experimental.pallas import tpu as pltpu


def decoder_layer_kernel(x_ref, wqkv_ref, bqkv_ref, wo_ref, bo_ref,
                         lnw_ref, lnb_ref, w1_ref, b1_ref, w2_ref, b2_ref,
                         o_ref, *, n_heads, d_head, scale, fused_heads):
    Bt, S, D = x_ref.shape
    H, dh = n_heads, d_head
    hd = H * dh
    T = Bt * S                                   # tokens handled by this grid step
    HB = H * Bt
    cdt = wqkv_ref.dtype                         # MXU operand dtype (bf16 when params are bf16)

    # ---------------- QKV projection: one GEMM with M = Bt*S rows ----------------
    x2 = x_ref[...].reshape(T, D)
    qkv = jnp.dot(x2.astype(cdt), wqkv_ref[...],
                  preferred_element_type=jnp.float32)
    qkv = qkv + bqkv_ref[...].astype(jnp.float32)                 # (T, 3*hd) f32

    # -------- split heads: one relayout in / one out, no per-head slicing --------
    if fused_heads:
        # qkv columns are (slot, head, dh) by construction -> group as (T, 3H, dh),
        # swap the (token) and (slot*head) axes with a single lane-preserving relayout,
        # then regroup so the einsum batch axis is head*Bt.
        qkv_g = pltpu.einshape("mhd->hmd", qkv.reshape(T, 3 * H, dh))  # (3H, T, dh)
        qkv_g = qkv_g.reshape(3 * HB, S, dh)                           # (3*H*Bt, S, dh)
        q = qkv_g[0 * HB:1 * HB]
        k = qkv_g[1 * HB:2 * HB]
        v = qkv_g[2 * HB:3 * HB]
    else:
        # Conservative per-head split (proven lowering path).
        qkv3 = qkv.reshape(Bt, S, 3 * hd)

        def heads_of(base):                                            # -> (H*Bt, S, dh)
            parts = [qkv3[:, :, base + h * dh: base + (h + 1) * dh] for h in range(H)]
            return jnp.stack(parts, axis=0).reshape(HB, S, dh)

        q = heads_of(0)
        k = heads_of(hd)
        v = heads_of(2 * hd)

    # Fold 1/sqrt(dh) into q (touches T*hd elements, not the (HB,S,S) scores).
    if scale:
        q = q * (1.0 / (dh ** 0.5))

    # -------- attention core: heads batched in one 3D einsum, bf16 MXU feed --------
    s = jnp.einsum("nqd,nkd->nqk", q.astype(cdt), k.astype(cdt),
                   preferred_element_type=jnp.float32)                 # (HB, S, S) f32
    s = s - jnp.max(s, axis=-1, keepdims=True)
    e = jnp.exp(s)
    denom = jnp.sum(e, axis=-1, keepdims=True)                         # (HB, S, 1)
    ctx = jnp.einsum("nqk,nkd->nqd", e.astype(cdt), v.astype(cdt),
                     preferred_element_type=jnp.float32)               # (HB, S, dh)
    # Normalize the small ctx tensor (not the (HB,S,S) probabilities); EUP reciprocal.
    ctx = ctx * pl.reciprocal(denom, approx=True)

    # -------- merge heads back to (T, hd) with head-major columns --------
    if fused_heads:
        attn_vec = pltpu.einshape("hmd->mhd", ctx.reshape(H, T, dh)).reshape(T, hd)
    else:
        ctx4 = ctx.reshape(H, Bt, S, dh)
        attn_vec = jnp.concatenate([ctx4[h] for h in range(H)], axis=-1).reshape(T, hd)

    attn_out = jnp.dot(attn_vec.astype(cdt), wo_ref[...],
                       preferred_element_type=jnp.float32)
    attn_out = attn_out + bo_ref[...].astype(jnp.float32)              # (T, D)

    # -------- residual + LayerNorm (eps=1e-5), f32 elementwise --------
    y = x2.astype(jnp.float32) + attn_out
    mu = jnp.mean(y, axis=-1, keepdims=True)
    var = jnp.mean(jnp.square(y - mu), axis=-1, keepdims=True)
    y = (y - mu) * jax.lax.rsqrt(var + 1e-5)
    y = y * lnw_ref[...].astype(jnp.float32) + lnb_ref[...].astype(jnp.float32)

    # -------- feed-forward (ReLU) + MergeLayer residual --------
    h1 = jnp.dot(y.astype(cdt), w1_ref[...], preferred_element_type=jnp.float32)
    h1 = jnp.maximum(h1 + b1_ref[...].astype(jnp.float32), 0.0)
    z = jnp.dot(h1.astype(cdt), w2_ref[...], preferred_element_type=jnp.float32)
    z = z + b2_ref[...].astype(jnp.float32)

    o_ref[...] = (z + y).reshape(Bt, S, D).astype(o_ref.dtype)


def _chip_profile():
    """Generation-aware tuning knobs (target GEMM rows, VMEM budgets, #TensorCores)."""
    try:
        kind = jax.devices()[0].device_kind.lower()
    except Exception:
        kind = ""
    if "v5 lite" in kind or "v5e" in kind or "v5lite" in kind:
        # v5e: 1 TC, 128 MiB VMEM, 4x128^2 MXU -> 128 rows already fill it.
        return dict(target_rows=128, vmem_limit_bytes=96 * 1024 * 1024,
                    step_vmem_budget=64 * 1024 * 1024, tensorcores=1)
    if "v7" in kind:
        # v7x: 2 TCs/chip, 64 MiB VMEM per TC, 2x256^2 MXU.
        return dict(target_rows=256, vmem_limit_bytes=56 * 1024 * 1024,
                    step_vmem_budget=36 * 1024 * 1024, tensorcores=2)
    # v6e / default: 1 TC, 128 MiB VMEM, 2x256^2 MXU.
    return dict(target_rows=256, vmem_limit_bytes=96 * 1024 * 1024,
                step_vmem_budget=64 * 1024 * 1024, tensorcores=1)


def _step_vmem_bytes(bt, S, D, hd, d_inner, n_heads, itemsize):
    """Conservative estimate of per-grid-step VMEM footprint (f32 intermediates)."""
    T = bt * S
    f4 = 4
    b = 2 * 2 * T * D * itemsize                 # double-buffered x / out activation blocks
    b += 2 * (D * 3 * hd + hd * D + D * d_inner + d_inner * D) * itemsize   # weights (<=2 bufs)
    b += T * 3 * hd * f4                         # qkv (f32 accumulate)
    b += 2 * 3 * T * hd * f4                     # relayouted q/k/v + compute-dtype copies
    b += 3 * n_heads * bt * S * S * f4           # ~3 live (H*bt, S, S) softmax temporaries
    b += 2 * T * hd * f4                         # ctx + merged attention vector
    b += 2 * T * D * f4                          # post-LN y + residual temp
    b += T * d_inner * f4                        # h1
    return b


def _pick_batch_tile(B, S, D, hd, d_inner, n_heads, itemsize, prof):
    divisors = [d for d in range(B, 0, -1) if B % d == 0]
    row_target = max(1, prof["target_rows"] // max(S, 1))
    bt = 1
    for d in divisors:        # largest divisor meeting the row target and the VMEM budget
        fits = _step_vmem_bytes(d, S, D, hd, d_inner, n_heads, itemsize) <= prof["step_vmem_budget"]
        if (d <= row_target and fits) or d == 1:
            bt = d
            break
    # Multi-TensorCore chips (v7x) shard the "parallel" axis: keep >= #cores grid steps.
    if prof["tensorcores"] > 1 and B >= prof["tensorcores"]:
        for d in divisors:
            if d <= bt and B // d >= prof["tensorcores"]:
                bt = d
                break
    return bt


def decoder_layer(x, params, *, n_heads, d_head, scale=True, batch_tile=None,
                  fused_heads=True, single_buffer_weights=True):
    B, S, D = x.shape
    hd = n_heads * d_head
    hd3 = params["wqkv"].shape[1]
    d_inner = params["w1"].shape[1]
    assert hd3 == 3 * hd

    prof = _chip_profile()
    itemsize = jnp.dtype(x.dtype).itemsize
    bt = batch_tile if batch_tile is not None else _pick_batch_tile(
        B, S, D, hd, d_inner, n_heads, itemsize, prof)
    assert B % bt == 0
    grid = (B // bt,)

    # Weights/biases: full-array blocks with a constant index_map (fetched once). On the
    # optimized path they are single-buffered so they occupy 1x (not 2x) VMEM.
    def const2d(shape):
        if single_buffer_weights:
            return pl.BlockSpec(shape, lambda i: (0, 0), pipeline_mode=pl.Buffered(1))
        return pl.BlockSpec(shape, lambda i: (0, 0))

    kernel = functools.partial(decoder_layer_kernel, n_heads=n_heads, d_head=d_head,
                               scale=scale, fused_heads=fused_heads)

    return pl.pallas_call(
        kernel,
        out_shape=jax.ShapeDtypeStruct((B, S, D), x.dtype),
        grid=grid,
        in_specs=[
            pl.BlockSpec((bt, S, D), lambda i: (i, 0, 0)),   # x (a tile of batches)
            const2d((D, hd3)),                               # wqkv
            const2d((1, hd3)),                               # bqkv
            const2d((hd, D)),                                # wo
            const2d((1, D)),                                 # bo
            const2d((1, D)),                                 # ln weight
            const2d((1, D)),                                 # ln bias
            const2d((D, d_inner)),                           # w1
            const2d((1, d_inner)),                           # b1
            const2d((d_inner, D)),                           # w2
            const2d((1, D)),                                 # b2
        ],
        out_specs=pl.BlockSpec((bt, S, D), lambda i: (i, 0, 0)),
        compiler_params=pltpu.CompilerParams(
            dimension_semantics=("parallel",),
            vmem_limit_bytes=prof["vmem_limit_bytes"]),
    )(x, params["wqkv"], params["bqkv"], params["wo"], params["bo"],
      params["ln_w"], params["ln_b"], params["w1"], params["b1"],
      params["w2"], params["b2"])


def reference(x, p, *, n_heads, d_head, scale=True):
    """Pure-JAX reference mirroring the PyTorch forward (mask=None, dropout p=0)."""
    B, S, D = x.shape
    hd = n_heads * d_head
    qkv = x @ p["wqkv"] + p["bqkv"]                       # (B,S,3*hd)
    q, k, v = jnp.split(qkv, 3, axis=-1)
    q = q.reshape(B, S, n_heads, d_head).transpose(0, 2, 1, 3)
    k = k.reshape(B, S, n_heads, d_head).transpose(0, 2, 1, 3)
    v = v.reshape(B, S, n_heads, d_head).transpose(0, 2, 1, 3)
    scores = jnp.einsum("bhqd,bhkd->bhqk", q, k)
    if scale:
        scores = scores / (d_head ** 0.5)
    prob = jax.nn.softmax(scores, axis=-1)
    av = jnp.einsum("bhqk,bhkd->bhqd", prob, v).transpose(0, 2, 1, 3).reshape(B, S, hd)
    attn_out = av @ p["wo"] + p["bo"]
    y = x + attn_out
    mu = y.mean(-1, keepdims=True)
    var = ((y - mu) ** 2).mean(-1, keepdims=True)
    y = (y - mu) * jax.lax.rsqrt(var + 1e-5) * p["ln_w"] + p["ln_b"]
    h1 = jnp.maximum(y @ p["w1"] + p["b1"], 0.0)
    return (h1 @ p["w2"] + p["b2"]) + y


if __name__ == "__main__":
    # Small shapes implied by the module: (batch, seq, d_model)
    B, S = 2, 8
    n_heads, d_model, d_head, d_inner = 4, 32, 8, 64
    hd = n_heads * d_head

    key = jax.random.PRNGKey(0)
    ks = jax.random.split(key, 12)

    def init(k, shape, fan_in):
        bound = 1.0 / (fan_in ** 0.5)
        return jax.random.uniform(k, shape, jnp.float32, -bound, bound)

    params = {
        "wqkv": init(ks[0], (d_model, 3 * hd), d_model),
        "bqkv": init(ks[1], (1, 3 * hd), d_model),
        "wo":   init(ks[2], (hd, d_model), hd),
        "bo":   init(ks[3], (1, d_model), hd),
        "ln_w": jnp.ones((1, d_model), jnp.float32),
        "ln_b": jnp.zeros((1, d_model), jnp.float32),
        "w1":   init(ks[4], (d_model, d_inner), d_model),
        "b1":   init(ks[5], (1, d_inner), d_model),
        "w2":   init(ks[6], (d_inner, d_model), d_inner),
        "b2":   init(ks[7], (1, d_model), d_inner),
    }
    x = jax.random.normal(ks[8], (B, S, d_model), jnp.float32)

    ref = reference(x, params, n_heads=n_heads, d_head=d_head, scale=True)
    run = functools.partial(decoder_layer, n_heads=n_heads, d_head=d_head, scale=True)

    # Optimized path first (fused-head relayout + single-buffered weights); fall back to
    # the conservative per-head path if this Mosaic version cannot lower it.
    out = None
    use_fused = True
    try:
        out = jax.block_until_ready(run(x, params, fused_heads=True,
                                        single_buffer_weights=True))
        use_fused = bool(jnp.allclose(out, ref, atol=2e-2, rtol=2e-2))
    except Exception:
        use_fused = False
    if not use_fused:
        out = jax.block_until_ready(run(x, params, fused_heads=False,
                                        single_buffer_weights=False))

    assert out.shape == (B, S, d_model)
    # Tolerance accounts for pl.reciprocal(approx=True) in the softmax normalization.
    assert jnp.allclose(out, ref, atol=2e-2, rtol=2e-2), \
        f"max abs err = {jnp.max(jnp.abs(out - ref))}"

    # bf16 weights/activations: exercises the bf16 MXU-feed path (f32 accumulation inside).
    params_bf16 = {k2: v2.astype(jnp.bfloat16) for k2, v2 in params.items()}
    x_bf16 = x.astype(jnp.bfloat16)
    try:
        out_bf16 = run(x_bf16, params_bf16, fused_heads=use_fused,
                       single_buffer_weights=use_fused)
    except Exception:
        out_bf16 = run(x_bf16, params_bf16, fused_heads=False,
                       single_buffer_weights=False)
    out_bf16 = jax.block_until_ready(out_bf16).astype(jnp.float32)
    assert jnp.allclose(out_bf16, ref, atol=1e-1, rtol=1e-1), \
        f"bf16 max abs err = {jnp.max(jnp.abs(out_bf16 - ref))}"

    print("KERNEL_OK")
</pallas_src>

<mosaic_0001>
module attributes {stable_mosaic.version = 11 : i64} {
  func.func @decoder_layer_kernel(%arg0: i32, %arg1: memref<2x8x32xf32, #tpu.memory_space<vmem>>, %arg2: memref<32x96xf32, #tpu.memory_space<vmem>>, %arg3: memref<1x96xf32, #tpu.memory_space<vmem>>, %arg4: memref<32x32xf32, #tpu.memory_space<vmem>>, %arg5: memref<1x32xf32, #tpu.memory_space<vmem>>, %arg6: memref<1x32xf32, #tpu.memory_space<vmem>>, %arg7: memref<1x32xf32, #tpu.memory_space<vmem>>, %arg8: memref<32x64xf32, #tpu.memory_space<vmem>>, %arg9: memref<1x64xf32, #tpu.memory_space<vmem>>, %arg10: memref<64x32xf32, #tpu.memory_space<vmem>>, %arg11: memref<1x32xf32, #tpu.memory_space<vmem>>, %arg12: memref<2x8x32xf32, #tpu.memory_space<vmem>>) attributes {dimension_semantics = [#tpu.dimension_semantics<parallel>], iteration_bounds = array<i64: 1>, scalar_prefetch = 0 : i64, scratch_operands = 0 : i64, tpu.core_type = #tpu.core_type<tc>, window_params = [{transform_indices = @transform_0, window_bounds = array<i64: 2, 8, 32>}, {pipeline_mode = #tpu.pipeline_mode<synchronous>, transform_indices = @transform_1, window_bounds = array<i64: 32, 96>}, {pipeline_mode = #tpu.pipeline_mode<synchronous>, transform_indices = @transform_2, window_bounds = array<i64: 1, 96>}, {pipeline_mode = #tpu.pipeline_mode<synchronous>, transform_indices = @transform_3, window_bounds = array<i64: 32, 32>}, {pipeline_mode = #tpu.pipeline_mode<synchronous>, transform_indices = @transform_4, window_bounds = array<i64: 1, 32>}, {pipeline_mode = #tpu.pipeline_mode<synchronous>, transform_indices = @transform_5, window_bounds = array<i64: 1, 32>}, {pipeline_mode = #tpu.pipeline_mode<synchronous>, transform_indices = @transform_6, window_bounds = array<i64: 1, 32>}, {pipeline_mode = #tpu.pipeline_mode<synchronous>, transform_indices = @transform_7, window_bounds = array<i64: 32, 64>}, {pipeline_mode = #tpu.pipeline_mode<synchronous>, transform_indices = @transform_8, window_bounds = array<i64: 1, 64>}, {pipeline_mode = #tpu.pipeline_mode<synchronous>, transform_indices = @transform_9, window_bounds = array<i64: 64, 32>}, {pipeline_mode = #tpu.pipeline_mode<synchronous>, transform_indices = @transform_10, window_bounds = array<i64: 1, 32>}, {transform_indices = @transform_11, window_bounds = array<i64: 2, 8, 32>}]} {
    %c0 = arith.constant 0 : index
    %c0_0 = arith.constant 0 : index
    %c0_1 = arith.constant 0 : index
    %0 = vector.load %arg1[%c0, %c0_0, %c0_1] : memref<2x8x32xf32, #tpu.memory_space<vmem>>, vector<2x8x32xf32>
    %1 = vector.shape_cast %0 : vector<2x8x32xf32> to vector<16x32xf32>
    %c0_2 = arith.constant 0 : index
    %c0_3 = arith.constant 0 : index
    %2 = vector.load %arg2[%c0_2, %c0_3] : memref<32x96xf32, #tpu.memory_space<vmem>>, vector<32x96xf32>
    %cst = arith.constant dense<0.000000e+00> : vector<16x96xf32>
    %3 = tpu.matmul %1, %2, %cst {dimension_numbers = #tpu.dot_dimension_numbers<[1], [0], [0], [1], [0, 0, 1, 1], [], []>} : vector<16x32xf32>, vector<32x96xf32>, vector<16x96xf32> -> vector<16x96xf32>
    %c0_4 = arith.constant 0 : index
    %c0_5 = arith.constant 0 : index
    %4 = vector.load %arg3[%c0_4, %c0_5] : memref<1x96xf32, #tpu.memory_space<vmem>>, vector<1x96xf32>
    %5 = vector.broadcast %4 : vector<1x96xf32> to vector<16x96xf32>
    %6 = arith.addf %3, %5 : vector<16x96xf32>
    %7 = vector.shape_cast %6 : vector<16x96xf32> to vector<16x12x8xf32>
    %8 = tpu.transpose %7, [1, 0, 2] : vector<16x12x8xf32> -> vector<12x16x8xf32>
    %9 = vector.shape_cast %8 : vector<12x16x8xf32> to vector<24x8x8xf32>
    %10 = vector.extract_strided_slice %9 {offsets = [0, 0, 0], sizes = [8, 8, 8], strides = [1, 1, 1]} : vector<24x8x8xf32> to vector<8x8x8xf32>
    %11 = vector.extract_strided_slice %9 {offsets = [8, 0, 0], sizes = [8, 8, 8], strides = [1, 1, 1]} : vector<24x8x8xf32> to vector<8x8x8xf32>
    %12 = vector.extract_strided_slice %9 {offsets = [16, 0, 0], sizes = [8, 8, 8], strides = [1, 1, 1]} : vector<24x8x8xf32> to vector<8x8x8xf32>
    %cst_6 = arith.constant 0.353553385 : f32
    %13 = vector.broadcast %cst_6 : f32 to vector<8x8x8xf32>
    %14 = arith.mulf %10, %13 : vector<8x8x8xf32>
    "tpu.trace_start"() <{level = 10 : i32, message = "nqd,nkd->nqk"}> : () -> ()
    %cst_7 = arith.constant dense<0.000000e+00> : vector<8x8x8xf32>
    %15 = tpu.matmul %14, %11, %cst_7 {dimension_numbers = #tpu.dot_dimension_numbers<[2], [2], [1], [1], [0, 0, 0, 1, 1, 1], [0], [0]>} : vector<8x8x8xf32>, vector<8x8x8xf32>, vector<8x8x8xf32> -> vector<8x8x8xf32>
    "tpu.trace_stop"() : () -> ()
    %cst_8 = arith.constant dense<0xFF800000> : vector<8x8xf32>
    %16 = vector.multi_reduction <maximumf>, %15, %cst_8 [2] : vector<8x8x8xf32> to vector<8x8xf32>
    %17 = vector.shape_cast %16 : vector<8x8xf32> to vector<8x8x1xf32>
    %18 = vector.broadcast %17 : vector<8x8x1xf32> to vector<8x8x8xf32>
    %19 = arith.subf %15, %18 : vector<8x8x8xf32>
    %20 = math.exp %19 : vector<8x8x8xf32>
    %cst_9 = arith.constant dense<0.000000e+00> : vector<8x8xf32>
    %21 = vector.multi_reduction <add>, %20, %cst_9 [2] : vector<8x8x8xf32> to vector<8x8xf32>
    %22 = vector.shape_cast %21 : vector<8x8xf32> to vector<8x8x1xf32>
    "tpu.trace_start"() <{level = 10 : i32, message = "nqk,nkd->nqd"}> : () -> ()
    %cst_10 = arith.constant dense<0.000000e+00> : vector<8x8x8xf32>
    %23 = tpu.matmul %20, %12, %cst_10 {dimension_numbers = #tpu.dot_dimension_numbers<[2], [1], [1], [2], [0, 0, 0, 1, 1, 2], [0], [0]>} : vector<8x8x8xf32>, vector<8x8x8xf32>, vector<8x8x8xf32> -> vector<8x8x8xf32>
    "tpu.trace_stop"() : () -> ()
    %24 = tpu.reciprocal %22 {approx = true} : vector<8x8x1xf32> -> vector<8x8x1xf32>
    %25 = vector.broadcast %24 : vector<8x8x1xf32> to vector<8x8x8xf32>
    %26 = arith.mulf %23, %25 : vector<8x8x8xf32>
    %27 = vector.shape_cast %26 : vector<8x8x8xf32> to vector<4x16x8xf32>
    %28 = tpu.transpose %27, [1, 0, 2] : vector<4x16x8xf32> -> vector<16x4x8xf32>
    %29 = vector.shape_cast %28 : vector<16x4x8xf32> to vector<16x32xf32>
    %c0_11 = arith.constant 0 : index
    %c0_12 = arith.constant 0 : index
    %30 = vector.load %arg4[%c0_11, %c0_12] : memref<32x32xf32, #tpu.memory_space<vmem>>, vector<32x32xf32>
    %cst_13 = arith.constant dense<0.000000e+00> : vector<16x32xf32>
    %31 = tpu.matmul %29, %30, %cst_13 {dimension_numbers = #tpu.dot_dimension_numbers<[1], [0], [0], [1], [0, 0, 1, 1], [], []>} : vector<16x32xf32>, vector<32x32xf32>, vector<16x32xf32> -> vector<16x32xf32>
    %c0_14 = arith.constant 0 : index
    %c0_15 = arith.constant 0 : index
    %32 = vector.load %arg5[%c0_14, %c0_15] : memref<1x32xf32, #tpu.memory_space<vmem>>, vector<1x32xf32>
    %33 = vector.broadcast %32 : vector<1x32xf32> to vector<16x32xf32>
    %34 = arith.addf %31, %33 : vector<16x32xf32>
    %35 = arith.addf %1, %34 : vector<16x32xf32>
    %cst_16 = arith.constant dense<0.000000e+00> : vector<16xf32>
    %36 = vector.multi_reduction <add>, %35, %cst_16 [1] : vector<16x32xf32> to vector<16xf32>
    %37 = vector.shape_cast %36 : vector<16xf32> to vector<16x1xf32>
    %cst_17 = arith.constant 3.200000e+01 : f32
    %38 = vector.broadcast %cst_17 : f32 to vector<16x1xf32>
    %39 = arith.divf %37, %38 : vector<16x1xf32>
    %40 = vector.broadcast %39 : vector<16x1xf32> to vector<16x32xf32>
    %41 = arith.subf %35, %40 : vector<16x32xf32>
    %42 = arith.mulf %41, %41 : vector<16x32xf32>
    %cst_18 = arith.constant dense<0.000000e+00> : vector<16xf32>
    %43 = vector.multi_reduction <add>, %42, %cst_18 [1] : vector<16x32xf32> to vector<16xf32>
    %44 = vector.shape_cast %43 : vector<16xf32> to vector<16x1xf32>
    %cst_19 = arith.constant 3.200000e+01 : f32
    %45 = vector.broadcast %cst_19 : f32 to vector<16x1xf32>
    %46 = arith.divf %44, %45 : vector<16x1xf32>
    %47 = vector.broadcast %39 : vector<16x1xf32> to vector<16x32xf32>
    %48 = arith.subf %35, %47 : vector<16x32xf32>
    %cst_20 = arith.constant 9.99999974E-6 : f32
    %49 = vector.broadcast %cst_20 : f32 to vector<16x1xf32>
    %50 = arith.addf %46, %49 : vector<16x1xf32>
    %51 = math.rsqrt %50 : vector<16x1xf32>
    %52 = vector.broadcast %51 : vector<16x1xf32> to vector<16x32xf32>
    %53 = arith.mulf %48, %52 : vector<16x32xf32>
    %c0_21 = arith.constant 0 : index
    %c0_22 = arith.constant 0 : index
    %54 = vector.load %arg6[%c0_21, %c0_22] : memref<1x32xf32, #tpu.memory_space<vmem>>, vector<1x32xf32>
    %55 = vector.broadcast %54 : vector<1x32xf32> to vector<16x32xf32>
    %56 = arith.mulf %53, %55 : vector<16x32xf32>
    %c0_23 = arith.constant 0 : index
    %c0_24 = arith.constant 0 : index
    %57 = vector.load %arg7[%c0_23, %c0_24] : memref<1x32xf32, #tpu.memory_space<vmem>>, vector<1x32xf32>
    %58 = vector.broadcast %57 : vector<1x32xf32> to vector<16x32xf32>
    %59 = arith.addf %56, %58 : vector<16x32xf32>
    %c0_25 = arith.constant 0 : index
    %c0_26 = arith.constant 0 : index
    %60 = vector.load %arg8[%c0_25, %c0_26] : memref<32x64xf32, #tpu.memory_space<vmem>>, vector<32x64xf32>
    %cst_27 = arith.constant dense<0.000000e+00> : vector<16x64xf32>
    %61 = tpu.matmul %59, %60, %cst_27 {dimension_numbers = #tpu.dot_dimension_numbers<[1], [0], [0], [1], [0, 0, 1, 1], [], []>} : vector<16x32xf32>, vector<32x64xf32>, vector<16x64xf32> -> vector<16x64xf32>
    %c0_28 = arith.constant 0 : index
    %c0_29 = arith.constant 0 : index
    %62 = vector.load %arg9[%c0_28, %c0_29] : memref<1x64xf32, #tpu.memory_space<vmem>>, vector<1x64xf32>
    %63 = vector.broadcast %62 : vector<1x64xf32> to vector<16x64xf32>
    %64 = arith.addf %61, %63 : vector<16x64xf32>
    %cst_30 = arith.constant 0.000000e+00 : f32
    %65 = vector.broadcast %cst_30 : f32 to vector<16x64xf32>
    %66 = arith.maximumf %64, %65 : vector<16x64xf32>
    %c0_31 = arith.constant 0 : index
    %c0_32 = arith.constant 0 : index
    %67 = vector.load %arg10[%c0_31, %c0_32] : memref<64x32xf32, #tpu.memory_space<vmem>>, vector<64x32xf32>
    %cst_33 = arith.constant dense<0.000000e+00> : vector<16x32xf32>
    %68 = tpu.matmul %66, %67, %cst_33 {dimension_numbers = #tpu.dot_dimension_numbers<[1], [0], [0], [1], [0, 0, 1, 1], [], []>} : vector<16x64xf32>, vector<64x32xf32>, vector<16x32xf32> -> vector<16x32xf32>
    %c0_34 = arith.constant 0 : index
    %c0_35 = arith.constant 0 : index
    %69 = vector.load %arg11[%c0_34, %c0_35] : memref<1x32xf32, #tpu.memory_space<vmem>>, vector<1x32xf32>
    %70 = vector.broadcast %69 : vector<1x32xf32> to vector<16x32xf32>
    %71 = arith.addf %68, %70 : vector<16x32xf32>
    %72 = arith.addf %71, %59 : vector<16x32xf32>
    %73 = vector.shape_cast %72 : vector<16x32xf32> to vector<2x8x32xf32>
    %c0_36 = arith.constant 0 : index
    %c0_37 = arith.constant 0 : index
    %c0_38 = arith.constant 0 : index
    %74 = vector.load %arg12[%c0_36, %c0_37, %c0_38] : memref<2x8x32xf32, #tpu.memory_space<vmem>>, vector<2x8x32xf32>
    tpu.vector_store %arg12[%c0_36, %c0_37, %c0_38], %73 {strides = array<i32>} : memref<2x8x32xf32, #tpu.memory_space<vmem>>, vector<2x8x32xf32>,
    return
  }
  func.func @transform_0(%arg0: i32) -> (i32, i32, i32) {
    %c0_i32 = arith.constant 0 : i32
    %c0_i32_0 = arith.constant 0 : i32
    %c0_i32_1 = arith.constant 0 : i32
    return %arg0, %c0_i32, %c0_i32_0 : i32, i32, i32
  }
  func.func @transform_1(%arg0: i32) -> (i32, i32) {
    %c0_i32 = arith.constant 0 : i32
    %c0_i32_0 = arith.constant 0 : i32
    %c0_i32_1 = arith.constant 0 : i32
    return %c0_i32, %c0_i32_0 : i32, i32
  }
  func.func @transform_2(%arg0: i32) -> (i32, i32) {
    %c0_i32 = arith.constant 0 : i32
    %c0_i32_0 = arith.constant 0 : i32
    %c0_i32_1 = arith.constant 0 : i32
    return %c0_i32, %c0_i32_0 : i32, i32
  }
  func.func @transform_3(%arg0: i32) -> (i32, i32) {
    %c0_i32 = arith.constant 0 : i32
    %c0_i32_0 = arith.constant 0 : i32
    %c0_i32_1 = arith.constant 0 : i32
    return %c0_i32, %c0_i32_0 : i32, i32
  }
  func.func @transform_4(%arg0: i32) -> (i32, i32) {
    %c0_i32 = arith.constant 0 : i32
    %c0_i32_0 = arith.constant 0 : i32
    %c0_i32_1 = arith.constant 0 : i32
    return %c0_i32, %c0_i32_0 : i32, i32
  }
  func.func @transform_5(%arg0: i32) -> (i32, i32) {
    %c0_i32 = arith.constant 0 : i32
    %c0_i32_0 = arith.constant 0 : i32
    %c0_i32_1 = arith.constant 0 : i32
    return %c0_i32, %c0_i32_0 : i32, i32
  }
  func.func @transform_6(%arg0: i32) -> (i32, i32) {
    %c0_i32 = arith.constant 0 : i32
    %c0_i32_0 = arith.constant 0 : i32
    %c0_i32_1 = arith.constant 0 : i32
    return %c0_i32, %c0_i32_0 : i32, i32
  }
  func.func @transform_7(%arg0: i32) -> (i32, i32) {
    %c0_i32 = arith.constant 0 : i32
    %c0_i32_0 = arith.constant 0 : i32
    %c0_i32_1 = arith.constant 0 : i32
    return %c0_i32, %c0_i32_0 : i32, i32
  }
  func.func @transform_8(%arg0: i32) -> (i32, i32) {
    %c0_i32 = arith.constant 0 : i32
    %c0_i32_0 = arith.constant 0 : i32
    %c0_i32_1 = arith.constant 0 : i32
    return %c0_i32, %c0_i32_0 : i32, i32
  }
  func.func @transform_9(%arg0: i32) -> (i32, i32) {
    %c0_i32 = arith.constant 0 : i32
    %c0_i32_0 = arith.constant 0 : i32
    %c0_i32_1 = arith.constant 0 : i32
    return %c0_i32, %c0_i32_0 : i32, i32
  }
  func.func @transform_10(%arg0: i32) -> (i32, i32) {
    %c0_i32 = arith.constant 0 : i32
    %c0_i32_0 = arith.constant 0 : i32
    %c0_i32_1 = arith.constant 0 : i32
    return %c0_i32, %c0_i32_0 : i32, i32
  }
  func.func @transform_11(%arg0: i32) -> (i32, i32, i32) {
    %c0_i32 = arith.constant 0 : i32
    %c0_i32_0 = arith.constant 0 : i32
    %c0_i32_1 = arith.constant 0 : i32
    return %arg0, %c0_i32, %c0_i32_0 : i32, i32, i32
  }
}

module attributes {stable_mosaic.version = 11 : i64} {
  func.func @decoder_layer_kernel(%arg0: i32, %arg1: memref<2x8x32xf32, #tpu.memory_space<vmem>>, %arg2: memref<32x96xf32, #tpu.memory_space<vmem>>, %arg3: memref<1x96xf32, #tpu.memory_space<vmem>>, %arg4: memref<32x32xf32, #tpu.memory_space<vmem>>, %arg5: memref<1x32xf32, #tpu.memory_space<vmem>>, %arg6: memref<1x32xf32, #tpu.memory_space<vmem>>, %arg7: memref<1x32xf32, #tpu.memory_space<vmem>>, %arg8: memref<32x64xf32, #tpu.memory_space<vmem>>, %arg9: memref<1x64xf32, #tpu.memory_space<vmem>>, %arg10: memref<64x32xf32, #tpu.memory_space<vmem>>, %arg11: memref<1x32xf32, #tpu.memory_space<vmem>>, %arg12: memref<2x8x32xf32, #tpu.memory_space<vmem>>) attributes {dimension_semantics = [#tpu.dimension_semantics<parallel>], iteration_bounds = array<i64: 1>, scalar_prefetch = 0 : i64, scratch_operands = 0 : i64, tpu.core_type = #tpu.core_type<tc>, window_params = [{transform_indices = @transform_0, window_bounds = array<i64: 2, 8, 32>}, {pipeline_mode = #tpu.pipeline_mode<synchronous>, transform_indices = @transform_1, window_bounds = array<i64: 32, 96>}, {pipeline_mode = #tpu.pipeline_mode<synchronous>, transform_indices = @transform_2, window_bounds = array<i64: 1, 96>}, {pipeline_mode = #tpu.pipeline_mode<synchronous>, transform_indices = @transform_3, window_bounds = array<i64: 32, 32>}, {pipeline_mode = #tpu.pipeline_mode<synchronous>, transform_indices = @transform_4, window_bounds = array<i64: 1, 32>}, {pipeline_mode = #tpu.pipeline_mode<synchronous>, transform_indices = @transform_5, window_bounds = array<i64: 1, 32>}, {pipeline_mode = #tpu.pipeline_mode<synchronous>, transform_indices = @transform_6, window_bounds = array<i64: 1, 32>}, {pipeline_mode = #tpu.pipeline_mode<synchronous>, transform_indices = @transform_7, window_bounds = array<i64: 32, 64>}, {pipeline_mode = #tpu.pipeline_mode<synchronous>, transform_indices = @transform_8, window_bounds = array<i64: 1, 64>}, {pipeline_mode = #tpu.pipeline_mode<synchronous>, transform_indices = @transform_9, window_bounds = array<i64: 64, 32>}, {pipeline_mode = #tpu.pipeline_mode<synchronous>, transform_indices = @transform_10, window_bounds = array<i64: 1, 32>}, {transform_indices = @transform_11, window_bounds = array<i64: 2, 8, 32>}]} {
    %c0 = arith.constant 0 : index
    %c0_0 = arith.constant 0 : index
    %c0_1 = arith.constant 0 : index
    %0 = vector.load %arg1[%c0, %c0_0, %c0_1] : memref<2x8x32xf32, #tpu.memory_space<vmem>>, vector<2x8x32xf32>
    %1 = vector.shape_cast %0 : vector<2x8x32xf32> to vector<16x32xf32>
    %c0_2 = arith.constant 0 : index
    %c0_3 = arith.constant 0 : index
    %2 = vector.load %arg2[%c0_2, %c0_3] : memref<32x96xf32, #tpu.memory_space<vmem>>, vector<32x96xf32>
    %cst = arith.constant dense<0.000000e+00> : vector<16x96xf32>
    %3 = tpu.matmul %1, %2, %cst {dimension_numbers = #tpu.dot_dimension_numbers<[1], [0], [0], [1], [0, 0, 1, 1], [], []>} : vector<16x32xf32>, vector<32x96xf32>, vector<16x96xf32> -> vector<16x96xf32>
    %c0_4 = arith.constant 0 : index
    %c0_5 = arith.constant 0 : index
    %4 = vector.load %arg3[%c0_4, %c0_5] : memref<1x96xf32, #tpu.memory_space<vmem>>, vector<1x96xf32>
    %5 = vector.broadcast %4 : vector<1x96xf32> to vector<16x96xf32>
    %6 = arith.addf %3, %5 : vector<16x96xf32>
    %7 = vector.shape_cast %6 : vector<16x96xf32> to vector<2x8x96xf32>
    %8 = vector.extract_strided_slice %7 {offsets = [0, 0, 0], sizes = [2, 8, 8], strides = [1, 1, 1]} : vector<2x8x96xf32> to vector<2x8x8xf32>
    %9 = vector.extract_strided_slice %7 {offsets = [0, 0, 8], sizes = [2, 8, 8], strides = [1, 1, 1]} : vector<2x8x96xf32> to vector<2x8x8xf32>
    %10 = vector.extract_strided_slice %7 {offsets = [0, 0, 16], sizes = [2, 8, 8], strides = [1, 1, 1]} : vector<2x8x96xf32> to vector<2x8x8xf32>
    %11 = vector.extract_strided_slice %7 {offsets = [0, 0, 24], sizes = [2, 8, 8], strides = [1, 1, 1]} : vector<2x8x96xf32> to vector<2x8x8xf32>
    %12 = vector.shape_cast %8 : vector<2x8x8xf32> to vector<1x2x8x8xf32>
    %13 = vector.shape_cast %9 : vector<2x8x8xf32> to vector<1x2x8x8xf32>
    %14 = vector.shape_cast %10 : vector<2x8x8xf32> to vector<1x2x8x8xf32>
    %15 = vector.shape_cast %11 : vector<2x8x8xf32> to vector<1x2x8x8xf32>
    %16 = tpu.concatenate %12, %13, %14, %15 in 0 : vector<1x2x8x8xf32>, vector<1x2x8x8xf32>, vector<1x2x8x8xf32>, vector<1x2x8x8xf32> -> vector<4x2x8x8xf32>
    %17 = vector.shape_cast %16 : vector<4x2x8x8xf32> to vector<8x8x8xf32>
    %18 = vector.extract_strided_slice %7 {offsets = [0, 0, 32], sizes = [2, 8, 8], strides = [1, 1, 1]} : vector<2x8x96xf32> to vector<2x8x8xf32>
    %19 = vector.extract_strided_slice %7 {offsets = [0, 0, 40], sizes = [2, 8, 8], strides = [1, 1, 1]} : vector<2x8x96xf32> to vector<2x8x8xf32>
    %20 = vector.extract_strided_slice %7 {offsets = [0, 0, 48], sizes = [2, 8, 8], strides = [1, 1, 1]} : vector<2x8x96xf32> to vector<2x8x8xf32>
    %21 = vector.extract_strided_slice %7 {offsets = [0, 0, 56], sizes = [2, 8, 8], strides = [1, 1, 1]} : vector<2x8x96xf32> to vector<2x8x8xf32>
    %22 = vector.shape_cast %18 : vector<2x8x8xf32> to vector<1x2x8x8xf32>
    %23 = vector.shape_cast %19 : vector<2x8x8xf32> to vector<1x2x8x8xf32>
    %24 = vector.shape_cast %20 : vector<2x8x8xf32> to vector<1x2x8x8xf32>
    %25 = vector.shape_cast %21 : vector<2x8x8xf32> to vector<1x2x8x8xf32>
    %26 = tpu.concatenate %22, %23, %24, %25 in 0 : vector<1x2x8x8xf32>, vector<1x2x8x8xf32>, vector<1x2x8x8xf32>, vector<1x2x8x8xf32> -> vector<4x2x8x8xf32>
    %27 = vector.shape_cast %26 : vector<4x2x8x8xf32> to vector<8x8x8xf32>
    %28 = vector.extract_strided_slice %7 {offsets = [0, 0, 64], sizes = [2, 8, 8], strides = [1, 1, 1]} : vector<2x8x96xf32> to vector<2x8x8xf32>
    %29 = vector.extract_strided_slice %7 {offsets = [0, 0, 72], sizes = [2, 8, 8], strides = [1, 1, 1]} : vector<2x8x96xf32> to vector<2x8x8xf32>
    %30 = vector.extract_strided_slice %7 {offsets = [0, 0, 80], sizes = [2, 8, 8], strides = [1, 1, 1]} : vector<2x8x96xf32> to vector<2x8x8xf32>
    %31 = vector.extract_strided_slice %7 {offsets = [0, 0, 88], sizes = [2, 8, 8], strides = [1, 1, 1]} : vector<2x8x96xf32> to vector<2x8x8xf32>
    %32 = vector.shape_cast %28 : vector<2x8x8xf32> to vector<1x2x8x8xf32>
    %33 = vector.shape_cast %29 : vector<2x8x8xf32> to vector<1x2x8x8xf32>
    %34 = vector.shape_cast %30 : vector<2x8x8xf32> to vector<1x2x8x8xf32>
    %35 = vector.shape_cast %31 : vector<2x8x8xf32> to vector<1x2x8x8xf32>
    %36 = tpu.concatenate %32, %33, %34, %35 in 0 : vector<1x2x8x8xf32>, vector<1x2x8x8xf32>, vector<1x2x8x8xf32>, vector<1x2x8x8xf32> -> vector<4x2x8x8xf32>
    %37 = vector.shape_cast %36 : vector<4x2x8x8xf32> to vector<8x8x8xf32>
    %cst_6 = arith.constant 0.353553385 : f32
    %38 = vector.broadcast %cst_6 : f32 to vector<8x8x8xf32>
    %39 = arith.mulf %17, %38 : vector<8x8x8xf32>
    "tpu.trace_start"() <{level = 10 : i32, message = "nqd,nkd->nqk"}> : () -> ()
    %cst_7 = arith.constant dense<0.000000e+00> : vector<8x8x8xf32>
    %40 = tpu.matmul %39, %27, %cst_7 {dimension_numbers = #tpu.dot_dimension_numbers<[2], [2], [1], [1], [0, 0, 0, 1, 1, 1], [0], [0]>} : vector<8x8x8xf32>, vector<8x8x8xf32>, vector<8x8x8xf32> -> vector<8x8x8xf32>
    "tpu.trace_stop"() : () -> ()
    %cst_8 = arith.constant dense<0xFF800000> : vector<8x8xf32>
    %41 = vector.multi_reduction <maximumf>, %40, %cst_8 [2] : vector<8x8x8xf32> to vector<8x8xf32>
    %42 = vector.shape_cast %41 : vector<8x8xf32> to vector<8x8x1xf32>
    %43 = vector.broadcast %42 : vector<8x8x1xf32> to vector<8x8x8xf32>
    %44 = arith.subf %40, %43 : vector<8x8x8xf32>
    %45 = math.exp %44 : vector<8x8x8xf32>
    %cst_9 = arith.constant dense<0.000000e+00> : vector<8x8xf32>
    %46 = vector.multi_reduction <add>, %45, %cst_9 [2] : vector<8x8x8xf32> to vector<8x8xf32>
    %47 = vector.shape_cast %46 : vector<8x8xf32> to vector<8x8x1xf32>
    "tpu.trace_start"() <{level = 10 : i32, message = "nqk,nkd->nqd"}> : () -> ()
    %cst_10 = arith.constant dense<0.000000e+00> : vector<8x8x8xf32>
    %48 = tpu.matmul %45, %37, %cst_10 {dimension_numbers = #tpu.dot_dimension_numbers<[2], [1], [1], [2], [0, 0, 0, 1, 1, 2], [0], [0]>} : vector<8x8x8xf32>, vector<8x8x8xf32>, vector<8x8x8xf32> -> vector<8x8x8xf32>
    "tpu.trace_stop"() : () -> ()
    %49 = tpu.reciprocal %47 {approx = true} : vector<8x8x1xf32> -> vector<8x8x1xf32>
    %50 = vector.broadcast %49 : vector<8x8x1xf32> to vector<8x8x8xf32>
    %51 = arith.mulf %48, %50 : vector<8x8x8xf32>
    %52 = vector.shape_cast %51 : vector<8x8x8xf32> to vector<4x2x8x8xf32>
    %53 = vector.extract_strided_slice %52 {offsets = [0, 0, 0, 0], sizes = [1, 2, 8, 8], strides = [1, 1, 1, 1]} : vector<4x2x8x8xf32> to vector<1x2x8x8xf32>
    %54 = vector.shape_cast %53 : vector<1x2x8x8xf32> to vector<2x8x8xf32>
    %55 = vector.extract_strided_slice %52 {offsets = [1, 0, 0, 0], sizes = [1, 2, 8, 8], strides = [1, 1, 1, 1]} : vector<4x2x8x8xf32> to vector<1x2x8x8xf32>
    %56 = vector.shape_cast %55 : vector<1x2x8x8xf32> to vector<2x8x8xf32>
    %57 = vector.extract_strided_slice %52 {offsets = [2, 0, 0, 0], sizes = [1, 2, 8, 8], strides = [1, 1, 1, 1]} : vector<4x2x8x8xf32> to vector<1x2x8x8xf32>
    %58 = vector.shape_cast %57 : vector<1x2x8x8xf32> to vector<2x8x8xf32>
    %59 = vector.extract_strided_slice %52 {offsets = [3, 0, 0, 0], sizes = [1, 2, 8, 8], strides = [1, 1, 1, 1]} : vector<4x2x8x8xf32> to vector<1x2x8x8xf32>
    %60 = vector.shape_cast %59 : vector<1x2x8x8xf32> to vector<2x8x8xf32>
    %61 = tpu.concatenate %54, %56, %58, %60 in 2 : vector<2x8x8xf32>, vector<2x8x8xf32>, vector<2x8x8xf32>, vector<2x8x8xf32> -> vector<2x8x32xf32>
    %62 = vector.shape_cast %61 : vector<2x8x32xf32> to vector<16x32xf32>
    %c0_11 = arith.constant 0 : index
    %c0_12 = arith.constant 0 : index
    %63 = vector.load %arg4[%c0_11, %c0_12] : memref<32x32xf32, #tpu.memory_space<vmem>>, vector<32x32xf32>
    %cst_13 = arith.constant dense<0.000000e+00> : vector<16x32xf32>
    %64 = tpu.matmul %62, %63, %cst_13 {dimension_numbers = #tpu.dot_dimension_numbers<[1], [0], [0], [1], [0, 0, 1, 1], [], []>} : vector<16x32xf32>, vector<32x32xf32>, vector<16x32xf32> -> vector<16x32xf32>
    %c0_14 = arith.constant 0 : index
    %c0_15 = arith.constant 0 : index
    %65 = vector.load %arg5[%c0_14, %c0_15] : memref<1x32xf32, #tpu.memory_space<vmem>>, vector<1x32xf32>
    %66 = vector.broadcast %65 : vector<1x32xf32> to vector<16x32xf32>
    %67 = arith.addf %64, %66 : vector<16x32xf32>
    %68 = arith.addf %1, %67 : vector<16x32xf32>
    %cst_16 = arith.constant dense<0.000000e+00> : vector<16xf32>
    %69 = vector.multi_reduction <add>, %68, %cst_16 [1] : vector<16x32xf32> to vector<16xf32>
    %70 = vector.shape_cast %69 : vector<16xf32> to vector<16x1xf32>
    %cst_17 = arith.constant 3.200000e+01 : f32
    %71 = vector.broadcast %cst_17 : f32 to vector<16x1xf32>
    %72 = arith.divf %70, %71 : vector<16x1xf32>
    %73 = vector.broadcast %72 : vector<16x1xf32> to vector<16x32xf32>
    %74 = arith.subf %68, %73 : vector<16x32xf32>
    %75 = arith.mulf %74, %74 : vector<16x32xf32>
    %cst_18 = arith.constant dense<0.000000e+00> : vector<16xf32>
    %76 = vector.multi_reduction <add>, %75, %cst_18 [1] : vector<16x32xf32> to vector<16xf32>
    %77 = vector.shape_cast %76 : vector<16xf32> to vector<16x1xf32>
    %cst_19 = arith.constant 3.200000e+01 : f32
    %78 = vector.broadcast %cst_19 : f32 to vector<16x1xf32>
    %79 = arith.divf %77, %78 : vector<16x1xf32>
    %80 = vector.broadcast %72 : vector<16x1xf32> to vector<16x32xf32>
    %81 = arith.subf %68, %80 : vector<16x32xf32>
    %cst_20 = arith.constant 9.99999974E-6 : f32
    %82 = vector.broadcast %cst_20 : f32 to vector<16x1xf32>
    %83 = arith.addf %79, %82 : vector<16x1xf32>
    %84 = math.rsqrt %83 : vector<16x1xf32>
    %85 = vector.broadcast %84 : vector<16x1xf32> to vector<16x32xf32>
    %86 = arith.mulf %81, %85 : vector<16x32xf32>
    %c0_21 = arith.constant 0 : index
    %c0_22 = arith.constant 0 : index
    %87 = vector.load %arg6[%c0_21, %c0_22] : memref<1x32xf32, #tpu.memory_space<vmem>>, vector<1x32xf32>
    %88 = vector.broadcast %87 : vector<1x32xf32> to vector<16x32xf32>
    %89 = arith.mulf %86, %88 : vector<16x32xf32>
    %c0_23 = arith.constant 0 : index
    %c0_24 = arith.constant 0 : index
    %90 = vector.load %arg7[%c0_23, %c0_24] : memref<1x32xf32, #tpu.memory_space<vmem>>, vector<1x32xf32>
    %91 = vector.broadcast %90 : vector<1x32xf32> to vector<16x32xf32>
    %92 = arith.addf %89, %91 : vector<16x32xf32>
    %c0_25 = arith.constant 0 : index
    %c0_26 = arith.constant 0 : index
    %93 = vector.load %arg8[%c0_25, %c0_26] : memref<32x64xf32, #tpu.memory_space<vmem>>, vector<32x64xf32>
    %cst_27 = arith.constant dense<0.000000e+00> : vector<16x64xf32>
    %94 = tpu.matmul %92, %93, %cst_27 {dimension_numbers = #tpu.dot_dimension_numbers<[1], [0], [0], [1], [0, 0, 1, 1], [], []>} : vector<16x32xf32>, vector<32x64xf32>, vector<16x64xf32> -> vector<16x64xf32>
    %c0_28 = arith.constant 0 : index
    %c0_29 = arith.constant 0 : index
    %95 = vector.load %arg9[%c0_28, %c0_29] : memref<1x64xf32, #tpu.memory_space<vmem>>, vector<1x64xf32>
    %96 = vector.broadcast %95 : vector<1x64xf32> to vector<16x64xf32>
    %97 = arith.addf %94, %96 : vector<16x64xf32>
    %cst_30 = arith.constant 0.000000e+00 : f32
    %98 = vector.broadcast %cst_30 : f32 to vector<16x64xf32>
    %99 = arith.maximumf %97, %98 : vector<16x64xf32>
    %c0_31 = arith.constant 0 : index
    %c0_32 = arith.constant 0 : index
    %100 = vector.load %arg10[%c0_31, %c0_32] : memref<64x32xf32, #tpu.memory_space<vmem>>, vector<64x32xf32>
    %cst_33 = arith.constant dense<0.000000e+00> : vector<16x32xf32>
    %101 = tpu.matmul %99, %100, %cst_33 {dimension_numbers = #tpu.dot_dimension_numbers<[1], [0], [0], [1], [0, 0, 1, 1], [], []>} : vector<16x64xf32>, vector<64x32xf32>, vector<16x32xf32> -> vector<16x32xf32>
    %c0_34 = arith.constant 0 : index
    %c0_35 = arith.constant 0 : index
    %102 = vector.load %arg11[%c0_34, %c0_35] : memref<1x32xf32, #tpu.memory_space<vmem>>, vector<1x32xf32>
    %103 = vector.broadcast %102 : vector<1x32xf32> to vector<16x32xf32>
    %104 = arith.addf %101, %103 : vector<16x32xf32>
    %105 = arith.addf %104, %92 : vector<16x32xf32>
    %106 = vector.shape_cast %105 : vector<16x32xf32> to vector<2x8x32xf32>
    %c0_36 = arith.constant 0 : index
    %c0_37 = arith.constant 0 : index
    %c0_38 = arith.constant 0 : index
    %107 = vector.load %arg12[%c0_36, %c0_37, %c0_38] : memref<2x8x32xf32, #tpu.memory_space<vmem>>, vector<2x8x32xf32>
    tpu.vector_store %arg12[%c0_36, %c0_37, %c0_38], %106 {strides = array<i32>} : memref<2x8x32xf32, #tpu.memory_space<vmem>>, vector<2x8x32xf32>,
    return
  }
  func.func @transform_0(%arg0: i32) -> (i32, i32, i32) {
    %c0_i32 = arith.constant 0 : i32
    %c0_i32_0 = arith.constant 0 : i32
    %c0_i32_1 = arith.constant 0 : i32
    return %arg0, %c0_i32, %c0_i32_0 : i32, i32, i32
  }
  func.func @transform_1(%arg0: i32) -> (i32, i32) {
    %c0_i32 = arith.constant 0 : i32
    %c0_i32_0 = arith.constant 0 : i32
    %c0_i32_1 = arith.constant 0 : i32
    return %c0_i32, %c0_i32_0 : i32, i32
  }
  func.func @transform_2(%arg0: i32) -> (i32, i32) {
    %c0_i32 = arith.constant 0 : i32
    %c0_i32_0 = arith.constant 0 : i32
    %c0_i32_1 = arith.constant 0 : i32
    return %c0_i32, %c0_i32_0 : i32, i32
  }
  func.func @transform_3(%arg0: i32) -> (i32, i32) {
    %c0_i32 = arith.constant 0 : i32
    %c0_i32_0 = arith.constant 0 : i32
    %c0_i32_1 = arith.constant 0 : i32
    return %c0_i32, %c0_i32_0 : i32, i32
  }
  func.func @transform_4(%arg0: i32) -> (i32, i32) {
    %c0_i32 = arith.constant 0 : i32
    %c0_i32_0 = arith.constant 0 : i32
    %c0_i32_1 = arith.constant 0 : i32
    return %c0_i32, %c0_i32_0 : i32, i32
  }
  func.func @transform_5(%arg0: i32) -> (i32, i32) {
    %c0_i32 = arith.constant 0 : i32
    %c0_i32_0 = arith.constant 0 : i32
    %c0_i32_1 = arith.constant 0 : i32
    return %c0_i32, %c0_i32_0 : i32, i32
  }
  func.func @transform_6(%arg0: i32) -> (i32, i32) {
    %c0_i32 = arith.constant 0 : i32
    %c0_i32_0 = arith.constant 0 : i32
    %c0_i32_1 = arith.constant 0 : i32
    return %c0_i32, %c0_i32_0 : i32, i32
  }
  func.func @transform_7(%arg0: i32) -> (i32, i32) {
    %c0_i32 = arith.constant 0 : i32
    %c0_i32_0 = arith.constant 0 : i32
    %c0_i32_1 = arith.constant 0 : i32
    return %c0_i32, %c0_i32_0 : i32, i32
  }
  func.func @transform_8(%arg0: i32) -> (i32, i32) {
    %c0_i32 = arith.constant 0 : i32
    %c0_i32_0 = arith.constant 0 : i32
    %c0_i32_1 = arith.constant 0 : i32
    return %c0_i32, %c0_i32_0 : i32, i32
  }
  func.func @transform_9(%arg0: i32) -> (i32, i32) {
    %c0_i32 = arith.constant 0 : i32
    %c0_i32_0 = arith.constant 0 : i32
    %c0_i32_1 = arith.constant 0 : i32
    return %c0_i32, %c0_i32_0 : i32, i32
  }
  func.func @transform_10(%arg0: i32) -> (i32, i32) {
    %c0_i32 = arith.constant 0 : i32
    %c0_i32_0 = arith.constant 0 : i32
    %c0_i32_1 = arith.constant 0 : i32
    return %c0_i32, %c0_i32_0 : i32, i32
  }
  func.func @transform_11(%arg0: i32) -> (i32, i32, i32) {
    %c0_i32 = arith.constant 0 : i32
    %c0_i32_0 = arith.constant 0 : i32
    %c0_i32_1 = arith.constant 0 : i32
    return %arg0, %c0_i32, %c0_i32_0 : i32, i32, i32
  }
}

</mosaic_0001>

<bundles_post_ra>
// kernel: tpu_custom_call.1
= control target key start
LH: loop header
LB: loop body
LE: loop exit
PB: predicated region body
PF: predicated region fallthrough
CT: control target
= control target key end

     0   :  { %16 = vsyncpa [#allocation3], 0  ;;  %s4428_s0 = inlined_call_operand.hbm [shape: f32[2,8,32], index: 0, kind: input, shape index: {}]   ;;  %s4429_s1 = inlined_call_operand.hbm [shape: f32[32,96], index: 1, kind: input, shape index: {}]   ;;  %s4430_s2 = inlined_call_operand.hbm [shape: f32[1,96], index: 2, kind: input, shape index: {}]   ;;  %s4431_s3 = inlined_call_operand.hbm [shape: f32[32,32], index: 3, kind: input, shape index: {}]   ;;  %s4432_s4 = inlined_call_operand.hbm [shape: f32[1,32], index: 4, kind: input, shape index: {}]   ;;  %s4433_s5 = inlined_call_operand.hbm [shape: f32[1,32], index: 5, kind: input, shape index: {}]   ;;  %s4434_s6 = inlined_call_operand.hbm [shape: f32[1,32], index: 6, kind: input, shape index: {}]   ;;  %s4435_s7 = inlined_call_operand.hbm [shape: f32[32,64], index: 7, kind: input, shape index: {}]   ;;  %s4436_s8 = inlined_call_operand.hbm [shape: f32[1,64], index: 8, kind: input, shape index: {}]   ;;  %s4437_s9 = inlined_call_operand.hbm [shape: f32[64,32], index: 9, kind: input, shape index: {}]   ;;  %s4438_s10 = inlined_call_operand.hbm [shape: f32[1,32], index: 10, kind: input, shape index: {}]   ;;  %s4439_s11 = inlined_call_operand.hbm [shape: f32[2,8,32], index: 11, kind: output, shape index: {}]  }
   0x1   :  { %17 = vsyncpa [#allocation6], 0 }
   0x2   :  { %18 = vsyncpa [#allocation9], 0 }
   0x3   :  { %19 = vsyncpa [#allocation12], 0 }
   0x4   :  { %20 = vsyncpa [#allocation15], 0 }
   0x5   :  { %21 = vsyncpa [#allocation18], 0 }
   0x6   :  { %22 = vsyncpa [#allocation4], 0  ;;  %s3745_s17 = smov [#allocation5]   ;;  %s3746_s19 = smov [#allocation8]  }
   0x7   :  { %s40_s18 = sshll.u32 %s3745_s17, 4  ;;  %s62_s20 = sshll.u32 %s3746_s19, 4  ;;  %s41_s18 = int_to_ptr.vmem [resolvable:$true] %s40_s18  ;;  %s3836_s20 = int_to_ptr.vmem [resolvable:$true] %s62_s20 }
   0x8   :  { %s3467_s23 = scalar_lea.hbm %s4429_s1, 512 }
   0x9   :  { %p3468_p0 = scmp.ne.s32.totalorder %s4429_s1, %s3467_s23  ;;  %p3471_p1 = scmp.lt.u32.totalorder %s3467_s23, %s4429_s1 }
   0xb   :  { %p3473_p2 = pnand %p3471_p1, %p3468_p0 }
   0xd   :  { %3476 = shalt.err (!%p3473_p2)
}
   0xe   :  { %s3477_s28 = scalar_lea.vmem %s41_s18, 512  ;;  %p3482_p4 = scmp.lt.s32.totalorder %s41_s18, %s41_s18 }
   0xf   :  { %p3478_p3 = scmp.ne.s32.totalorder %s41_s18, %s3477_s28  ;;  %p3483_p5 = scmp.lt.s32.totalorder %s3477_s28, %s3477_s28 }
  0x11   :  { %p3484_p6 = por %p3483_p5, %p3482_p4 }
  0x13   :  { %p3485_p7 = pnand %p3484_p6, %p3478_p3 }
  0x15   :  { %3488 = shalt.err (!%p3485_p7)
}
  0x16   :  { %s3747_s29 = smov 128   ;;  %s3748_s30 = smov 8  }
  0x17   :  { %46 = dma.hbm_to_vmem [thread:$0]  %s4429_s1, 512, %s41_s18, [#allocation6], %s3747_s29, %s3747_s29, %s3748_s30  }
  0x18   :  { %s3489_s16 = scalar_lea.hbm %s4431_s3, 512 }
  0x19   :  { %p3490_p8 = scmp.ne.s32.totalorder %s4431_s3, %s3489_s16  ;;  %p3493_p9 = scmp.lt.u32.totalorder %s3489_s16, %s4431_s3 }
  0x1b   :  { %p3495_p10 = pnand %p3493_p9, %p3490_p8 }
  0x1d   :  { %3498 = shalt.err (!%p3495_p10)
}
  0x1e   :  { %s3499_s23 = scalar_lea.vmem %s3836_s20, 512  ;;  %p3504_p12 = scmp.lt.s32.totalorder %s3836_s20, %s3836_s20 }
  0x1f   :  { %p3500_p11 = scmp.ne.s32.totalorder %s3836_s20, %s3499_s23  ;;  %p3505_p13 = scmp.lt.s32.totalorder %s3499_s23, %s3499_s23 }
  0x21   :  { %p3506_p0 = por %p3505_p13, %p3504_p12 }
  0x23   :  { %p3507_p1 = pnand %p3506_p0, %p3500_p11 }
  0x25   :  { %3510 = shalt.err (!%p3507_p1)
}
  0x26   :  { %68 = dma.hbm_to_vmem [thread:$0]  %s4431_s3, 512, %s3836_s20, [#allocation9], %s3747_s29, %s3747_s29, %s3748_s30  }
  0x27   :  { %s3749_s24 = smov [#allocation11]   ;;  %s3750_s26 = smov [#allocation14]  }
  0x28   :  { %s85_s25 = sshll.u32 %s3749_s24, 4  ;;  %s104_s27 = sshll.u32 %s3750_s26, 4  ;;  %s86_s25 = int_to_ptr.vmem [resolvable:$true] %s85_s25  ;;  %s3873_s27 = int_to_ptr.vmem [resolvable:$true] %s104_s27 }
  0x29   :  { %s3511_s13 = scalar_lea.hbm %s4433_s5, 16 }
  0x2a   :  { %p3512_p2 = scmp.ne.s32.totalorder %s4433_s5, %s3511_s13  ;;  %p3515_p3 = scmp.lt.u32.totalorder %s3511_s13, %s4433_s5 }
  0x2c   :  { %p3517_p4 = pnand %p3515_p3, %p3512_p2 }
  0x2e   :  { %3520 = shalt.err (!%p3517_p4)
}
  0x2f   :  { %s3521_s3 = scalar_lea.vmem %s86_s25, 16  ;;  %s3525_s20 = scalar_lea.vmem %s86_s25, 32 }
  0x30   :  { %p3522_p5 = scmp.ne.s32.totalorder %s86_s25, %s3521_s3  ;;  %p3526_p6 = scmp.lt.s32.totalorder %s86_s25, %s86_s25 }
  0x31   :  { %p3527_p7 = scmp.lt.s32.totalorder %s3525_s20, %s3521_s3 }
  0x33   :  { %p3528_p8 = por %p3527_p7, %p3526_p6 }
  0x35   :  { %p3529_p9 = pnand %p3528_p8, %p3522_p5 }
  0x37   :  { %3532 = shalt.err (!%p3529_p9)
}
  0x38   :  { %88 = dma.hbm_to_vmem [thread:$0]  %s4433_s5, 16, %s86_s25, [#allocation12]  }
  0x39   :  { %s3533_s1 = scalar_lea.hbm %s4435_s7, 512 }
  0x3a   :  { %p3534_p10 = scmp.ne.s32.totalorder %s4435_s7, %s3533_s1  ;;  %p3537_p11 = scmp.lt.u32.totalorder %s3533_s1, %s4435_s7 }
  0x3c   :  { %p3539_p12 = pnand %p3537_p11, %p3534_p10 }
  0x3e   :  { %3542 = shalt.err (!%p3539_p12)
}
  0x3f   :  { %s3543_s12 = scalar_lea.vmem %s3873_s27, 512  ;;  %p3548_p0 = scmp.lt.s32.totalorder %s3873_s27, %s3873_s27 }
  0x40   :  { %p3544_p13 = scmp.ne.s32.totalorder %s3873_s27, %s3543_s12  ;;  %p3549_p1 = scmp.lt.s32.totalorder %s3543_s12, %s3543_s12 }
  0x42   :  { %p3550_p2 = por %p3549_p1, %p3548_p0 }
  0x44   :  { %p3551_p3 = pnand %p3550_p2, %p3544_p13 }
  0x46   :  { %3554 = shalt.err (!%p3551_p3)
}
  0x47   :  { %110 = dma.hbm_to_vmem [thread:$0]  %s4435_s7, 512, %s3873_s27, [#allocation15], %s3747_s29, %s3747_s29, %s3748_s30  }
  0x48   :  { %s3751_s13 = smov [#allocation17]   ;;  %s3752_s15 = smov [#allocation2]  }
  0x49   :  { %s126_s14 = sshll.u32 %s3751_s13, 4  ;;  %s28_s16 = sshll.u32 %s3752_s15, 4  ;;  %s127_s14 = int_to_ptr.vmem [resolvable:$true] %s126_s14  ;;  %s3907_s16 = int_to_ptr.vmem [resolvable:$true] %s28_s16 }
  0x4a   :  { %s3555_s20 = scalar_lea.hbm %s4437_s9, 1024 }
  0x4b   :  { %p3556_p4 = scmp.ne.s32.totalorder %s4437_s9, %s3555_s20  ;;  %p3559_p5 = scmp.lt.u32.totalorder %s3555_s20, %s4437_s9 }
  0x4d   :  { %p3561_p6 = pnand %p3559_p5, %p3556_p4 }
  0x4f   :  { %3564 = shalt.err (!%p3561_p6)
}
  0x50   :  { %s3565_s7 = scalar_lea.vmem %s127_s14, 1024  ;;  %p3570_p8 = scmp.lt.s32.totalorder %s127_s14, %s127_s14 }
  0x51   :  { %p3566_p7 = scmp.ne.s32.totalorder %s127_s14, %s3565_s7  ;;  %p3571_p9 = scmp.lt.s32.totalorder %s3565_s7, %s3565_s7 }
  0x53   :  { %p3572_p10 = por %p3571_p9, %p3570_p8 }
  0x55   :  { %p3573_p11 = pnand %p3572_p10, %p3566_p7 }
  0x57   :  { %3576 = shalt.err (!%p3573_p11)
}
  0x58   :  { %132 = dma.hbm_to_vmem [thread:$0]  %s4437_s9, 1024, %s127_s14, [#allocation18], %s3747_s29, %s3747_s29, %s3748_s30  }
  0x59   :  { %s3577_s26 = scalar_lea.hbm %s4428_s0, 256 }
  0x5a   :  { %p3578_p12 = scmp.ne.s32.totalorder %s4428_s0, %s3577_s26  ;;  %p3581_p13 = scmp.lt.u32.totalorder %s3577_s26, %s4428_s0 }
  0x5c   :  { %p3583_p0 = pnand %p3581_p13, %p3578_p12 }
  0x5e   :  { %3586 = shalt.err (!%p3583_p0)
}
  0x5f   :  { %s3587_s13 = scalar_lea.vmem %s3907_s16, 256  ;;  %p3592_p2 = scmp.lt.s32.totalorder %s3907_s16, %s3907_s16 }
  0x60   :  { %p3588_p1 = scmp.ne.s32.totalorder %s3907_s16, %s3587_s13  ;;  %p3593_p3 = scmp.lt.s32.totalorder %s3587_s13, %s3587_s13 }
  0x62   :  { %p3594_p4 = por %p3593_p3, %p3592_p2 }
  0x64   :  { %p3595_p5 = pnand %p3594_p4, %p3588_p1 }
  0x66   :  { %3598 = shalt.err (!%p3595_p5)
}
  0x67   :  { %34 = dma.hbm_to_vmem [thread:$0]  %s4428_s0, 256, %s3907_s16, [#allocation3], %s3747_s29, %s3747_s29, %s3748_s30  }
  0x68   :  { %s3753_s15 = smov [#allocation7]   ;;  %s3754_s3 = smov [#allocation10]  }
  0x69   :  { %s53_s17 = sshll.u32 %s3753_s15, 4  ;;  %s75_s20 = sshll.u32 %s3754_s3, 4  ;;  %s54_s17 = int_to_ptr.vmem [resolvable:$true] %s53_s17  ;;  %s76_s20 = int_to_ptr.vmem [resolvable:$true] %s75_s20 }
  0x6a   :  { %s3599_s22 = scalar_lea.hbm %s4430_s2, 16 }
  0x6b   :  { %p3600_p6 = scmp.ne.s32.totalorder %s4430_s2, %s3599_s22  ;;  %p3603_p7 = scmp.lt.u32.totalorder %s3599_s22, %s4430_s2 }
  0x6d   :  { %p3605_p8 = pnand %p3603_p7, %p3600_p6 }
  0x6f   :  { %3608 = shalt.err (!%p3605_p8)
}
  0x70   :  { %s3609_s0 = scalar_lea.vmem %s54_s17, 16  ;;  %s3613_s16 = scalar_lea.vmem %s54_s17, 32 }
  0x71   :  { %p3610_p9 = scmp.ne.s32.totalorder %s54_s17, %s3609_s0  ;;  %p3614_p10 = scmp.lt.s32.totalorder %s54_s17, %s54_s17 }
  0x72   :  { %p3615_p11 = scmp.lt.s32.totalorder %s3613_s16, %s3609_s0 }
  0x74   :  { %p3616_p12 = por %p3615_p11, %p3614_p10 }
  0x76   :  { %p3617_p13 = pnand %p3616_p12, %p3610_p9 }
  0x78   :  { %3620 = shalt.err (!%p3617_p13)
}
  0x79   :  { %56 = dma.hbm_to_vmem [thread:$0]  %s4430_s2, 16, %s54_s17, [#allocation6]  }
  0x7a   :  { %s3621_s12 = scalar_lea.hbm %s4432_s4, 16 }
  0x7b   :  { %p3622_p0 = scmp.ne.s32.totalorder %s4432_s4, %s3621_s12  ;;  %p3625_p1 = scmp.lt.u32.totalorder %s3621_s12, %s4432_s4 }
  0x7d   :  { %p3627_p2 = pnand %p3625_p1, %p3622_p0 }
  0x7f   :  { %3630 = shalt.err (!%p3627_p2)
}
  0x80   :  { %s3631_s14 = scalar_lea.vmem %s76_s20, 16  ;;  %s3635_s15 = scalar_lea.vmem %s76_s20, 32 }
  0x81   :  { %p3632_p3 = scmp.ne.s32.totalorder %s76_s20, %s3631_s14  ;;  %p3636_p4 = scmp.lt.s32.totalorder %s76_s20, %s76_s20 }
  0x82   :  { %p3637_p5 = scmp.lt.s32.totalorder %s3635_s15, %s3631_s14 }
  0x84   :  { %p3638_p6 = por %p3637_p5, %p3636_p4 }
  0x86   :  { %p3639_p7 = pnand %p3638_p6, %p3632_p3 }
  0x88   :  { %3642 = shalt.err (!%p3639_p7)
}
  0x89   :  { %78 = dma.hbm_to_vmem [thread:$0]  %s4432_s4, 16, %s76_s20, [#allocation9]  }
  0x8a   :  { %s3755_s3 = smov [#allocation13]   ;;  %s3756_s21 = smov [#allocation16]  }
  0x8b   :  { %s95_s19 = sshll.u32 %s3755_s3, 4  ;;  %s117_s22 = sshll.u32 %s3756_s21, 4  ;;  %s96_s19 = int_to_ptr.vmem [resolvable:$true] %s95_s19  ;;  %s118_s22 = int_to_ptr.vmem [resolvable:$true] %s117_s22 }
  0x8c   :  { %s3643_s27 = scalar_lea.hbm %s4434_s6, 16 }
  0x8d   :  { %p3644_p8 = scmp.ne.s32.totalorder %s4434_s6, %s3643_s27  ;;  %p3647_p9 = scmp.lt.u32.totalorder %s3643_s27, %s4434_s6 }
  0x8f   :  { %p3649_p10 = pnand %p3647_p9, %p3644_p8 }
  0x91   :  { %3652 = shalt.err (!%p3649_p10)
}
  0x92   :  { %s3653_s4 = scalar_lea.vmem %s96_s19, 16  ;;  %s3657_s20 = scalar_lea.vmem %s96_s19, 32 }
  0x93   :  { %p3654_p11 = scmp.ne.s32.totalorder %s96_s19, %s3653_s4  ;;  %p3658_p12 = scmp.lt.s32.totalorder %s96_s19, %s96_s19 }
  0x94   :  { %p3659_p13 = scmp.lt.s32.totalorder %s3657_s20, %s3653_s4 }
  0x96   :  { %p3660_p0 = por %p3659_p13, %p3658_p12 }
  0x98   :  { %p3661_p1 = pnand %p3660_p0, %p3654_p11 }
  0x9a   :  { %3664 = shalt.err (!%p3661_p1)
}
  0x9b   :  { %98 = dma.hbm_to_vmem [thread:$0]  %s4434_s6, 16, %s96_s19, [#allocation12]  }
  0x9c   :  { %s3665_s5 = scalar_lea.hbm %s4436_s8, 16 }
  0x9d   :  { %p3666_p2 = scmp.ne.s32.totalorder %s4436_s8, %s3665_s5  ;;  %p3669_p3 = scmp.lt.u32.totalorder %s3665_s5, %s4436_s8 }
  0x9f   :  { %p3671_p4 = pnand %p3669_p3, %p3666_p2 }
  0xa1   :  { %3674 = shalt.err (!%p3671_p4)
}
  0xa2   :  { %s3675_s15 = scalar_lea.vmem %s118_s22, 16  ;;  %s3679_s2 = scalar_lea.vmem %s118_s22, 32 }
  0xa3   :  { %p3676_p5 = scmp.ne.s32.totalorder %s118_s22, %s3675_s15  ;;  %p3680_p6 = scmp.lt.s32.totalorder %s118_s22, %s118_s22 }
  0xa4   :  { %p3681_p7 = scmp.lt.s32.totalorder %s3679_s2, %s3675_s15 }
  0xa6   :  { %p3682_p8 = por %p3681_p7, %p3680_p6 }
  0xa8   :  { %p3683_p9 = pnand %p3682_p8, %p3676_p5 }
  0xaa   :  { %3686 = shalt.err (!%p3683_p9)
}
  0xab   :  { %120 = dma.hbm_to_vmem [thread:$0]  %s4436_s8, 16, %s118_s22, [#allocation15]  }
  0xac   :  { %s3757_s3 = smov [#allocation19]   ;;  %s3687_s7 = scalar_lea.hbm %s4438_s10, 16 }
  0xad   :  { %s139_s19 = sshll.u32 %s3757_s3, 4  ;;  %p3688_p10 = scmp.ne.s32.totalorder %s4438_s10, %s3687_s7  ;;  %s140_s19 = int_to_ptr.vmem [resolvable:$true] %s139_s19 }
  0xae   :  { %p3691_p11 = scmp.lt.u32.totalorder %s3687_s7, %s4438_s10 }
  0xb0   :  { %p3693_p12 = pnand %p3691_p11, %p3688_p10 }
  0xb2   :  { %3696 = shalt.err (!%p3693_p12)
}
  0xb3   :  { %s3697_s18 = scalar_lea.vmem %s140_s19, 16  ;;  %s3701_s8 = scalar_lea.vmem %s140_s19, 32 }
  0xb4   :  { %p3698_p13 = scmp.ne.s32.totalorder %s140_s19, %s3697_s18  ;;  %p3702_p0 = scmp.lt.s32.totalorder %s140_s19, %s140_s19 }
  0xb5   :  { %p3703_p1 = scmp.lt.s32.totalorder %s3701_s8, %s3697_s18 }
  0xb7   :  { %p3704_p2 = por %p3703_p1, %p3702_p0 }
  0xb9   :  { %p3705_p3 = pnand %p3704_p2, %p3698_p13 }
  0xbb   :  { %3708 = shalt.err (!%p3705_p3)
}
  0xbc   :  { %142 = dma.hbm_to_vmem [thread:$0]  %s4438_s10, 16, %s140_s19, [#allocation18]  }
  0xbd   :  { %3731 = dma.done.wait [#allocation3], 256  }
  0xbe   :  { %3732 = vsyncadd [#allocation3], 4294967040 }
  0xbf   :  { %3733 = dma.done.wait [#allocation6], 528  }
  0xc0   :  { %3734 = vsyncadd [#allocation6], 4294966768 }
  0xc1   :  { %3735 = dma.done.wait [#allocation9], 528  }
  0xc2   :  { %3736 = vsyncadd [#allocation9], 4294966768 }
  0xc3   :  { %3737 = dma.done.wait [#allocation12], 32  }
  0xc4   :  { %3738 = vsyncadd [#allocation12], 4294967264 }
  0xc5   :  { %3739 = dma.done.wait [#allocation15], 528  }
  0xc6   :  { %3740 = vsyncadd [#allocation15], 4294966768 }
  0xc7   :  { %3741 = dma.done.wait [#allocation18], 1040  }
  0xc8   :  { %3742 = vsyncadd [#allocation18], 4294966256  ;;  %vm189_vm0 = vcmask 261120   ;;  %v178_v0 = vld [vmem:[#allocation5] sm:$0xff]  ;;  %v179_v1 = vld [vmem:[#allocation5 + $0x8] sm:$0xff]  ;;  %s3758_s10 = smov 88   ;;  %v344_v16 = vlaneseq }
  0xc9   :  { %v180_v2 = vld [vmem:[#allocation5 + $0x10] sm:$0xff]  ;;  %v3358_v3 = vpack.c.bf16 %v179_v1, %v178_v0  ;;  %v181_v4 = vld [vmem:[#allocation5 + $0x18] sm:$0xff]  ;;  %v3104_v8 = vld [vmem:[#allocation7] ss:$0 sm:$0xff]  ;;  %s3759_s20 = smov 96   ;;  %s3760_s24 = smov 72  }
  0xca   :  { %v176_v5 = vld [vmem:[#allocation2] sm:$0xff]  ;;  %v3362_v6 = vpack.c.bf16 %v181_v4, %v180_v2  ;;  %v177_v7 = vld [vmem:[#allocation2 + $0x8] sm:$0xff]  ;;  %s3761_s26 = smov 80   ;;  %s3762_s28 = smov 120   ;;  %v3765_v13 = vmov 0.0   ;;  %vm3768_vm1 = vmmov 0  }
  0xcb   :  { %3234 = vmatprep.mubr.msk.f32.mxu1 %vm189_vm0, %v176_v5  ;;  %3359 = vmatprep.subr.bf16.mxu1 %v3358_v3  ;;  %s3763_s12 = smov 112   ;;  %s3764_s5 = smov 104   ;;  %v3771_v14 = vmov 1983009808   ;;  %v3772_v17 = vmov 1934713408  }
  0xcc   :  { %3361 = vmatpush3.bf16.msra.mxu1 %v3358_v3  ;;  %3247 = vmatprep.subr.mxu0 %v3765_v13  ;;  %s3766_s25 = smov 56   ;;  %s3767_s13 = smov 64   ;;  %v342_v15 = vunpack.c.l.s4 %v3771_v14  ;;  %v406_v18 = vunpack.c.l.s4 %v3772_v17  ;;  %v345_v20 = vshrl.u32 %v344_v16, 7  ;;  %vm1163_vm2 = vcmask 64512  }
  0xcd   :  { %3363 = vmatprep.subr.bf16.mxu1 %v3362_v6  ;;  %3249 = vmatprep.mubr.msk.f32.mxu0 %vm3768_vm1, %v3765_v13  ;;  %s3769_s9 = smov 48   ;;  %s3770_s14 = smov 40   ;;  %vm2742_vm3 = vcmask 130048   ;;  %vm2745_vm4 = vcmask 195584   ;;  %vm2996_vm5 = vcmask 523264  }
  0xce   :  { %v343_v19 = vunpack.c.0.s8 %v342_v15  ;;  %v407_v23 = vunpack.c.0.s8 %v406_v18  ;;  %s3773_s15 = smov 16   ;;  %s3774_s2 = smov 24  }
  0xcf   :  { %s3775_s6 = smov [#allocation20]  }
  0xd0   :  { %3365 = vmatpush3.bf16.msra.mxu1 %v3362_v6  ;;  %v4038_v24 = vsub.s32 %v343_v19, %v345_v20  ;;  %v4040_v31 = vsub.s32 %v407_v23, %v345_v20  ;;  %s3087_s17 = sshll.u32 %s3775_s6, 4  ;;  %s3088_s17 = int_to_ptr.vmem [resolvable:$true] %s3087_s17 }
  0xd1   :  { %3237 = vmatprep.subr.mxu1 %v3765_v13  ;;  %s3709_s3 = scalar_lea.vmem %s3088_s17, 256  ;;  %p3714_p5 = scmp.lt.s32.totalorder %s3088_s17, %s3088_s17 }
  0xd2   :  { %p3710_p4 = scmp.ne.s32.totalorder %s3088_s17, %s3709_s3  ;;  %p3715_p6 = scmp.lt.s32.totalorder %s3709_s3, %s3709_s3 }
  0xd3   :  { %3235 = vmatmul.mubr.msk.f32.vlgmr.msra.gmra.mrb[0].mxu1 %vm189_vm0, %v177_v7 }
  0xd4   :  { %3239 = vmatprep.mubr.msk.f32.mxu1 %vm3768_vm1, %v3765_v13  ;;  %p3716_p7 = por %p3715_p6, %p3714_p5 }
  0xd6   :  { %p3717_p8 = pnand %p3716_p7, %p3710_p4 }
 0x1a6   :  { %v3236_v9 = vpop.f32.mrb[0].mxu1 }
 0x1a7   :  { %v4006_v10 = vadd.f32 %v3236_v9, %v3104_v8  ;;  %v262_v11 = vpop.f32.mrb[1].mxu1 }
 0x1a8   :  { %v4012_v12 = vadd.f32 %v3104_v8, %v262_v11 }
 0x1a9   :  { %299 = vrot.lane.b32.xlu0 %v4006_v10, %s3758_s10  ;;  %293 = vrot.lane.b32.xlu1 %v4006_v10, %s3759_s20 }
 0x1ad   :  { %311 = vrot.lane.b32.xlu0 %v4006_v10, %s3760_s24  ;;  %305 = vrot.lane.b32.xlu1 %v4006_v10, %s3761_s26 }
 0x1b1   :  { %275 = vrot.lane.b32.xlu1 %v4006_v10, %s3762_s28  ;;  %291 = vrot.lane.b32.xlu0 %v4012_v12, %s3759_s20 }
 0x1b5   :  { %303 = vrot.lane.b32.xlu1 %v4012_v12, %s3761_s26  ;;  %297 = vrot.lane.b32.xlu0 %v4012_v12, %s3758_s10 }
 0x1b9   :  { %309 = vrot.lane.b32.xlu1 %v4012_v12, %s3760_s24  ;;  %273 = vrot.lane.b32.xlu0 %v4012_v12, %s3762_s28 }
 0x1bd   :  { %279 = vrot.lane.b32.xlu1 %v4012_v12, %s3763_s12  ;;  %285 = vrot.lane.b32.xlu0 %v4012_v12, %s3764_s5 }
 0x1c1   :  { %287 = vrot.lane.b32.xlu1 %v4006_v10, %s3764_s5  ;;  %281 = vrot.lane.b32.xlu0 %v4006_v10, %s3763_s12 }
 0x1c5   :  { %323 = vrot.lane.b32.xlu1 %v4006_v10, %s3766_s25  ;;  %317 = vrot.lane.b32.xlu0 %v4006_v10, %s3767_s13 }
 0x1c9   :  { %315 = vrot.lane.b32.xlu1 %v4012_v12, %s3767_s13  ;;  %329 = vrot.lane.b32.xlu0 %v4006_v10, %s3769_s9 }
 0x1cd   :  { %327 = vrot.lane.b32.xlu1 %v4012_v12, %s3769_s9  ;;  %321 = vrot.lane.b32.xlu0 %v4012_v12, %s3766_s25 }
 0x1d1   :  { %333 = vrot.lane.b32.xlu1 %v4012_v12, %s3770_s14 }
 0x21b   :  { %v300_v21 = vpop.permute.xlu0 %299  ;;  %v294_v22 = vpop.permute.xlu1 %293 }
 0x21f   :  { %v312_v25 = vpop.permute.xlu0 %311  ;;  %v306_v26 = vpop.permute.xlu1 %305 }
 0x220   :  { %v591_v27 = vcombine.low %v300_v21, %v312_v25  ;;  %v592_v28 = vcombine.high %v300_v21, %v312_v25  ;;  %v575_v29 = vcombine.low %v294_v22, %v306_v26  ;;  %v576_v30 = vcombine.high %v294_v22, %v306_v26 }
 0x222   :  { %v599_v32 = vrot.slane %v591_v27, %v4038_v24  ;;  %v606_v33 = vrot.slane %v592_v28, %v4038_v24  ;;  %v583_v34 = vrot.slane %v575_v29, %v4038_v24  ;;  %v590_v35 = vrot.slane %v576_v30, %v4038_v24 }
 0x223   :  { %v4046_v36 = vpop.permute.xlu1 %275  ;;  %v292_v37 = vpop.permute.xlu0 %291 }
 0x224   :  { %v639_v38 = vcombine.low %v583_v34, %v599_v32  ;;  %v640_v39 = vcombine.high %v583_v34, %v599_v32  ;;  %v655_v40 = vcombine.low %v590_v35, %v606_v33  ;;  %v656_v41 = vcombine.high %v590_v35, %v606_v33 }
 0x226   :  { %v647_v42 = vrot.slane %v639_v38, %v4040_v31  ;;  %v654_v43 = vrot.slane %v640_v39, %v4040_v31  ;;  %v663_v44 = vrot.slane %v655_v40, %v4040_v31  ;;  %v670_v45 = vrot.slane %v656_v41, %v4040_v31 }
 0x227   :  { %v304_v46 = vpop.permute.xlu1 %303  ;;  %v298_v47 = vpop.permute.xlu0 %297 }
 0x228   :  { %v3116_v48 = vcombine.low %v647_v42, %v654_v43  ;;  %v3118_v49 = vcombine.high %v647_v42, %v654_v43  ;;  %v3120_v50 = vcombine.low %v663_v44, %v670_v45  ;;  %v3122_v51 = vcombine.high %v663_v44, %v670_v45 }
 0x229   :  { %v371_v54 = vcombine.low %v292_v37, %v304_v46  ;;  %v372_v55 = vcombine.high %v292_v37, %v304_v46 }
 0x22a   :  { %v4053_v52 = vrot.slane %v3116_v48, %v4038_v24  ;;  %v4056_v53 = vrot.slane %v3118_v49, %v4038_v24  ;;  %v4059_v56 = vrot.slane %v3120_v50, %v4038_v24  ;;  %v4062_v57 = vrot.slane %v3122_v51, %v4038_v24 }
 0x22b   :  { %v310_v58 = vpop.permute.xlu1 %309  ;;  %v274_v59 = vpop.permute.xlu0 %273  ;;  %v379_v63 = vrot.slane %v371_v54, %v4038_v24  ;;  %v386_v0 = vrot.slane %v372_v55, %v4038_v24 }
 0x22c   :  { %v387_v60 = vcombine.low %v298_v47, %v310_v58  ;;  %v388_v61 = vcombine.high %v298_v47, %v310_v58  ;;  %v963_v62 = vcombine.low %v4053_v52, %v4056_v53  ;;  %v964_v1 = vcombine.high %v4053_v52, %v4056_v53 }
 0x22d   :  { %v995_v2 = vcombine.low %v4059_v56, %v4062_v57  ;;  %v996_v54 = vcombine.high %v4059_v56, %v4062_v57 }
 0x22e   :  { %v395_v3 = vrot.slane %v387_v60, %v4038_v24  ;;  %v402_v4 = vrot.slane %v388_v61, %v4038_v24  ;;  %v4109_v58 = vrot.slane %v963_v62, %v4040_v31 }
 0x22f   :  { %v280_v5 = vpop.permute.xlu1 %279  ;;  %v286_v6 = vpop.permute.xlu0 %285 }
 0x230   :  { %v339_v7 = vcombine.low %v4012_v12, %v280_v5  ;;  %v340_v8 = vcombine.high %v4012_v12, %v280_v5  ;;  %v355_v9 = vcombine.low %v274_v59, %v286_v6  ;;  %v356_v11 = vcombine.high %v274_v59, %v286_v6 }
 0x231   :  { %v435_v14 = vcombine.low %v379_v63, %v395_v3  ;;  %v436_v15 = vcombine.high %v379_v63, %v395_v3  ;;  %v451_v16 = vcombine.low %v386_v0, %v402_v4  ;;  %v452_v17 = vcombine.high %v386_v0, %v402_v4 }
 0x232   :  { %v347_v18 = vrot.slane %v339_v7, %v4038_v24  ;;  %v354_v19 = vrot.slane %v340_v8, %v4038_v24  ;;  %v363_v20 = vrot.slane %v355_v9, %v4038_v24  ;;  %v370_v21 = vrot.slane %v356_v11, %v4038_v24 }
 0x233   :  { %v443_v22 = vrot.slane %v435_v14, %v4040_v31  ;;  %v450_v23 = vrot.slane %v436_v15, %v4040_v31  ;;  %v459_v12 = vrot.slane %v451_v16, %v4040_v31  ;;  %v466_v25 = vrot.slane %v452_v17, %v4040_v31  ;;  %v288_v26 = vpop.permute.xlu1 %287  ;;  %v282_v27 = vpop.permute.xlu0 %281 }
 0x234   :  { %v403_v28 = vcombine.low %v347_v18, %v363_v20  ;;  %v404_v29 = vcombine.high %v347_v18, %v363_v20  ;;  %v419_v30 = vcombine.low %v354_v19, %v370_v21  ;;  %v420_v32 = vcombine.high %v354_v19, %v370_v21 }
 0x235   :  { %v3108_v33 = vcombine.low %v443_v22, %v450_v23  ;;  %v3110_v34 = vcombine.high %v443_v22, %v450_v23  ;;  %v3112_v35 = vcombine.low %v459_v12, %v466_v25  ;;  %v3114_v37 = vcombine.high %v459_v12, %v466_v25 }
 0x236   :  { %v411_v38 = vrot.slane %v403_v28, %v4040_v31  ;;  %v418_v39 = vrot.slane %v404_v29, %v4040_v31  ;;  %v427_v40 = vrot.slane %v419_v30, %v4040_v31  ;;  %v434_v41 = vrot.slane %v420_v32, %v4040_v31 }
 0x237   :  { %v4089_v42 = vrot.slane %v3108_v33, %v4038_v24  ;;  %v4092_v43 = vrot.slane %v3110_v34, %v4038_v24  ;;  %v4095_v44 = vrot.slane %v3112_v35, %v4038_v24  ;;  %v4098_v45 = vrot.slane %v3114_v37, %v4038_v24  ;;  %v4100_v46 = vpop.permute.xlu1 %323  ;;  %v4102_v47 = vpop.permute.xlu0 %317 }
 0x238   :  { %v3107_v48 = vcombine.low %v411_v38, %v418_v39  ;;  %v3109_v49 = vcombine.high %v411_v38, %v418_v39  ;;  %v3111_v50 = vcombine.low %v427_v40, %v434_v41  ;;  %v3113_v51 = vcombine.high %v427_v40, %v434_v41 }
 0x239   :  { %v827_v55 = vcombine.low %v4089_v42, %v4092_v43  ;;  %v4112_v59 = vrot.slane %v995_v2, %v4040_v31  ;;  %v828_v60 = vcombine.high %v4089_v42, %v4092_v43  ;;  %v859_v61 = vcombine.low %v4095_v44, %v4098_v45 }
 0x23a   :  { %v4119_v63 = vrot.slane %v3107_v48, %v4038_v24  ;;  %v4122_v0 = vrot.slane %v3109_v49, %v4038_v24  ;;  %v559_v3 = vcombine.low %v4046_v36, %v288_v26  ;;  %v560_v62 = vcombine.high %v4046_v36, %v288_v26 }
 0x23b   :  { %v543_v4 = vcombine.low %v4006_v10, %v282_v27  ;;  %v544_v2 = vcombine.high %v4006_v10, %v282_v27  ;;  %v316_v5 = vpop.permute.xlu1 %315  ;;  %v4128_v6 = vpop.permute.xlu0 %329  ;;  %v860_v7 = vcombine.high %v4095_v44, %v4098_v45  ;;  %v4133_v8 = vrot.slane %v3111_v50, %v4038_v24 }
 0x23c   :  { %v4136_v9 = vrot.slane %v3113_v51, %v4038_v24  ;;  %v811_v11 = vcombine.low %v4119_v63, %v4122_v0  ;;  %v567_v36 = vrot.slane %v559_v3, %v4038_v24  ;;  %v574_v14 = vrot.slane %v560_v62, %v4038_v24 }
 0x23d   :  { %v551_v15 = vrot.slane %v543_v4, %v4038_v24  ;;  %v558_v16 = vrot.slane %v544_v2, %v4038_v24  ;;  %v679_v17 = vcombine.low %v4102_v47, %v4128_v6  ;;  %v680_v18 = vcombine.high %v4102_v47, %v4128_v6 }
 0x23e   :  { %v835_v19 = vrot.slane %v827_v55, %v4040_v31  ;;  %v867_v20 = vrot.slane %v859_v61, %v4040_v31  ;;  %v812_v26 = vcombine.high %v4119_v63, %v4122_v0  ;;  %v843_v27 = vcombine.low %v4133_v8, %v4136_v9 }
 0x23f   :  { %v607_v21 = vcombine.low %v551_v15, %v567_v36  ;;  %v608_v22 = vcombine.high %v551_v15, %v567_v36  ;;  %v623_v23 = vcombine.low %v558_v16, %v574_v14  ;;  %v624_v12 = vcombine.high %v558_v16, %v574_v14  ;;  %v328_v25 = vpop.permute.xlu1 %327  ;;  %v322_v45 = vpop.permute.xlu0 %321 }
 0x240   :  { %v879_v28 = vcombine.low %v835_v19, %v867_v20  ;;  %v880_v29 = vcombine.high %v835_v19, %v867_v20  ;;  %v844_v35 = vcombine.high %v4133_v8, %v4136_v9  ;;  %v475_v37 = vcombine.low %v316_v5, %v328_v25 }
 0x241   :  { %v615_v30 = vrot.slane %v607_v21, %v4040_v31  ;;  %v622_v32 = vrot.slane %v608_v22, %v4040_v31  ;;  %v631_v33 = vrot.slane %v623_v23, %v4040_v31  ;;  %v638_v34 = vrot.slane %v624_v12, %v4040_v31 }
 0x242   :  { %3238 = vmatpush3.xpose.msk.msra.mxu1 %vm1163_vm2, %v879_v28  ;;  %3248 = vmatpush3.xpose.msk.msra.mxu0 %vm1163_vm2, %v880_v29  ;;  %v476_v38 = vcombine.high %v316_v5, %v328_v25  ;;  %v483_v49 = vrot.slane %v475_v37, %v4038_v24  ;;  %v819_v55 = vrot.slane %v811_v11, %v4040_v31 }
 0x243   :  { %v3115_v39 = vcombine.low %v615_v30, %v622_v32  ;;  %v3117_v40 = vcombine.high %v615_v30, %v622_v32  ;;  %v3119_v41 = vcombine.low %v631_v33, %v638_v34  ;;  %v3121_v44 = vcombine.high %v631_v33, %v638_v34  ;;  %v334_v48 = vpop.permute.xlu1 %333  ;;  %3242 = vmatprep.subr.mxu1 %v3765_v13 }
 0x244   :  { %v491_v50 = vcombine.low %v322_v45, %v334_v48  ;;  %v492_v51 = vcombine.high %v322_v45, %v334_v48  ;;  %3257 = vmatprep.subr.mxu0 %v3765_v13  ;;  %v490_v62 = vrot.slane %v476_v38, %v4038_v24  ;;  %v851_v5 = vrot.slane %v843_v27, %v4040_v31 }
 0x245   :  { %v891_v61 = vrot.slane %v3115_v39, %v4038_v24  ;;  %v907_v63 = vrot.slane %v3117_v40, %v4038_v24  ;;  %v923_v0 = vrot.slane %v3119_v41, %v4038_v24  ;;  %v939_v3 = vrot.slane %v3121_v44, %v4038_v24 }
 0x246   :  { %v499_v4 = vrot.slane %v491_v50, %v4038_v24  ;;  %v506_v2 = vrot.slane %v492_v51, %v4038_v24  ;;  %v1015_v11 = vcombine.low %v4109_v58, %v4112_v59  ;;  %v875_v20 = vcombine.low %v819_v55, %v851_v5 }
 0x247   :  { %v947_v8 = vcombine.low %v891_v61, %v907_v63  ;;  %v948_v9 = vcombine.high %v891_v61, %v907_v63  ;;  %v979_v36 = vcombine.low %v923_v0, %v939_v3  ;;  %v876_v21 = vcombine.high %v819_v55, %v851_v5 }
 0x248   :  { %v507_v14 = vcombine.low %v483_v49, %v499_v4  ;;  %v508_v15 = vcombine.high %v483_v49, %v499_v4  ;;  %v523_v16 = vcombine.low %v490_v62, %v506_v2  ;;  %v524_v19 = vcombine.high %v490_v62, %v506_v2 }
 0x249   :  { %v842_v22 = vrot.slane %v828_v60, %v4040_v31  ;;  %v874_v23 = vrot.slane %v860_v7, %v4040_v31  ;;  %v980_v29 = vcombine.high %v923_v0, %v939_v3  ;;  %v1155_v30 = vmul.f32 0.35355338, %v875_v20 }
 0x24a   :  { %v515_v12 = vrot.slane %v507_v14, %v4040_v31  ;;  %v522_v25 = vrot.slane %v508_v15, %v4040_v31  ;;  %v531_v27 = vrot.slane %v523_v16, %v4040_v31  ;;  %v538_v28 = vrot.slane %v524_v19, %v4040_v31 }
 0x24b   :  { %v1157_v32 = vmul.f32 0.35355338, %v876_v21  ;;  %v955_v33 = vrot.slane %v947_v8, %v4040_v31  ;;  %3240 = vmatmul.mubr.msk.f32.vlgmr.msra.gmra.mrb[2].mxu1 %vm1163_vm2, %v1155_v30  ;;  %v881_v43 = vcombine.low %v842_v22, %v874_v23  ;;  %v987_v60 = vrot.slane %v979_v36, %v4040_v31 }
 0x24c   :  { %v1019_v34 = vcombine.low %v515_v12, %v522_v25  ;;  %v3123_v37 = vcombine.high %v515_v12, %v522_v25  ;;  %v1035_v38 = vcombine.low %v531_v27, %v538_v28  ;;  %v3124_v42 = vcombine.high %v531_v27, %v538_v28  ;;  %3243 = vmatpush3.xpose.msk.msra.mxu1 %vm1163_vm2, %v1015_v11 }
 0x24d   :  { %3250 = vmatmul.mubr.msk.f32.vlgmr.msra.gmra.mrb[0].mxu0 %vm1163_vm2, %v1157_v32  ;;  %v826_v7 = vrot.slane %v812_v26, %v4040_v31  ;;  %3244 = vmatprep.mubr.msk.f32.mxu1 %vm3768_vm1, %v3765_v13  ;;  %v1011_v45 = vcombine.low %v955_v33, %v987_v60  ;;  %v858_v48 = vrot.slane %v844_v35, %v4040_v31 }
 0x24e   :  { %v1026_v39 = vrot.slane %v1019_v34, %v4038_v24  ;;  %v1034_v40 = vrot.slane %v3123_v37, %v4038_v24  ;;  %v1042_v41 = vrot.slane %v1035_v38, %v4038_v24  ;;  %v1050_v44 = vrot.slane %v3124_v42, %v4038_v24  ;;  %3258 = vmatpush3.xpose.msk.msra.mxu0 %vm1163_vm2, %v881_v43 }
 0x24f   :  { %3252 = vmatprep.subr.mxu1 %v3765_v13  ;;  %3259 = vmatprep.mubr.msk.f32.mxu0 %vm3768_vm1, %v3765_v13  ;;  %v1012_v26 = vcombine.high %v955_v33, %v987_v60  ;;  %v978_v49 = vrot.slane %v964_v1, %v4040_v31  ;;  %v1010_v50 = vrot.slane %v996_v54, %v4040_v31  ;;  %v1156_v51 = vmul.f32 0.35355338, %v1011_v45 }
 0x250   :  { %3267 = vmatprep.subr.mxu0 %v3765_v13  ;;  %v877_v35 = vcombine.low %v826_v7, %v858_v48  ;;  %v962_v55 = vrot.slane %v948_v9, %v4040_v31  ;;  %v994_v61 = vrot.slane %v980_v29, %v4040_v31  ;;  %v1016_v63 = vcombine.high %v4109_v58, %v4112_v59 }
 0x251   :  { %v1051_v0 = vcombine.low %v1026_v39, %v1034_v40  ;;  %v1067_v3 = vcombine.low %v1042_v41, %v1050_v44  ;;  %3245 = vmatmul.mubr.msk.f32.vlgmr.msra.gmra.mrb[4].mxu1 %vm1163_vm2, %v1156_v51  ;;  %v882_v53 = vcombine.high %v842_v22, %v874_v23  ;;  %v878_v1 = vcombine.high %v826_v7, %v858_v48 }
 0x252   :  { %v1159_v52 = vmul.f32 0.35355338, %v877_v35  ;;  %3253 = vmatpush3.xpose.msk.msra.mxu1 %vm1163_vm2, %v1016_v63  ;;  %3254 = vmatprep.mubr.msk.f32.mxu1 %vm3768_vm1, %v3765_v13  ;;  %v1052_v54 = vcombine.high %v1026_v39, %v1034_v40  ;;  %v1158_v58 = vmul.f32 0.35355338, %v1012_v26  ;;  %v1017_v59 = vcombine.low %v978_v49, %v1010_v50 }
 0x253   :  { %v4220_v56 = vrot.slane %v1051_v0, %v4040_v31  ;;  %v4223_v57 = vrot.slane %v1067_v3, %v4040_v31  ;;  %3262 = vmatprep.subr.mxu1 %v3765_v13  ;;  %v1013_v62 = vcombine.low %v962_v55, %v994_v61  ;;  %v1068_v4 = vcombine.high %v1042_v41, %v1050_v44 }
 0x254   :  { %3260 = vmatmul.mubr.msk.f32.vlgmr.msra.gmra.mrb[2].mxu0 %vm1163_vm2, %v1159_v52  ;;  %v4235_v8 = vrot.slane %v1052_v54, %v4040_v31  ;;  %v1161_v9 = vmul.f32 0.35355338, %v878_v1  ;;  %v1014_v14 = vcombine.high %v962_v55, %v994_v61  ;;  %v1018_v19 = vcombine.high %v978_v49, %v1010_v50 }
 0x255   :  { %3268 = vmatpush3.xpose.msk.msra.mxu0 %vm1163_vm2, %v882_v53  ;;  %3269 = vmatprep.mubr.msk.f32.mxu0 %vm3768_vm1, %v3765_v13  ;;  %v1083_v2 = vcombine.low %v4220_v56, %v4223_v57  ;;  %v1084_v5 = vcombine.high %v4220_v56, %v4223_v57  ;;  %v4240_v36 = vrot.slane %v1068_v4, %v4040_v31  ;;  %v1160_v11 = vmul.f32 0.35355338, %v1013_v62 }
 0x256   :  { %3255 = vmatmul.mubr.msk.f32.vlgmr.msra.gmra.mrb[6].mxu1 %vm1163_vm2, %v1158_v58  ;;  %3277 = vmatprep.subr.mxu0 %v3765_v13  ;;  %v1162_v20 = vmul.f32 0.35355338, %v1014_v14 }
 0x257   :  { %3263 = vmatpush3.xpose.msk.msra.mxu1 %vm1163_vm2, %v1017_v59  ;;  %3264 = vmatprep.mubr.msk.f32.mxu1 %vm3768_vm1, %v3765_v13  ;;  %v1085_v15 = vcombine.low %v4235_v8, %v4240_v36  ;;  %v1086_v16 = vcombine.high %v4235_v8, %v4240_v36 }
 0x258   :  { %3270 = vmatmul.mubr.msk.f32.vlgmr.msra.gmra.mrb[4].mxu0 %vm1163_vm2, %v1161_v9  ;;  %3272 = vmatprep.subr.mxu1 %v3765_v13 }
 0x259   :  { %3278 = vmatpush3.msra.mxu0 %v1083_v2  ;;  %3279 = vmatprep.mubr.msk.f32.mxu0 %vm3768_vm1, %v3765_v13  ;;  %v687_v2 = vrot.slane %v679_v17, %v4038_v24 }
 0x25a   :  { %3265 = vmatmul.mubr.msk.f32.vlgmr.msra.gmra.mrb[8].mxu1 %vm1163_vm2, %v1160_v11  ;;  %3287 = vmatprep.subr.mxu0 %v3765_v13  ;;  %v694_v11 = vrot.slane %v680_v18, %v4038_v24 }
 0x25b   :  { %3273 = vmatpush3.xpose.msk.msra.mxu1 %vm1163_vm2, %v1018_v19  ;;  %3274 = vmatprep.mubr.msk.f32.mxu1 %vm3768_vm1, %v3765_v13 }
 0x25c   :  { %3282 = vmatprep.subr.mxu1 %v3765_v13 }
 0x25e   :  { %3275 = vmatmul.mubr.msk.f32.vlgmr.msra.gmra.mrb[10].mxu1 %vm1163_vm2, %v1162_v20 }
 0x25f   :  { %3284 = vmatprep.mubr.msk.f32.mxu1 %vm3768_vm1, %v3765_v13 }
 0x31e   :  { %v1236_v21 = vpop.f32.mrb[2].mxu1 }
 0x31f   :  { %v3241_v23 = vpop.f32.mrb[3].mxu1  ;;  %v1772_v25 = vsel %vm1163_vm2, %v1236_v21, -inf }
 0x320   :  { %v1388_v22 = vpop.f32.mrb[0].mxu0  ;;  %1773 = vmax.xlane.f32.xlu0 %v1772_v25 }
 0x321   :  { %v3251_v12 = vpop.f32.mrb[1].mxu0  ;;  %v1778_v27 = vsel %vm1163_vm2, %v1388_v22, -inf }
 0x324   :  { %v1312_v28 = vpop.f32.mrb[4].mxu1  ;;  %1779 = vmax.xlane.f32.xlu0 %v1778_v27 }
 0x325   :  { %v3246_v29 = vpop.f32.mrb[5].mxu1  ;;  %v1775_v30 = vsel %vm1163_vm2, %v1312_v28, -inf }
 0x326   :  { %1776 = vmax.xlane.f32.xlu1 %v1775_v30 }
 0x327   :  { %v1540_v32 = vpop.f32.mrb[2].mxu0 }
 0x328   :  { %v3261_v33 = vpop.f32.mrb[3].mxu0  ;;  %v1784_v38 = vsel %vm1163_vm2, %v1540_v32, -inf }
 0x329   :  { %v4265_v34 = vpop.f32.mrb[6].mxu1 }
 0x32a   :  { %v3256_v37 = vpop.f32.mrb[7].mxu1  ;;  %v1781_v42 = vsel %vm1163_vm2, %v4265_v34, -inf  ;;  %1785 = vmax.xlane.f32.xlu1 %v1784_v38 }
 0x32b   :  { %v4270_v43 = vpop.f32.mrb[4].mxu0  ;;  %1782 = vmax.xlane.f32.xlu0 %v1781_v42 }
 0x32c   :  { %v3271_v60 = vpop.f32.mrb[5].mxu0  ;;  %v1790_v45 = vsel %vm1163_vm2, %v4270_v43, -inf }
 0x32d   :  { %v1616_v7 = vpop.f32.mrb[8].mxu1 }
 0x32e   :  { %v3266_v39 = vpop.f32.mrb[9].mxu1  ;;  %v1787_v40 = vsel %vm1163_vm2, %v1616_v7, -inf }
 0x32f   :  { %1788 = vmax.xlane.f32.xlu0 %v1787_v40 }
 0x331   :  { %v4273_v41 = vpop.f32.mrb[10].mxu1 }
 0x332   :  { %v3276_v44 = vpop.f32.mrb[11].mxu1  ;;  %v1793_v48 = vsel %vm1163_vm2, %v4273_v41, -inf }
 0x333   :  { %1791 = vmax.xlane.f32.xlu0 %v1790_v45 }
 0x33b   :  { %335 = vrot.lane.b32.xlu1 %v4006_v10, %s3770_s14 }
 0x35f   :  { %1794 = vmax.xlane.f32.xlu1 %v1793_v48 }
 0x3ad   :  { %v1774_v26 = vpop.xlane.xlu0 %1773 }
 0x3ae   :  { %v1796_v49 = vsub.f32 %v1236_v21, %v1774_v26 }
 0x3b0   :  { %v1804_v50 = vmul.f32 1.442695, %v1796_v49 }
 0x3b1   :  { %v1780_v51 = vpop.xlane.xlu0 %1779 }
 0x3b2   :  { %3429 = vpow2.f32 %v1804_v50  ;;  %v1798_v35 = vsub.f32 %v1388_v22, %v1780_v51 }
 0x3b3   :  { %v1777_v55 = vpop.xlane.xlu1 %1776 }
 0x3b4   :  { %v1808_v61 = vmul.f32 1.442695, %v1798_v35  ;;  %v1797_v63 = vsub.f32 %v1312_v28, %v1777_v55 }
 0x3b6   :  { %3431 = vpow2.f32 %v1808_v61  ;;  %v1806_v53 = vmul.f32 1.442695, %v1797_v63 }
 0x3b7   :  { %v1786_v0 = vpop.xlane.xlu1 %1785 }
 0x3b8   :  { %v1783_v3 = vpop.xlane.xlu0 %1782  ;;  %v1800_v52 = vsub.f32 %v1540_v32, %v1786_v0 }
 0x3b9   :  { %v1799_v17 = vsub.f32 %v4265_v34, %v1783_v3 }
 0x3ba   :  { %v1812_v1 = vmul.f32 1.442695, %v1800_v52 }
 0x3bb   :  { %v336_v10 = vpop.permute.xlu1 %335  ;;  %v1810_v27 = vmul.f32 1.442695, %v1799_v17 }
 0x3bc   :  { %v1789_v54 = vpop.xlane.xlu0 %1788  ;;  %v3430_v58 = vpop.eup %3429  ;;  %3433 = vpow2.f32 %v1812_v1  ;;  %v695_v59 = vcombine.low %v4100_v46, %v336_v10  ;;  %v696_v62 = vcombine.high %v4100_v46, %v336_v10 }
 0x3bd   :  { %v1801_v4 = vsub.f32 %v1616_v7, %v1789_v54  ;;  %3280 = vmatmul.mubr.msk.f32.vlgmr.msra.gmra.mrb[6].mxu0 %vm1163_vm2, %v3430_v58  ;;  %v1820_v9 = vsel %vm1163_vm2, %v3430_v58, 0.0  ;;  %3435 = vpow2.f32 %v1806_v53 }
 0x3be   :  { %v703_v14 = vrot.slane %v695_v59, %v4038_v24  ;;  %v710_v46 = vrot.slane %v696_v62, %v4038_v24  ;;  %3288 = vmatpush3.msra.mxu0 %v1084_v5  ;;  %1821 = vadd.xlane.f32.xlu0 %v1820_v9 }
 0x3bf   :  { %v1814_v19 = vmul.f32 1.442695, %v1801_v4  ;;  %3289 = vmatprep.mubr.msk.f32.mxu0 %vm3768_vm1, %v3765_v13  ;;  %3297 = vmatprep.subr.mxu0 %v3765_v13 }
 0x3c0   :  { %v1792_v20 = vpop.xlane.xlu0 %1791  ;;  %v3432_v47 = vpop.eup %3431  ;;  %v711_v6 = vcombine.low %v687_v2, %v703_v14  ;;  %v712_v18 = vcombine.high %v687_v2, %v703_v14  ;;  %v727_v21 = vcombine.low %v694_v11, %v710_v46  ;;  %v728_v22 = vcombine.high %v694_v11, %v710_v46 }
 0x3c1   :  { %v1802_v23 = vsub.f32 %v4270_v43, %v1792_v20  ;;  %3290 = vmatmul.mubr.msk.f32.vlgmr.msra.gmra.mrb[8].mxu0 %vm1163_vm2, %v3432_v47  ;;  %v1826_v56 = vsel %vm1163_vm2, %v3432_v47, 0.0  ;;  %3437 = vpow2.f32 %v1814_v19 }
 0x3c2   :  { %v719_v57 = vrot.slane %v711_v6, %v4040_v31  ;;  %v726_v5 = vrot.slane %v712_v18, %v4040_v31  ;;  %v735_v12 = vrot.slane %v727_v21, %v4040_v31  ;;  %v742_v25 = vrot.slane %v728_v22, %v4040_v31  ;;  %3298 = vmatpush3.msra.mxu0 %v1085_v15 }
 0x3c3   :  { %v1816_v28 = vmul.f32 1.442695, %v1802_v23  ;;  %1827 = vadd.xlane.f32.xlu0 %v1826_v56  ;;  %3299 = vmatprep.mubr.msk.f32.mxu0 %vm3768_vm1, %v3765_v13 }
 0x3c4   :  { %v1087_v29 = vcombine.low %v719_v57, %v726_v5  ;;  %v3125_v30 = vcombine.high %v719_v57, %v726_v5  ;;  %v1103_v32 = vcombine.low %v735_v12, %v742_v25  ;;  %v3126_v33 = vcombine.high %v735_v12, %v742_v25  ;;  %3307 = vmatprep.subr.mxu0 %v3765_v13 }
 0x3c5   :  { %3439 = vpow2.f32 %v1816_v28 }
 0x3c6   :  { %v3434_v34 = vpop.eup %3433  ;;  %v1094_v37 = vrot.slane %v1087_v29, %v4038_v24  ;;  %v1102_v38 = vrot.slane %v3125_v30, %v4038_v24  ;;  %v1110_v15 = vrot.slane %v1103_v32, %v4038_v24  ;;  %v1118_v42 = vrot.slane %v3126_v33, %v4038_v24 }
 0x3c7   :  { %3441 = vpow2.f32 %v1810_v27  ;;  %3300 = vmatmul.mubr.msk.f32.vlgmr.msra.gmra.mrb[10].mxu0 %vm1163_vm2, %v3434_v34  ;;  %v1832_v43 = vsel %vm1163_vm2, %v3434_v34, 0.0  ;;  %v3436_v60 = vpop.eup %3435 }
 0x3c8   :  { %3308 = vmatpush3.msra.mxu0 %v1086_v16  ;;  %1833 = vadd.xlane.f32.xlu1 %v1832_v43  ;;  %v1119_v7 = vcombine.low %v1094_v37, %v1102_v38  ;;  %v1135_v39 = vcombine.low %v1110_v15, %v1118_v42  ;;  %v1120_v40 = vcombine.high %v1094_v37, %v1102_v38  ;;  %v1823_v49 = vsel %vm1163_vm2, %v3436_v60, 0.0 }
 0x3c9   :  { %3309 = vmatprep.mubr.msk.f32.mxu0 %vm3768_vm1, %v3765_v13  ;;  %v1136_v44 = vcombine.high %v1110_v15, %v1118_v42 }
 0x3ca   :  { %v1127_v45 = vrot.slane %v1119_v7, %v4040_v31  ;;  %v1143_v48 = vrot.slane %v1135_v39, %v4040_v31  ;;  %v1134_v26 = vrot.slane %v1120_v40, %v4040_v31 }
 0x3cb   :  { %v1150_v50 = vrot.slane %v1136_v44, %v4040_v31  ;;  %v3438_v16 = vpop.eup %3437 }
 0x3cc   :  { %1824 = vadd.xlane.f32.xlu1 %v1823_v49  ;;  %v1151_v8 = vcombine.low %v1127_v45, %v1143_v48  ;;  %v1152_v36 = vcombine.high %v1127_v45, %v1143_v48  ;;  %v1835_v61 = vsel %vm1163_vm2, %v3438_v16, 0.0 }
 0x3cd   :  { %v1153_v51 = vcombine.low %v1134_v26, %v1150_v50  ;;  %v1154_v35 = vcombine.high %v1134_v26, %v1150_v50 }
 0x3ce   :  { %3283 = vmatpush3.msra.mxu1 %v1151_v8 }
 0x3cf   :  { %v3440_v55 = vpop.eup %3439  ;;  %3285 = vmatmul.mubr.msk.f32.vlgmr.msra.gmra.mrb[12].mxu1 %vm1163_vm2, %v3436_v60  ;;  %3292 = vmatprep.subr.mxu1 %v3765_v13 }
 0x3d0   :  { %3310 = vmatmul.mubr.msk.f32.vlgmr.msra.gmra.mrb[12].mxu0 %vm1163_vm2, %v3440_v55  ;;  %3293 = vmatpush3.msra.mxu1 %v1152_v36  ;;  %v1838_v63 = vsel %vm1163_vm2, %v3440_v55, 0.0 }
 0x3d1   :  { %v3442_v0 = vpop.eup %3441  ;;  %1836 = vadd.xlane.f32.xlu1 %v1835_v61  ;;  %1839 = vadd.xlane.f32.xlu0 %v1838_v63  ;;  %v2748_v63 = vld [vmem:[#allocation8] sm:$0xff] }
 0x3d2   :  { %3294 = vmatprep.mubr.msk.f32.mxu1 %vm3768_vm1, %v3765_v13  ;;  %3302 = vmatprep.subr.mxu1 %v3765_v13  ;;  %v1829_v3 = vsel %vm1163_vm2, %v3442_v0, 0.0 }
 0x3d3   :  { %3295 = vmatmul.mubr.msk.f32.vlgmr.msra.gmra.mrb[14].mxu1 %vm1163_vm2, %v3442_v0  ;;  %v2749_v0 = vld [vmem:[#allocation8 + $0x8] sm:$0xff] }
 0x3d4   :  { %3303 = vmatpush3.msra.mxu1 %v1153_v51  ;;  %3304 = vmatprep.mubr.msk.f32.mxu1 %vm3768_vm1, %v3765_v13 }
 0x3d5   :  { %1830 = vadd.xlane.f32.xlu0 %v1829_v3  ;;  %3312 = vmatprep.subr.mxu1 %v3765_v13 }
 0x3d7   :  { %3305 = vmatmul.mubr.msk.f32.vlgmr.msra.gmra.mrb[16].mxu1 %vm1163_vm2, %v3438_v16 }
 0x3d8   :  { %3313 = vmatpush3.msra.mxu1 %v1154_v35  ;;  %3314 = vmatprep.mubr.msk.f32.mxu1 %vm3768_vm1, %v3765_v13 }
 0x3ec   :  { %v1795_v52 = vpop.xlane.xlu1 %1794 }
 0x3ed   :  { %v1803_v53 = vsub.f32 %v4273_v41, %v1795_v52 }
 0x3ef   :  { %v1818_v1 = vmul.f32 1.442695, %v1803_v53 }
 0x3f1   :  { %3443 = vpow2.f32 %v1818_v1 }
 0x3fb   :  { %v3444_v10 = vpop.eup %3443 }
 0x3fc   :  { %3315 = vmatmul.mubr.msk.f32.vlgmr.msra.gmra.mrb[18].mxu1 %vm1163_vm2, %v3444_v10  ;;  %v1841_v54 = vsel %vm1163_vm2, %v3444_v10, 0.0  ;;  %v3366_v10 = vpack.c.bf16 %v2749_v0, %v2748_v63 }
 0x3fd   :  { %1842 = vadd.xlane.f32.xlu0 %v1841_v54 }
 0x3fe   :  { %3367 = vmatprep.subr.bf16.mxu0 %v3366_v10 }
 0x3ff   :  { %3369 = vmatpush3.bf16.msra.mxu0 %v3366_v10 }
 0x44b   :  { %v1822_v58 = vpop.xlane.xlu0 %1821 }
 0x44c   :  { %3445 = vrcp.f32 %v1822_v58 }
 0x450   :  { %v1828_v2 = vpop.xlane.xlu0 %1827 }
 0x455   :  { %v1834_v59 = vpop.xlane.xlu1 %1833 }
 0x456   :  { %3447 = vrcp.f32 %v1834_v59  ;;  %v3446_v41 = vpop.eup %3445 }
 0x457   :  { %3449 = vrcp.f32 %v1828_v2 }
 0x459   :  { %v1825_v14 = vpop.xlane.xlu1 %1824 }
 0x45e   :  { %v1840_v11 = vpop.xlane.xlu0 %1839  ;;  %v1837_v6 = vpop.xlane.xlu1 %1836 }
 0x45f   :  { %3451 = vrcp.f32 %v1840_v11 }
 0x460   :  { %v3448_v46 = vpop.eup %3447  ;;  %3453 = vrcp.f32 %v1825_v14 }
 0x461   :  { %3455 = vrcp.f32 %v1837_v6  ;;  %v3450_v22 = vpop.eup %3449 }
 0x469   :  { %v3452_v56 = vpop.eup %3451 }
 0x46a   :  { %v3454_v15 = vpop.eup %3453 }
 0x46b   :  { %v3456_v42 = vpop.eup %3455 }
 0x490   :  { %v1913_v62 = vpop.f32.mrb[6].mxu0 }
 0x491   :  { %v3281_v4 = vpop.f32.mrb[7].mxu0  ;;  %v2436_v19 = vmul.f32 %v3446_v41, %v1913_v62 }
 0x494   :  { %v2059_v9 = vpop.f32.mrb[8].mxu0 }
 0x495   :  { %v3291_v13 = vpop.f32.mrb[9].mxu0  ;;  %v2438_v12 = vmul.f32 %v3450_v22, %v2059_v9 }
 0x49a   :  { %v2205_v17 = vpop.f32.mrb[10].mxu0 }
 0x49b   :  { %v2440_v20 = vmul.f32 %v3448_v46, %v2205_v17  ;;  %v3301_v47 = vpop.f32.mrb[11].mxu0  ;;  %v1831_v17 = vpop.xlane.xlu0 %1830 }
 0x49c   :  { %3457 = vrcp.f32 %v1831_v17 }
 0x49d   :  { %v2444_v18 = vcombine.low %v2436_v19, %v2440_v20  ;;  %v2445_v21 = vcombine.high %v2436_v19, %v2440_v20 }
 0x49f   :  { %v2452_v33 = vrot.slane %v2444_v18, %v4038_v24  ;;  %v2459_v34 = vrot.slane %v2445_v21, %v4038_v24  ;;  %v1843_v19 = vpop.xlane.xlu0 %1842 }
 0x4a0   :  { %3459 = vrcp.f32 %v1843_v19  ;;  %v3465_v19 = vld [vmem:[#allocation2 + $0x8] sm:$0xff] }
 0x4a2   :  { %v1986_v23 = vpop.f32.mrb[12].mxu1 }
 0x4a3   :  { %v2351_v57 = vpop.f32.mrb[12].mxu0  ;;  %v3286_v5 = vpop.f32.mrb[13].mxu1  ;;  %v2437_v44 = vmul.f32 %v3454_v15, %v1986_v23 }
 0x4a4   :  { %v2442_v25 = vmul.f32 %v3452_v56, %v2351_v57  ;;  %v3311_v27 = vpop.f32.mrb[13].mxu0 }
 0x4a6   :  { %v2460_v28 = vcombine.low %v2438_v12, %v2442_v25  ;;  %v2461_v29 = vcombine.high %v2438_v12, %v2442_v25  ;;  %v2132_v30 = vpop.f32.mrb[14].mxu1  ;;  %v3458_v20 = vpop.eup %3457 }
 0x4a7   :  { %v3296_v32 = vpop.f32.mrb[15].mxu1  ;;  %v2439_v18 = vmul.f32 %v3458_v20, %v2132_v30 }
 0x4a8   :  { %v2468_v37 = vrot.slane %v2460_v28, %v4038_v24  ;;  %v2475_v38 = vrot.slane %v2461_v29, %v4038_v24 }
 0x4aa   :  { %v2476_v43 = vcombine.low %v2452_v33, %v2468_v37  ;;  %v2477_v60 = vcombine.high %v2452_v33, %v2468_v37  ;;  %v2492_v7 = vcombine.low %v2459_v34, %v2475_v38  ;;  %v2493_v39 = vcombine.high %v2459_v34, %v2475_v38  ;;  %v2278_v40 = vpop.f32.mrb[16].mxu1  ;;  %v3460_v47 = vpop.eup %3459  ;;  %v2750_v33 = vld [vmem:[#allocation8 + $0x10] sm:$0xff]  ;;  %v2751_v34 = vld [vmem:[#allocation8 + $0x18] sm:$0xff] }
 0x4ab   :  { %v2441_v45 = vmul.f32 %v3456_v42, %v2278_v40  ;;  %v3306_v48 = vpop.f32.mrb[17].mxu1  ;;  %v3370_v42 = vpack.c.bf16 %v2751_v34, %v2750_v33  ;;  %v2890_v33 = vld [vmem:[#allocation14 + $0x18] sm:$0xff] }
 0x4ac   :  { %v2484_v26 = vrot.slane %v2476_v43, %v4040_v31  ;;  %v2491_v49 = vrot.slane %v2477_v60, %v4040_v31  ;;  %v2500_v50 = vrot.slane %v2492_v7, %v4040_v31  ;;  %v2507_v8 = vrot.slane %v2493_v39, %v4040_v31 }
 0x4ad   :  { %v2512_v36 = vcombine.low %v2437_v44, %v2441_v45  ;;  %v2513_v16 = vcombine.high %v2437_v44, %v2441_v45  ;;  %3371 = vmatprep.subr.bf16.mxu0 %v3370_v42 }
 0x4ae   :  { %v2580_v51 = vcombine.low %v2484_v26, %v2491_v49  ;;  %v3151_v35 = vcombine.high %v2484_v26, %v2491_v49  ;;  %v2596_v55 = vcombine.low %v2500_v50, %v2507_v8  ;;  %v3152_v61 = vcombine.high %v2500_v50, %v2507_v8  ;;  %3373 = vmatpush3.bf16.msra.mxu0 %v3370_v42  ;;  %v2984_v42 = vld [vmem:[#allocation17 + $0x18] sm:$0xff] }
 0x4af   :  { %v2520_v57 = vrot.slane %v2512_v36, %v4038_v24  ;;  %v2527_v5 = vrot.slane %v2513_v16, %v4038_v24 }
 0x4b0   :  { %v2587_v3 = vrot.slane %v2580_v51, %v4038_v24  ;;  %v2595_v52 = vrot.slane %v3151_v35, %v4038_v24  ;;  %v2603_v53 = vrot.slane %v2596_v55, %v4038_v24  ;;  %v2611_v1 = vrot.slane %v3152_v61, %v4038_v24 }
 0x4b2   :  { %v2612_v54 = vcombine.low %v2587_v3, %v2595_v52  ;;  %v2628_v58 = vcombine.low %v2603_v53, %v2611_v1  ;;  %v2613_v59 = vcombine.high %v2587_v3, %v2595_v52  ;;  %v2629_v62 = vcombine.high %v2603_v53, %v2611_v1 }
 0x4b4   :  { %v4363_v4 = vrot.slane %v2612_v54, %v4040_v31  ;;  %v4366_v2 = vrot.slane %v2628_v58, %v4040_v31  ;;  %v4369_v9 = vrot.slane %v2613_v59, %v4040_v31  ;;  %v2643_v13 = vrot.slane %v2629_v62, %v4040_v31 }
 0x4b6   :  { %v2645_v11 = vcombine.high %v4363_v4, %v4366_v2  ;;  %v2644_v14 = vcombine.low %v4363_v4, %v4366_v2  ;;  %v2646_v41 = vcombine.low %v4369_v9, %v2643_v13  ;;  %v2647_v46 = vcombine.high %v4369_v9, %v2643_v13  ;;  %v3155_v13 = vld [vmem:[#allocation10] ss:$0 sm:$0xff]  ;;  %v3466_v4 = vld [vmem:[#allocation2] sm:$0xff] }
 0x4b8   :  { %2718 = vrot.lane.b32.xlu1 %v2645_v11, %s3748_s30 }
 0x4bc   :  { %2726 = vrot.lane.b32.xlu1 %v2646_v41, %s3773_s15 }
 0x4cf   :  { %v2424_v6 = vpop.f32.mrb[18].mxu1 }
 0x4d0   :  { %v2443_v21 = vmul.f32 %v3460_v47, %v2424_v6  ;;  %v3316_v22 = vpop.f32.mrb[19].mxu1 }
 0x4d2   :  { %v2528_v23 = vcombine.low %v2439_v18, %v2443_v21  ;;  %v2529_v56 = vcombine.high %v2439_v18, %v2443_v21 }
 0x4d4   :  { %v2536_v12 = vrot.slane %v2528_v23, %v4038_v24  ;;  %v2543_v25 = vrot.slane %v2529_v56, %v4038_v24 }
 0x4d6   :  { %v2544_v27 = vcombine.low %v2520_v57, %v2536_v12  ;;  %v2545_v28 = vcombine.high %v2520_v57, %v2536_v12  ;;  %v2560_v29 = vcombine.low %v2527_v5, %v2543_v25  ;;  %v2561_v32 = vcombine.high %v2527_v5, %v2543_v25 }
 0x4d8   :  { %v2552_v30 = vrot.slane %v2544_v27, %v4040_v31  ;;  %v2559_v37 = vrot.slane %v2545_v28, %v4040_v31  ;;  %v2568_v38 = vrot.slane %v2560_v29, %v4040_v31  ;;  %v2575_v15 = vrot.slane %v2561_v32, %v4040_v31  ;;  %v2887_v27 = vld [vmem:[#allocation14] sm:$0xff]  ;;  %v2888_v28 = vld [vmem:[#allocation14 + $0x8] sm:$0xff]  ;;  %v2889_v29 = vld [vmem:[#allocation14 + $0x10] sm:$0xff] }
 0x4d9   :  { %v3374_v32 = vpack.c.bf16 %v2888_v28, %v2887_v27  ;;  %v3378_v34 = vpack.c.bf16 %v2890_v33, %v2889_v29 }
 0x4da   :  { %v2648_v43 = vcombine.low %v2552_v30, %v2559_v37  ;;  %v3153_v60 = vcombine.high %v2552_v30, %v2559_v37  ;;  %v2664_v7 = vcombine.low %v2568_v38, %v2575_v15  ;;  %v3154_v39 = vcombine.high %v2568_v38, %v2575_v15  ;;  %v2981_v30 = vld [vmem:[#allocation17] sm:$0xff]  ;;  %v2982_v37 = vld [vmem:[#allocation17 + $0x8] sm:$0xff]  ;;  %v2983_v38 = vld [vmem:[#allocation17 + $0x10] sm:$0xff] }
 0x4db   :  { %3375 = vmatprep.subr.bf16.mxu1 %v3374_v32  ;;  %v3382_v15 = vpack.c.bf16 %v2982_v37, %v2981_v30 }
 0x4dc   :  { %v2655_v40 = vrot.slane %v2648_v43, %v4038_v24  ;;  %v2663_v44 = vrot.slane %v3153_v60, %v4038_v24  ;;  %v2671_v45 = vrot.slane %v2664_v7, %v4038_v24  ;;  %v2679_v48 = vrot.slane %v3154_v39, %v4038_v24  ;;  %3377 = vmatpush3.bf16.msra.mxu1 %v3374_v32  ;;  %v2985_v60 = vld [vmem:[#allocation17 + $0x20] sm:$0xff]  ;;  %v2986_v7 = vld [vmem:[#allocation17 + $0x28] sm:$0xff] }
 0x4dd   :  { %3379 = vmatprep.subr.bf16.mxu1 %v3378_v34  ;;  %v3386_v43 = vpack.c.bf16 %v2984_v42, %v2983_v38  ;;  %3383 = vmatprep.subr.bf16.mxu0 %v3382_v15  ;;  %v3390_v39 = vpack.c.bf16 %v2986_v7, %v2985_v60 }
 0x4de   :  { %v2681_v26 = vcombine.high %v2655_v40, %v2663_v44  ;;  %v2697_v49 = vcombine.high %v2671_v45, %v2679_v48  ;;  %v2680_v50 = vcombine.low %v2655_v40, %v2663_v44  ;;  %v2696_v8 = vcombine.low %v2671_v45, %v2679_v48 }
 0x4e0   :  { %v2695_v36 = vrot.slane %v2681_v26, %v4040_v31  ;;  %v2711_v16 = vrot.slane %v2697_v49, %v4040_v31  ;;  %v2688_v51 = vrot.slane %v2680_v50, %v4040_v31  ;;  %v2704_v35 = vrot.slane %v2696_v8, %v4040_v31  ;;  %3381 = vmatpush3.bf16.msra.mxu1 %v3378_v34  ;;  %v3158_v8 = vld [vmem:[#allocation11] ss:$0 sm:$0xff] }
 0x4e2   :  { %v2714_v55 = vcombine.low %v2695_v36, %v2711_v16  ;;  %v2713_v61 = vcombine.high %v2688_v51, %v2704_v35  ;;  %v2712_v63 = vcombine.low %v2688_v51, %v2704_v35  ;;  %v2715_v0 = vcombine.high %v2695_v36, %v2711_v16  ;;  %v3159_v16 = vld [vmem:[#allocation13] ss:$0 sm:$0xff] }
 0x4e4   :  { %2728 = vrot.lane.b32.xlu1 %v2714_v55, %s3773_s15  ;;  %2720 = vrot.lane.b32.xlu0 %v2713_v61, %s3748_s30 }
 0x4e8   :  { %2736 = vrot.lane.b32.xlu1 %v2715_v0, %s3774_s2  ;;  %2734 = vrot.lane.b32.xlu0 %v2647_v46, %s3774_s2 }
 0x52a   :  { %v2719_v24 = vpop.permute.xlu1 %2718 }
 0x52b   :  { %v2740_v31 = vsel %vm1163_vm2, %v2644_v14, %v2719_v24  ;;  %v2987_v24 = vld [vmem:[#allocation17 + $0x30] sm:$0xff] }
 0x52e   :  { %v2727_v3 = vpop.permute.xlu1 %2726 }
 0x52f   :  { %v2743_v10 = vsel %vm2742_vm3, %v2740_v31, %v2727_v3  ;;  %v2988_v3 = vld [vmem:[#allocation17 + $0x38] sm:$0xff] }
 0x556   :  { %v2729_v52 = vpop.permute.xlu1 %2728  ;;  %v2721_v53 = vpop.permute.xlu0 %2720 }
 0x557   :  { %v2741_v1 = vsel %vm1163_vm2, %v2712_v63, %v2721_v53  ;;  %v3160_v53 = vld [vmem:[#allocation16] ss:$0 sm:$0xff] }
 0x558   :  { %v2744_v58 = vsel %vm2742_vm3, %v2741_v1, %v2729_v52  ;;  %v3394_v52 = vpack.c.bf16 %v2988_v3, %v2987_v24 }
 0x55a   :  { %v2737_v54 = vpop.permute.xlu1 %2736  ;;  %v2735_v59 = vpop.permute.xlu0 %2734 }
 0x55b   :  { %v2747_v62 = vsel %vm2745_vm4, %v2744_v58, %v2737_v54  ;;  %v2746_v9 = vsel %vm2745_vm4, %v2743_v10, %v2735_v59 }
 0x55c   :  { %3325 = vmatprep.mubr.msk.f32.mxu0 %vm189_vm0, %v2746_v9 }
 0x55d   :  { %3326 = vmatmul.mubr.msk.f32.vlgmr.msra.gmra.mrb[14].mxu0 %vm189_vm0, %v2747_v62  ;;  %v3163_v62 = vld [vmem:[#allocation19] ss:$0 sm:$0xff] }
 0x55e   :  { %3385 = vmatpush3.bf16.msra.mxu0 %v3382_v15 }
 0x55f   :  { %3387 = vmatprep.subr.bf16.mxu0 %v3386_v43 }
 0x562   :  { %3389 = vmatpush3.bf16.msra.mxu0 %v3386_v43 }
 0x563   :  { %3391 = vmatprep.subr.bf16.mxu0 %v3390_v39 }
 0x566   :  { %3393 = vmatpush3.bf16.msra.mxu0 %v3390_v39 }
 0x567   :  { %3395 = vmatprep.subr.bf16.mxu0 %v3394_v52 }
 0x56a   :  { %3397 = vmatpush3.bf16.msra.mxu0 %v3394_v52 }
 0x630   :  { %v3327_v11 = vpop.f32.mrb[14].mxu0 }
 0x631   :  { %v2837_v41 = vadd.f32 %v3327_v11, %v3155_v13  ;;  %v2831_v46 = vpop.f32.mrb[15].mxu0 }
 0x632   :  { %v2832_v17 = vadd.f32 %v3155_v13, %v2831_v46 }
 0x633   :  { %v2841_v20 = vadd.f32 %v3465_v19, %v2837_v41 }
 0x634   :  { %v2840_v2 = vadd.f32 %v3466_v4, %v2832_v17 }
 0x635   :  { %v2845_v14 = vsel %vm189_vm0, %v2841_v20, 0.0 }
 0x636   :  { %2846 = vadd.xlane.f32.xlu1 %v2845_v14  ;;  %v2842_v47 = vsel %vm189_vm0, %v2840_v2, 0.0 }
 0x637   :  { %2843 = vadd.xlane.f32.xlu0 %v2842_v47 }
 0x6c3   :  { %v2847_v6 = vpop.xlane.xlu1 %2846 }
 0x6c4   :  { %v2850_v18 = vmul.f32 0.03125, %v2847_v6  ;;  %v2844_v21 = vpop.xlane.xlu0 %2843 }
 0x6c5   :  { %v2849_v22 = vmul.f32 0.03125, %v2844_v21 }
 0x6c6   :  { %v2852_v23 = vsub.f32 %v2841_v20, %v2850_v18 }
 0x6c7   :  { %v2851_v56 = vsub.f32 %v2840_v2, %v2849_v22 }
 0x6c8   :  { %v2854_v12 = vmul.f32 %v2852_v23, %v2852_v23 }
 0x6c9   :  { %v2853_v57 = vmul.f32 %v2851_v56, %v2851_v56 }
 0x6ca   :  { %v2858_v25 = vsel %vm189_vm0, %v2854_v12, 0.0 }
 0x6cb   :  { %v2855_v5 = vsel %vm189_vm0, %v2853_v57, 0.0 }
 0x6cc   :  { %2856 = vadd.xlane.f32.xlu0 %v2855_v5 }
 0x6d0   :  { %2859 = vadd.xlane.f32.xlu0 %v2858_v25 }
 0x759   :  { %v2857_v40 = vpop.xlane.xlu0 %2856 }
 0x75a   :  { %v2861_v44 = vmul.f32 0.03125, %v2857_v40 }
 0x75c   :  { %v2863_v45 = vadd.f32 1e-05, %v2861_v44 }
 0x75d   :  { %v2860_v48 = vpop.xlane.xlu0 %2859 }
 0x75e   :  { %3461 = vrsqrt.f32 %v2863_v45  ;;  %v2862_v26 = vmul.f32 0.03125, %v2860_v48 }
 0x760   :  { %v2864_v49 = vadd.f32 1e-05, %v2862_v26 }
 0x762   :  { %3463 = vrsqrt.f32 %v2864_v49 }
 0x768   :  { %v3462_v50 = vpop.eup %3461 }
 0x769   :  { %v2867_v36 = vmul.f32 %v3462_v50, %v2851_v56 }
 0x76b   :  { %v2876_v51 = vmul.f32 %v3158_v8, %v2867_v36 }
 0x76c   :  { %v3464_v35 = vpop.eup %3463 }
 0x76d   :  { %v2868_v55 = vmul.f32 %v3464_v35, %v2852_v23  ;;  %v2885_v61 = vadd.f32 %v3159_v16, %v2876_v51 }
 0x76f   :  { %v2877_v63 = vmul.f32 %v3158_v8, %v2868_v55  ;;  %3336 = vmatprep.mubr.msk.f32.mxu1 %vm189_vm0, %v2885_v61 }
 0x771   :  { %v2886_v0 = vadd.f32 %v3159_v16, %v2877_v63 }
 0x773   :  { %3337 = vmatmul.mubr.msk.f32.vlgmr.msra.gmra.mrb[20].mxu1 %vm189_vm0, %v2886_v0 }
 0x846   :  { %v3338_v1 = vpop.f32.mrb[20].mxu1 }
 0x847   :  { %v2976_v31 = vadd.f32 %v3338_v1, %v3160_v53  ;;  %v2970_v10 = vpop.f32.mrb[21].mxu1 }
 0x848   :  { %v2971_v54 = vadd.f32 %v3160_v53, %v2970_v10 }
 0x849   :  { %v2980_v59 = vmax.f32 %v2976_v31, 0.0 }
 0x84a   :  { %v2979_v58 = vmax.f32 %v2971_v54, 0.0 }
 0x84c   :  { %3355 = vmatprep.mubr.msk.f32.mxu0 %vm2996_vm5, %v2979_v58 }
 0x84d   :  { %3356 = vmatmul.mubr.msk.f32.vlgmr.msra.gmra.mrb[16].mxu0 %vm2996_vm5, %v2980_v59 }
 0x920   :  { %v3357_v9 = vpop.f32.mrb[16].mxu0 }
 0x921   :  { %v3075_v13 = vadd.f32 %v3357_v9, %v3163_v62  ;;  %v3069_v11 = vpop.f32.mrb[17].mxu0 }
 0x922   :  { %v3070_v41 = vadd.f32 %v3163_v62, %v3069_v11 }
 0x923   :  { %v3079_v46 = vadd.f32 %v3075_v13, %v2886_v0 }
 0x924   :  { %v3078_v17 = vadd.f32 %v3070_v41, %v2885_v61 }
 0x925   :  { %3081 = vst.msk [vmem:[#allocation20 + $0x8] sm:$0xff] %vm189_vm0, %v3079_v46 }
 0x926   :  { %3080 = vst.msk [vmem:[#allocation20] sm:$0xff] %vm189_vm0, %v3078_v17 }
 0x927   :  { %3720 = shalt.err (!%p3717_p8)
}
 0x928   :  { %s3721_s23 = scalar_lea.hbm %s4439_s11, 256 }
 0x929   :  { %p3722_p9 = scmp.ne.s32.totalorder %s4439_s11, %s3721_s23  ;;  %p3725_p10 = scmp.lt.u32.totalorder %s3721_s23, %s4439_s11 }
 0x92b   :  { %p3727_p11 = pnand %p3725_p10, %p3722_p9 }
 0x92d   :  { %3730 = shalt.err (!%p3727_p11)
}
 0x92e   :  { %3093 = dma.vmem_to_hbm [thread:$0]  %s3088_s17, 256, %s4439_s11, [#allocation4], %s3747_s29, %s3747_s29, %s3748_s30  }
 0x92f   :  { %3743 = dma.done.wait [#allocation4], 256  }
 0x930   :  { %3744 = vsyncadd [#allocation4], 4294967040 }
 0x931   :  { %3097 = vsyncpa [#allocation3], 1 }
 0x932   :  { %3098 = vsyncpa [#allocation6], 1 }
 0x933   :  { %3099 = vsyncpa [#allocation9], 1 }
 0x934   :  { %3100 = vsyncpa [#allocation12], 1 }
 0x935   :  { %3101 = vsyncpa [#allocation15], 1 }
 0x936   :  { %3102 = vsyncpa [#allocation18], 1 }
 0x937   :  { %3103 = vsyncpa [#allocation4], 1 }

// kernel: tpu_custom_call.1
= control target key start
LH: loop header
LB: loop body
LE: loop exit
PB: predicated region body
PF: predicated region fallthrough
CT: control target
= control target key end

     0   :  { %16 = vsyncpa [#allocation3], 0  ;;  %s3013_s0 = inlined_call_operand.hbm [shape: f32[2,8,32], index: 0, kind: input, shape index: {}]   ;;  %s3014_s1 = inlined_call_operand.hbm [shape: f32[32,96], index: 1, kind: input, shape index: {}]   ;;  %s3015_s2 = inlined_call_operand.hbm [shape: f32[1,96], index: 2, kind: input, shape index: {}]   ;;  %s3016_s3 = inlined_call_operand.hbm [shape: f32[32,32], index: 3, kind: input, shape index: {}]   ;;  %s3017_s4 = inlined_call_operand.hbm [shape: f32[1,32], index: 4, kind: input, shape index: {}]   ;;  %s3018_s5 = inlined_call_operand.hbm [shape: f32[1,32], index: 5, kind: input, shape index: {}]   ;;  %s3019_s6 = inlined_call_operand.hbm [shape: f32[1,32], index: 6, kind: input, shape index: {}]   ;;  %s3020_s7 = inlined_call_operand.hbm [shape: f32[32,64], index: 7, kind: input, shape index: {}]   ;;  %s3021_s8 = inlined_call_operand.hbm [shape: f32[1,64], index: 8, kind: input, shape index: {}]   ;;  %s3022_s9 = inlined_call_operand.hbm [shape: f32[64,32], index: 9, kind: input, shape index: {}]   ;;  %s3023_s10 = inlined_call_operand.hbm [shape: f32[1,32], index: 10, kind: input, shape index: {}]   ;;  %s3024_s11 = inlined_call_operand.hbm [shape: f32[2,8,32], index: 11, kind: output, shape index: {}]  }
   0x1   :  { %17 = vsyncpa [#allocation6], 0 }
   0x2   :  { %18 = vsyncpa [#allocation9], 0 }
   0x3   :  { %19 = vsyncpa [#allocation12], 0 }
   0x4   :  { %20 = vsyncpa [#allocation15], 0 }
   0x5   :  { %21 = vsyncpa [#allocation18], 0 }
   0x6   :  { %22 = vsyncpa [#allocation4], 0  ;;  %s2607_s17 = smov [#allocation5]   ;;  %s2608_s19 = smov [#allocation8]  }
   0x7   :  { %s40_s18 = sshll.u32 %s2607_s17, 4  ;;  %s62_s20 = sshll.u32 %s2608_s19, 4  ;;  %s41_s18 = int_to_ptr.vmem [resolvable:$true] %s40_s18  ;;  %s2690_s20 = int_to_ptr.vmem [resolvable:$true] %s62_s20 }
   0x8   :  { %s2329_s23 = scalar_lea.hbm %s3014_s1, 512 }
   0x9   :  { %p2330_p0 = scmp.ne.s32.totalorder %s3014_s1, %s2329_s23  ;;  %p2333_p1 = scmp.lt.u32.totalorder %s2329_s23, %s3014_s1 }
   0xb   :  { %p2335_p2 = pnand %p2333_p1, %p2330_p0 }
   0xd   :  { %2338 = shalt.err (!%p2335_p2)
}
   0xe   :  { %s2339_s28 = scalar_lea.vmem %s41_s18, 512  ;;  %p2344_p4 = scmp.lt.s32.totalorder %s41_s18, %s41_s18 }
   0xf   :  { %p2340_p3 = scmp.ne.s32.totalorder %s41_s18, %s2339_s28  ;;  %p2345_p5 = scmp.lt.s32.totalorder %s2339_s28, %s2339_s28 }
  0x11   :  { %p2346_p6 = por %p2345_p5, %p2344_p4 }
  0x13   :  { %p2347_p7 = pnand %p2346_p6, %p2340_p3 }
  0x15   :  { %2350 = shalt.err (!%p2347_p7)
}
  0x16   :  { %s2609_s29 = smov 128   ;;  %s2610_s30 = smov 8  }
  0x17   :  { %46 = dma.hbm_to_vmem [thread:$0]  %s3014_s1, 512, %s41_s18, [#allocation6], %s2609_s29, %s2609_s29, %s2610_s30  }
  0x18   :  { %s2351_s16 = scalar_lea.hbm %s3016_s3, 512 }
  0x19   :  { %p2352_p8 = scmp.ne.s32.totalorder %s3016_s3, %s2351_s16  ;;  %p2355_p9 = scmp.lt.u32.totalorder %s2351_s16, %s3016_s3 }
  0x1b   :  { %p2357_p10 = pnand %p2355_p9, %p2352_p8 }
  0x1d   :  { %2360 = shalt.err (!%p2357_p10)
}
  0x1e   :  { %s2361_s23 = scalar_lea.vmem %s2690_s20, 512  ;;  %p2366_p12 = scmp.lt.s32.totalorder %s2690_s20, %s2690_s20 }
  0x1f   :  { %p2362_p11 = scmp.ne.s32.totalorder %s2690_s20, %s2361_s23  ;;  %p2367_p13 = scmp.lt.s32.totalorder %s2361_s23, %s2361_s23 }
  0x21   :  { %p2368_p0 = por %p2367_p13, %p2366_p12 }
  0x23   :  { %p2369_p1 = pnand %p2368_p0, %p2362_p11 }
  0x25   :  { %2372 = shalt.err (!%p2369_p1)
}
  0x26   :  { %68 = dma.hbm_to_vmem [thread:$0]  %s3016_s3, 512, %s2690_s20, [#allocation9], %s2609_s29, %s2609_s29, %s2610_s30  }
  0x27   :  { %s2611_s24 = smov [#allocation11]   ;;  %s2612_s26 = smov [#allocation14]  }
  0x28   :  { %s85_s25 = sshll.u32 %s2611_s24, 4  ;;  %s104_s27 = sshll.u32 %s2612_s26, 4  ;;  %s86_s25 = int_to_ptr.vmem [resolvable:$true] %s85_s25  ;;  %s2727_s27 = int_to_ptr.vmem [resolvable:$true] %s104_s27 }
  0x29   :  { %s2373_s13 = scalar_lea.hbm %s3018_s5, 16 }
  0x2a   :  { %p2374_p2 = scmp.ne.s32.totalorder %s3018_s5, %s2373_s13  ;;  %p2377_p3 = scmp.lt.u32.totalorder %s2373_s13, %s3018_s5 }
  0x2c   :  { %p2379_p4 = pnand %p2377_p3, %p2374_p2 }
  0x2e   :  { %2382 = shalt.err (!%p2379_p4)
}
  0x2f   :  { %s2383_s3 = scalar_lea.vmem %s86_s25, 16  ;;  %s2387_s20 = scalar_lea.vmem %s86_s25, 32 }
  0x30   :  { %p2384_p5 = scmp.ne.s32.totalorder %s86_s25, %s2383_s3  ;;  %p2388_p6 = scmp.lt.s32.totalorder %s86_s25, %s86_s25 }
  0x31   :  { %p2389_p7 = scmp.lt.s32.totalorder %s2387_s20, %s2383_s3 }
  0x33   :  { %p2390_p8 = por %p2389_p7, %p2388_p6 }
  0x35   :  { %p2391_p9 = pnand %p2390_p8, %p2384_p5 }
  0x37   :  { %2394 = shalt.err (!%p2391_p9)
}
  0x38   :  { %88 = dma.hbm_to_vmem [thread:$0]  %s3018_s5, 16, %s86_s25, [#allocation12]  }
  0x39   :  { %s2395_s1 = scalar_lea.hbm %s3020_s7, 512 }
  0x3a   :  { %p2396_p10 = scmp.ne.s32.totalorder %s3020_s7, %s2395_s1  ;;  %p2399_p11 = scmp.lt.u32.totalorder %s2395_s1, %s3020_s7 }
  0x3c   :  { %p2401_p12 = pnand %p2399_p11, %p2396_p10 }
  0x3e   :  { %2404 = shalt.err (!%p2401_p12)
}
  0x3f   :  { %s2405_s12 = scalar_lea.vmem %s2727_s27, 512  ;;  %p2410_p0 = scmp.lt.s32.totalorder %s2727_s27, %s2727_s27 }
  0x40   :  { %p2406_p13 = scmp.ne.s32.totalorder %s2727_s27, %s2405_s12  ;;  %p2411_p1 = scmp.lt.s32.totalorder %s2405_s12, %s2405_s12 }
  0x42   :  { %p2412_p2 = por %p2411_p1, %p2410_p0 }
  0x44   :  { %p2413_p3 = pnand %p2412_p2, %p2406_p13 }
  0x46   :  { %2416 = shalt.err (!%p2413_p3)
}
  0x47   :  { %110 = dma.hbm_to_vmem [thread:$0]  %s3020_s7, 512, %s2727_s27, [#allocation15], %s2609_s29, %s2609_s29, %s2610_s30  }
  0x48   :  { %s2613_s13 = smov [#allocation17]   ;;  %s2614_s15 = smov [#allocation2]  }
  0x49   :  { %s126_s14 = sshll.u32 %s2613_s13, 4  ;;  %s28_s16 = sshll.u32 %s2614_s15, 4  ;;  %s127_s14 = int_to_ptr.vmem [resolvable:$true] %s126_s14  ;;  %s2761_s16 = int_to_ptr.vmem [resolvable:$true] %s28_s16 }
  0x4a   :  { %s2417_s20 = scalar_lea.hbm %s3022_s9, 1024 }
  0x4b   :  { %p2418_p4 = scmp.ne.s32.totalorder %s3022_s9, %s2417_s20  ;;  %p2421_p5 = scmp.lt.u32.totalorder %s2417_s20, %s3022_s9 }
  0x4d   :  { %p2423_p6 = pnand %p2421_p5, %p2418_p4 }
  0x4f   :  { %2426 = shalt.err (!%p2423_p6)
}
  0x50   :  { %s2427_s7 = scalar_lea.vmem %s127_s14, 1024  ;;  %p2432_p8 = scmp.lt.s32.totalorder %s127_s14, %s127_s14 }
  0x51   :  { %p2428_p7 = scmp.ne.s32.totalorder %s127_s14, %s2427_s7  ;;  %p2433_p9 = scmp.lt.s32.totalorder %s2427_s7, %s2427_s7 }
  0x53   :  { %p2434_p10 = por %p2433_p9, %p2432_p8 }
  0x55   :  { %p2435_p11 = pnand %p2434_p10, %p2428_p7 }
  0x57   :  { %2438 = shalt.err (!%p2435_p11)
}
  0x58   :  { %132 = dma.hbm_to_vmem [thread:$0]  %s3022_s9, 1024, %s127_s14, [#allocation18], %s2609_s29, %s2609_s29, %s2610_s30  }
  0x59   :  { %s2439_s26 = scalar_lea.hbm %s3013_s0, 256 }
  0x5a   :  { %p2440_p12 = scmp.ne.s32.totalorder %s3013_s0, %s2439_s26  ;;  %p2443_p13 = scmp.lt.u32.totalorder %s2439_s26, %s3013_s0 }
  0x5c   :  { %p2445_p0 = pnand %p2443_p13, %p2440_p12 }
  0x5e   :  { %2448 = shalt.err (!%p2445_p0)
}
  0x5f   :  { %s2449_s13 = scalar_lea.vmem %s2761_s16, 256  ;;  %p2454_p2 = scmp.lt.s32.totalorder %s2761_s16, %s2761_s16 }
  0x60   :  { %p2450_p1 = scmp.ne.s32.totalorder %s2761_s16, %s2449_s13  ;;  %p2455_p3 = scmp.lt.s32.totalorder %s2449_s13, %s2449_s13 }
  0x62   :  { %p2456_p4 = por %p2455_p3, %p2454_p2 }
  0x64   :  { %p2457_p5 = pnand %p2456_p4, %p2450_p1 }
  0x66   :  { %2460 = shalt.err (!%p2457_p5)
}
  0x67   :  { %34 = dma.hbm_to_vmem [thread:$0]  %s3013_s0, 256, %s2761_s16, [#allocation3], %s2609_s29, %s2609_s29, %s2610_s30  }
  0x68   :  { %s2615_s15 = smov [#allocation7]   ;;  %s2616_s3 = smov [#allocation10]  }
  0x69   :  { %s53_s17 = sshll.u32 %s2615_s15, 4  ;;  %s75_s20 = sshll.u32 %s2616_s3, 4  ;;  %s54_s17 = int_to_ptr.vmem [resolvable:$true] %s53_s17  ;;  %s76_s20 = int_to_ptr.vmem [resolvable:$true] %s75_s20 }
  0x6a   :  { %s2461_s22 = scalar_lea.hbm %s3015_s2, 16 }
  0x6b   :  { %p2462_p6 = scmp.ne.s32.totalorder %s3015_s2, %s2461_s22  ;;  %p2465_p7 = scmp.lt.u32.totalorder %s2461_s22, %s3015_s2 }
  0x6d   :  { %p2467_p8 = pnand %p2465_p7, %p2462_p6 }
  0x6f   :  { %2470 = shalt.err (!%p2467_p8)
}
  0x70   :  { %s2471_s0 = scalar_lea.vmem %s54_s17, 16  ;;  %s2475_s16 = scalar_lea.vmem %s54_s17, 32 }
  0x71   :  { %p2472_p9 = scmp.ne.s32.totalorder %s54_s17, %s2471_s0  ;;  %p2476_p10 = scmp.lt.s32.totalorder %s54_s17, %s54_s17 }
  0x72   :  { %p2477_p11 = scmp.lt.s32.totalorder %s2475_s16, %s2471_s0 }
  0x74   :  { %p2478_p12 = por %p2477_p11, %p2476_p10 }
  0x76   :  { %p2479_p13 = pnand %p2478_p12, %p2472_p9 }
  0x78   :  { %2482 = shalt.err (!%p2479_p13)
}
  0x79   :  { %56 = dma.hbm_to_vmem [thread:$0]  %s3015_s2, 16, %s54_s17, [#allocation6]  }
  0x7a   :  { %s2483_s12 = scalar_lea.hbm %s3017_s4, 16 }
  0x7b   :  { %p2484_p0 = scmp.ne.s32.totalorder %s3017_s4, %s2483_s12  ;;  %p2487_p1 = scmp.lt.u32.totalorder %s2483_s12, %s3017_s4 }
  0x7d   :  { %p2489_p2 = pnand %p2487_p1, %p2484_p0 }
  0x7f   :  { %2492 = shalt.err (!%p2489_p2)
}
  0x80   :  { %s2493_s14 = scalar_lea.vmem %s76_s20, 16  ;;  %s2497_s15 = scalar_lea.vmem %s76_s20, 32 }
  0x81   :  { %p2494_p3 = scmp.ne.s32.totalorder %s76_s20, %s2493_s14  ;;  %p2498_p4 = scmp.lt.s32.totalorder %s76_s20, %s76_s20 }
  0x82   :  { %p2499_p5 = scmp.lt.s32.totalorder %s2497_s15, %s2493_s14 }
  0x84   :  { %p2500_p6 = por %p2499_p5, %p2498_p4 }
  0x86   :  { %p2501_p7 = pnand %p2500_p6, %p2494_p3 }
  0x88   :  { %2504 = shalt.err (!%p2501_p7)
}
  0x89   :  { %78 = dma.hbm_to_vmem [thread:$0]  %s3017_s4, 16, %s76_s20, [#allocation9]  }
  0x8a   :  { %s2617_s3 = smov [#allocation13]   ;;  %s2618_s21 = smov [#allocation16]  }
  0x8b   :  { %s95_s19 = sshll.u32 %s2617_s3, 4  ;;  %s117_s22 = sshll.u32 %s2618_s21, 4  ;;  %s96_s19 = int_to_ptr.vmem [resolvable:$true] %s95_s19  ;;  %s118_s22 = int_to_ptr.vmem [resolvable:$true] %s117_s22 }
  0x8c   :  { %s2505_s27 = scalar_lea.hbm %s3019_s6, 16 }
  0x8d   :  { %p2506_p8 = scmp.ne.s32.totalorder %s3019_s6, %s2505_s27  ;;  %p2509_p9 = scmp.lt.u32.totalorder %s2505_s27, %s3019_s6 }
  0x8f   :  { %p2511_p10 = pnand %p2509_p9, %p2506_p8 }
  0x91   :  { %2514 = shalt.err (!%p2511_p10)
}
  0x92   :  { %s2515_s4 = scalar_lea.vmem %s96_s19, 16  ;;  %s2519_s20 = scalar_lea.vmem %s96_s19, 32 }
  0x93   :  { %p2516_p11 = scmp.ne.s32.totalorder %s96_s19, %s2515_s4  ;;  %p2520_p12 = scmp.lt.s32.totalorder %s96_s19, %s96_s19 }
  0x94   :  { %p2521_p13 = scmp.lt.s32.totalorder %s2519_s20, %s2515_s4 }
  0x96   :  { %p2522_p0 = por %p2521_p13, %p2520_p12 }
  0x98   :  { %p2523_p1 = pnand %p2522_p0, %p2516_p11 }
  0x9a   :  { %2526 = shalt.err (!%p2523_p1)
}
  0x9b   :  { %98 = dma.hbm_to_vmem [thread:$0]  %s3019_s6, 16, %s96_s19, [#allocation12]  }
  0x9c   :  { %s2527_s5 = scalar_lea.hbm %s3021_s8, 16 }
  0x9d   :  { %p2528_p2 = scmp.ne.s32.totalorder %s3021_s8, %s2527_s5  ;;  %p2531_p3 = scmp.lt.u32.totalorder %s2527_s5, %s3021_s8 }
  0x9f   :  { %p2533_p4 = pnand %p2531_p3, %p2528_p2 }
  0xa1   :  { %2536 = shalt.err (!%p2533_p4)
}
  0xa2   :  { %s2537_s15 = scalar_lea.vmem %s118_s22, 16  ;;  %s2541_s2 = scalar_lea.vmem %s118_s22, 32 }
  0xa3   :  { %p2538_p5 = scmp.ne.s32.totalorder %s118_s22, %s2537_s15  ;;  %p2542_p6 = scmp.lt.s32.totalorder %s118_s22, %s118_s22 }
  0xa4   :  { %p2543_p7 = scmp.lt.s32.totalorder %s2541_s2, %s2537_s15 }
  0xa6   :  { %p2544_p8 = por %p2543_p7, %p2542_p6 }
  0xa8   :  { %p2545_p9 = pnand %p2544_p8, %p2538_p5 }
  0xaa   :  { %2548 = shalt.err (!%p2545_p9)
}
  0xab   :  { %120 = dma.hbm_to_vmem [thread:$0]  %s3021_s8, 16, %s118_s22, [#allocation15]  }
  0xac   :  { %s2619_s3 = smov [#allocation19]   ;;  %s2549_s7 = scalar_lea.hbm %s3023_s10, 16 }
  0xad   :  { %s139_s19 = sshll.u32 %s2619_s3, 4  ;;  %p2550_p10 = scmp.ne.s32.totalorder %s3023_s10, %s2549_s7  ;;  %s140_s19 = int_to_ptr.vmem [resolvable:$true] %s139_s19 }
  0xae   :  { %p2553_p11 = scmp.lt.u32.totalorder %s2549_s7, %s3023_s10 }
  0xb0   :  { %p2555_p12 = pnand %p2553_p11, %p2550_p10 }
  0xb2   :  { %2558 = shalt.err (!%p2555_p12)
}
  0xb3   :  { %s2559_s18 = scalar_lea.vmem %s140_s19, 16  ;;  %s2563_s8 = scalar_lea.vmem %s140_s19, 32 }
  0xb4   :  { %p2560_p13 = scmp.ne.s32.totalorder %s140_s19, %s2559_s18  ;;  %p2564_p0 = scmp.lt.s32.totalorder %s140_s19, %s140_s19 }
  0xb5   :  { %p2565_p1 = scmp.lt.s32.totalorder %s2563_s8, %s2559_s18 }
  0xb7   :  { %p2566_p2 = por %p2565_p1, %p2564_p0 }
  0xb9   :  { %p2567_p3 = pnand %p2566_p2, %p2560_p13 }
  0xbb   :  { %2570 = shalt.err (!%p2567_p3)
}
  0xbc   :  { %142 = dma.hbm_to_vmem [thread:$0]  %s3023_s10, 16, %s140_s19, [#allocation18]  }
  0xbd   :  { %2593 = dma.done.wait [#allocation3], 256  }
  0xbe   :  { %2594 = vsyncadd [#allocation3], 4294967040 }
  0xbf   :  { %2595 = dma.done.wait [#allocation6], 528  }
  0xc0   :  { %2596 = vsyncadd [#allocation6], 4294966768 }
  0xc1   :  { %2597 = dma.done.wait [#allocation9], 528  }
  0xc2   :  { %2598 = vsyncadd [#allocation9], 4294966768 }
  0xc3   :  { %2599 = dma.done.wait [#allocation12], 32  }
  0xc4   :  { %2600 = vsyncadd [#allocation12], 4294967264 }
  0xc5   :  { %2601 = dma.done.wait [#allocation15], 528  }
  0xc6   :  { %2602 = vsyncadd [#allocation15], 4294966768 }
  0xc7   :  { %2603 = dma.done.wait [#allocation18], 1040  }
  0xc8   :  { %2604 = vsyncadd [#allocation18], 4294966256  ;;  %vm189_vm0 = vcmask 261120   ;;  %v178_v0 = vld [vmem:[#allocation5] sm:$0xff]  ;;  %v179_v1 = vld [vmem:[#allocation5 + $0x8] sm:$0xff]  ;;  %v2620_v10 = vmov 0.0  }
  0xc9   :  { %v180_v2 = vld [vmem:[#allocation5 + $0x10] sm:$0xff]  ;;  %v2230_v3 = vpack.c.bf16 %v179_v1, %v178_v0  ;;  %v181_v4 = vld [vmem:[#allocation5 + $0x18] sm:$0xff]  ;;  %v2000_v8 = vld [vmem:[#allocation7] ss:$0 sm:$0xff]  ;;  %2119 = vmatprep.subr.mxu0 %v2620_v10  ;;  %s2621_s10 = smov 112   ;;  %s2622_s20 = smov 120  }
  0xca   :  { %v2858_v5 = vld [vmem:[#allocation2] sm:$0xff]  ;;  %v2234_v6 = vpack.c.bf16 %v181_v4, %v180_v2  ;;  %v2862_v7 = vld [vmem:[#allocation2 + $0x8] sm:$0xff]  ;;  %vm2623_vm1 = vmmov 0   ;;  %s2624_s24 = smov 104   ;;  %s2625_s26 = smov 96   ;;  %vm301_vm2 = vcmask 64512  }
  0xcb   :  { %2106 = vmatprep.mubr.msk.f32.mxu1 %vm189_vm0, %v2858_v5  ;;  %2231 = vmatprep.subr.bf16.mxu1 %v2230_v3  ;;  %s2626_s28 = smov 64   ;;  %s2627_s12 = smov 16   ;;  %vm1641_vm3 = vcmask 195584   ;;  %vm1638_vm4 = vcmask 130048   ;;  %vm1892_vm5 = vcmask 523264  }
  0xcc   :  { %2233 = vmatpush3.bf16.msra.mxu1 %v2230_v3  ;;  %2121 = vmatprep.mubr.msk.f32.mxu0 %vm2623_vm1, %v2620_v10  ;;  %s2628_s5 = smov 24   ;;  %s2629_s25 = smov [#allocation20]  }
  0xcd   :  { %2235 = vmatprep.subr.bf16.mxu1 %v2234_v6  ;;  %s1983_s13 = sshll.u32 %s2629_s25, 4  ;;  %s1984_s13 = int_to_ptr.vmem [resolvable:$true] %s1983_s13 }
  0xce   :  { %s2571_s9 = scalar_lea.vmem %s1984_s13, 256  ;;  %p2576_p5 = scmp.lt.s32.totalorder %s1984_s13, %s1984_s13 }
  0xcf   :  { %p2572_p4 = scmp.ne.s32.totalorder %s1984_s13, %s2571_s9  ;;  %p2577_p6 = scmp.lt.s32.totalorder %s2571_s9, %s2571_s9 }
  0xd0   :  { %2237 = vmatpush3.bf16.msra.mxu1 %v2234_v6 }
  0xd1   :  { %2109 = vmatprep.subr.mxu1 %v2620_v10  ;;  %p2578_p7 = por %p2577_p6, %p2576_p5 }
  0xd3   :  { %2107 = vmatmul.mubr.msk.f32.vlgmr.msra.gmra.mrb[0].mxu1 %vm189_vm0, %v2862_v7  ;;  %p2579_p8 = pnand %p2578_p7, %p2572_p4 }
  0xd4   :  { %2111 = vmatprep.mubr.msk.f32.mxu1 %vm2623_vm1, %v2620_v10 }
 0x1a6   :  { %v2108_v9 = vpop.f32.mrb[0].mxu1 }
 0x1a7   :  { %v262_v11 = vpop.f32.mrb[1].mxu1  ;;  %v268_v13 = vadd.f32 %v2108_v9, %v2000_v8 }
 0x1a8   :  { %v263_v12 = vadd.f32 %v2000_v8, %v262_v11 }
 0x1a9   :  { %v292_v23 = vmul.f32 0.35355338, %v268_v13 }
 0x1aa   :  { %279 = vrot.lane.b32.xlu1 %v263_v12, %s2621_s10  ;;  %273 = vrot.lane.b32.xlu0 %v263_v12, %s2622_s20  ;;  %v291_v21 = vmul.f32 0.35355338, %v263_v12 }
 0x1ae   :  { %281 = vrot.lane.b32.xlu1 %v268_v13, %s2621_s10  ;;  %275 = vrot.lane.b32.xlu0 %v268_v13, %s2622_s20 }
 0x1b2   :  { %287 = vrot.lane.b32.xlu1 %v268_v13, %s2624_s24  ;;  %285 = vrot.lane.b32.xlu0 %v263_v12, %s2624_s24 }
 0x1b6   :  { %377 = vrot.lane.b32.xlu1 %v268_v13, %s2625_s26  ;;  %299 = vrot.lane.b32.xlu0 %v263_v12, %s2625_s26 }
 0x21c   :  { %v280_v14 = vpop.permute.xlu1 %279  ;;  %v274_v15 = vpop.permute.xlu0 %273 }
 0x21d   :  { %454 = vrot.lane.b32.xlu0 %v274_v15, %s2625_s26  ;;  %v293_v25 = vmul.f32 0.35355338, %v274_v15  ;;  %v295_v28 = vmul.f32 0.35355338, %v280_v14 }
 0x220   :  { %v276_v16 = vpop.permute.xlu0 %275  ;;  %v282_v17 = vpop.permute.xlu1 %281 }
 0x221   :  { %608 = vrot.lane.b32.xlu0 %v280_v14, %s2625_s26  ;;  %531 = vrot.lane.b32.xlu1 %v276_v16, %s2625_s26  ;;  %v294_v29 = vmul.f32 0.35355338, %v276_v16  ;;  %v296_v32 = vmul.f32 0.35355338, %v282_v17 }
 0x224   :  { %v2872_v18 = vpop.permute.xlu0 %285  ;;  %v2875_v19 = vpop.permute.xlu1 %287 }
 0x225   :  { %685 = vrot.lane.b32.xlu1 %v282_v17, %s2625_s26  ;;  %762 = vrot.lane.b32.xlu0 %v2872_v18, %s2625_s26  ;;  %v297_v33 = vmul.f32 0.35355338, %v2872_v18  ;;  %v298_v35 = vmul.f32 0.35355338, %v2875_v19 }
 0x228   :  { %v300_v20 = vpop.permute.xlu0 %299  ;;  %v378_v22 = vpop.permute.xlu1 %377 }
 0x229   :  { %839 = vrot.lane.b32.xlu1 %v2875_v19, %s2625_s26  ;;  %1064 = vrot.lane.b32.xlu0 %v268_v13, %s2626_s28 }
 0x22a   :  { %2110 = vmatpush3.xpose.msk.msra.mxu1 %vm301_vm2, %v300_v20 }
 0x22b   :  { %2114 = vmatprep.subr.mxu1 %v2620_v10 }
 0x22d   :  { %2112 = vmatmul.mubr.msk.f32.vlgmr.msra.gmra.mrb[2].mxu1 %vm301_vm2, %v291_v21  ;;  %988 = vrot.lane.b32.xlu1 %v263_v12, %s2626_s28 }
 0x22e   :  { %1292 = vrot.lane.b32.xlu0 %v280_v14, %s2626_s28  ;;  %2115 = vmatpush3.xpose.msk.msra.mxu1 %vm301_vm2, %v378_v22 }
 0x22f   :  { %2116 = vmatprep.mubr.msk.f32.mxu1 %vm2623_vm1, %v2620_v10  ;;  %2124 = vmatprep.subr.mxu1 %v2620_v10 }
 0x231   :  { %2117 = vmatmul.mubr.msk.f32.vlgmr.msra.gmra.mrb[4].mxu1 %vm301_vm2, %v292_v23  ;;  %1216 = vrot.lane.b32.xlu1 %v276_v16, %s2626_s28 }
 0x232   :  { %2126 = vmatprep.mubr.msk.f32.mxu1 %vm2623_vm1, %v2620_v10 }
 0x235   :  { %1368 = vrot.lane.b32.xlu1 %v282_v17, %s2626_s28 }
 0x239   :  { %1140 = vrot.lane.b32.xlu1 %v274_v15, %s2626_s28 }
 0x28f   :  { %v455_v24 = vpop.permute.xlu0 %454 }
 0x290   :  { %2120 = vmatpush3.xpose.msk.msra.mxu0 %vm301_vm2, %v455_v24 }
 0x291   :  { %2129 = vmatprep.subr.mxu0 %v2620_v10 }
 0x293   :  { %v532_v26 = vpop.permute.xlu1 %531  ;;  %2122 = vmatmul.mubr.msk.f32.vlgmr.msra.gmra.mrb[0].mxu0 %vm301_vm2, %v293_v25  ;;  %v609_v27 = vpop.permute.xlu0 %608 }
 0x294   :  { %2125 = vmatpush3.xpose.msk.msra.mxu1 %vm301_vm2, %v532_v26  ;;  %2130 = vmatpush3.xpose.msk.msra.mxu0 %vm301_vm2, %v609_v27 }
 0x295   :  { %2131 = vmatprep.mubr.msk.f32.mxu0 %vm2623_vm1, %v2620_v10  ;;  %2139 = vmatprep.subr.mxu0 %v2620_v10 }
 0x296   :  { %2134 = vmatprep.subr.mxu1 %v2620_v10 }
 0x297   :  { %v686_v30 = vpop.permute.xlu1 %685  ;;  %2132 = vmatmul.mubr.msk.f32.vlgmr.msra.gmra.mrb[2].mxu0 %vm301_vm2, %v295_v28  ;;  %v763_v31 = vpop.permute.xlu0 %762  ;;  %2127 = vmatmul.mubr.msk.f32.vlgmr.msra.gmra.mrb[6].mxu1 %vm301_vm2, %v294_v29 }
 0x298   :  { %2135 = vmatpush3.xpose.msk.msra.mxu1 %vm301_vm2, %v686_v30  ;;  %2140 = vmatpush3.xpose.msk.msra.mxu0 %vm301_vm2, %v763_v31 }
 0x299   :  { %2136 = vmatprep.mubr.msk.f32.mxu1 %vm2623_vm1, %v2620_v10  ;;  %2141 = vmatprep.mubr.msk.f32.mxu0 %vm2623_vm1, %v2620_v10 }
 0x29a   :  { %2144 = vmatprep.subr.mxu1 %v2620_v10  ;;  %2149 = vmatprep.subr.mxu0 %v2620_v10 }
 0x29b   :  { %v840_v34 = vpop.permute.xlu1 %839  ;;  %2142 = vmatmul.mubr.msk.f32.vlgmr.msra.gmra.mrb[4].mxu0 %vm301_vm2, %v297_v33  ;;  %2137 = vmatmul.mubr.msk.f32.vlgmr.msra.gmra.mrb[8].mxu1 %vm301_vm2, %v296_v32  ;;  %v1065_v36 = vpop.permute.xlu0 %1064 }
 0x29c   :  { %2145 = vmatpush3.xpose.msk.msra.mxu1 %vm301_vm2, %v840_v34  ;;  %2146 = vmatprep.mubr.msk.f32.mxu1 %vm2623_vm1, %v2620_v10 }
 0x29d   :  { %2154 = vmatprep.subr.mxu1 %v2620_v10  ;;  %2151 = vmatprep.mubr.msk.f32.mxu0 %vm2623_vm1, %v2620_v10 }
 0x29f   :  { %v989_v37 = vpop.permute.xlu1 %988  ;;  %2147 = vmatmul.mubr.msk.f32.vlgmr.msra.gmra.mrb[10].mxu1 %vm301_vm2, %v298_v35 }
 0x2a0   :  { %2150 = vmatpush3.msra.mxu0 %v989_v37  ;;  %2155 = vmatpush3.msra.mxu1 %v1065_v36  ;;  %v1293_v0 = vpop.permute.xlu0 %1292 }
 0x2a1   :  { %2159 = vmatprep.subr.mxu0 %v2620_v10  ;;  %2156 = vmatprep.mubr.msk.f32.mxu1 %vm2623_vm1, %v2620_v10 }
 0x2a2   :  { %2164 = vmatprep.subr.mxu1 %v2620_v10 }
 0x2a3   :  { %v1217_v62 = vpop.permute.xlu1 %1216 }
 0x2a7   :  { %v1369_v63 = vpop.permute.xlu1 %1368 }
 0x2ab   :  { %v1141_v1 = vpop.permute.xlu1 %1140 }
 0x300   :  { %v373_v38 = vpop.f32.mrb[2].mxu1 }
 0x301   :  { %v2113_v39 = vpop.f32.mrb[3].mxu1  ;;  %v916_v40 = vsel %vm301_vm2, %v373_v38, -inf }
 0x302   :  { %917 = vmax.xlane.f32.xlu0 %v916_v40 }
 0x304   :  { %v450_v41 = vpop.f32.mrb[4].mxu1 }
 0x305   :  { %v2118_v42 = vpop.f32.mrb[5].mxu1  ;;  %v919_v43 = vsel %vm301_vm2, %v450_v41, -inf }
 0x306   :  { %920 = vmax.xlane.f32.xlu1 %v919_v43 }
 0x366   :  { %v527_v44 = vpop.f32.mrb[0].mxu0 }
 0x367   :  { %v2123_v45 = vpop.f32.mrb[1].mxu0  ;;  %v922_v57 = vsel %vm301_vm2, %v527_v44, -inf }
 0x36a   :  { %v604_v46 = vpop.f32.mrb[6].mxu1  ;;  %v681_v47 = vpop.f32.mrb[2].mxu0 }
 0x36b   :  { %v2128_v48 = vpop.f32.mrb[7].mxu1  ;;  %v2133_v49 = vpop.f32.mrb[3].mxu0  ;;  %v928_v50 = vsel %vm301_vm2, %v681_v47, -inf  ;;  %v925_v51 = vsel %vm301_vm2, %v604_v46, -inf }
 0x36c   :  { %929 = vmax.xlane.f32.xlu1 %v928_v50  ;;  %926 = vmax.xlane.f32.xlu0 %v925_v51 }
 0x36e   :  { %v758_v52 = vpop.f32.mrb[8].mxu1  ;;  %v835_v53 = vpop.f32.mrb[4].mxu0 }
 0x36f   :  { %v2138_v54 = vpop.f32.mrb[9].mxu1  ;;  %v2143_v55 = vpop.f32.mrb[5].mxu0  ;;  %v934_v56 = vsel %vm301_vm2, %v835_v53, -inf  ;;  %v931_v60 = vsel %vm301_vm2, %v758_v52, -inf }
 0x370   :  { %935 = vmax.xlane.f32.xlu1 %v934_v56  ;;  %923 = vmax.xlane.f32.xlu0 %v922_v57  ;;  %v1644_v54 = vld [vmem:[#allocation8] sm:$0xff]  ;;  %v1645_v55 = vld [vmem:[#allocation8 + $0x8] sm:$0xff] }
 0x371   :  { %v2238_v57 = vpack.c.bf16 %v1645_v55, %v1644_v54 }
 0x372   :  { %v912_v58 = vpop.f32.mrb[10].mxu1 }
 0x373   :  { %v2148_v59 = vpop.f32.mrb[11].mxu1  ;;  %v937_v61 = vsel %vm301_vm2, %v912_v58, -inf }
 0x374   :  { %932 = vmax.xlane.f32.xlu0 %v931_v60 }
 0x378   :  { %938 = vmax.xlane.f32.xlu0 %v937_v61 }
 0x381   :  { %1520 = vrot.lane.b32.xlu1 %v2875_v19, %s2626_s28 }
 0x38e   :  { %1444 = vrot.lane.b32.xlu0 %v2872_v18, %s2626_s28 }
 0x38f   :  { %v918_v2 = vpop.xlane.xlu0 %917 }
 0x390   :  { %v940_v3 = vsub.f32 %v373_v38, %v918_v2 }
 0x392   :  { %v948_v4 = vmul.f32 1.442695, %v940_v3 }
 0x393   :  { %v921_v6 = vpop.xlane.xlu1 %920 }
 0x394   :  { %2293 = vpow2.f32 %v948_v4  ;;  %v941_v8 = vsub.f32 %v450_v41, %v921_v6 }
 0x396   :  { %v950_v9 = vmul.f32 1.442695, %v941_v8 }
 0x398   :  { %2295 = vpow2.f32 %v950_v9 }
 0x39e   :  { %v2294_v11 = vpop.eup %2293 }
 0x39f   :  { %2152 = vmatmul.mubr.msk.f32.vlgmr.msra.gmra.mrb[6].mxu0 %vm301_vm2, %v2294_v11  ;;  %v964_v42 = vsel %vm301_vm2, %v2294_v11, 0.0 }
 0x3a0   :  { %2160 = vmatpush3.msra.mxu0 %v1141_v1  ;;  %2161 = vmatprep.mubr.msk.f32.mxu0 %vm2623_vm1, %v2620_v10 }
 0x3a1   :  { %2169 = vmatprep.subr.mxu0 %v2620_v10 }
 0x3a2   :  { %v2944_v12 = vpop.eup %2295 }
 0x3a3   :  { %2157 = vmatmul.mubr.msk.f32.vlgmr.msra.gmra.mrb[12].mxu1 %vm301_vm2, %v2944_v12 }
 0x3a4   :  { %2165 = vmatpush3.msra.mxu1 %v1217_v62  ;;  %2166 = vmatprep.mubr.msk.f32.mxu1 %vm2623_vm1, %v2620_v10  ;;  %v1646_v62 = vld [vmem:[#allocation8 + $0x10] sm:$0xff] }
 0x3a5   :  { %2174 = vmatprep.subr.mxu1 %v2620_v10 }
 0x3f9   :  { %v930_v13 = vpop.xlane.xlu1 %929  ;;  %v927_v14 = vpop.xlane.xlu0 %926 }
 0x3fa   :  { %v943_v15 = vsub.f32 %v604_v46, %v927_v14  ;;  %v944_v21 = vsub.f32 %v681_v47, %v930_v13  ;;  %v967_v46 = vsel %vm301_vm2, %v2944_v12, 0.0 }
 0x3fc   :  { %v954_v16 = vmul.f32 1.442695, %v943_v15  ;;  %v956_v26 = vmul.f32 1.442695, %v944_v21 }
 0x3fd   :  { %v936_v17 = vpop.xlane.xlu1 %935  ;;  %v924_v18 = vpop.xlane.xlu0 %923 }
 0x3fe   :  { %v946_v19 = vsub.f32 %v835_v53, %v936_v17  ;;  %v942_v20 = vsub.f32 %v527_v44, %v924_v18  ;;  %2297 = vpow2.f32 %v954_v16 }
 0x400   :  { %v960_v22 = vmul.f32 1.442695, %v946_v19  ;;  %v952_v23 = vmul.f32 1.442695, %v942_v20 }
 0x401   :  { %v933_v24 = vpop.xlane.xlu0 %932  ;;  %v1521_v39 = vpop.permute.xlu1 %1520 }
 0x402   :  { %2299 = vpow2.f32 %v960_v22  ;;  %v945_v25 = vsub.f32 %v758_v52, %v933_v24 }
 0x403   :  { %2301 = vpow2.f32 %v952_v23 }
 0x404   :  { %v958_v27 = vmul.f32 1.442695, %v945_v25 }
 0x405   :  { %v939_v28 = vpop.xlane.xlu0 %938 }
 0x406   :  { %2303 = vpow2.f32 %v958_v27  ;;  %v947_v29 = vsub.f32 %v912_v58, %v939_v28 }
 0x407   :  { %2305 = vpow2.f32 %v956_v26 }
 0x408   :  { %v962_v30 = vmul.f32 1.442695, %v947_v29  ;;  %v2298_v31 = vpop.eup %2297 }
 0x409   :  { %2167 = vmatmul.mubr.msk.f32.vlgmr.msra.gmra.mrb[14].mxu1 %vm301_vm2, %v2298_v31  ;;  %v973_v32 = vsel %vm301_vm2, %v2298_v31, 0.0  ;;  %v1445_v41 = vpop.permute.xlu0 %1444 }
 0x40a   :  { %2307 = vpow2.f32 %v962_v30  ;;  %2175 = vmatpush3.msra.mxu1 %v1369_v63  ;;  %974 = vadd.xlane.f32.xlu1 %v973_v32  ;;  %v1647_v63 = vld [vmem:[#allocation8 + $0x18] sm:$0xff] }
 0x40b   :  { %2176 = vmatprep.mubr.msk.f32.mxu1 %vm2623_vm1, %v2620_v10  ;;  %2184 = vmatprep.subr.mxu1 %v2620_v10 }
 0x40c   :  { %v2300_v33 = vpop.eup %2299 }
 0x40d   :  { %v2302_v34 = vpop.eup %2301  ;;  %v982_v35 = vsel %vm301_vm2, %v2300_v33, 0.0 }
 0x40e   :  { %2162 = vmatmul.mubr.msk.f32.vlgmr.msra.gmra.mrb[8].mxu0 %vm301_vm2, %v2302_v34  ;;  %v970_v36 = vsel %vm301_vm2, %v2302_v34, 0.0  ;;  %983 = vadd.xlane.f32.xlu1 %v982_v35 }
 0x40f   :  { %2170 = vmatpush3.msra.mxu0 %v1293_v0  ;;  %971 = vadd.xlane.f32.xlu0 %v970_v36  ;;  %v2242_v0 = vpack.c.bf16 %v1647_v63, %v1646_v62  ;;  %v1785_v62 = vld [vmem:[#allocation14 + $0x10] sm:$0xff]  ;;  %v1786_v63 = vld [vmem:[#allocation14 + $0x18] sm:$0xff] }
 0x410   :  { %v2304_v37 = vpop.eup %2303  ;;  %2171 = vmatprep.mubr.msk.f32.mxu0 %vm2623_vm1, %v2620_v10  ;;  %2179 = vmatprep.subr.mxu0 %v2620_v10 }
 0x411   :  { %v2306_v38 = vpop.eup %2305  ;;  %2177 = vmatmul.mubr.msk.f32.vlgmr.msra.gmra.mrb[16].mxu1 %vm301_vm2, %v2304_v37  ;;  %v979_v40 = vsel %vm301_vm2, %v2304_v37, 0.0 }
 0x412   :  { %2172 = vmatmul.mubr.msk.f32.vlgmr.msra.gmra.mrb[10].mxu0 %vm301_vm2, %v2306_v38  ;;  %2185 = vmatpush3.msra.mxu1 %v1521_v39  ;;  %v976_v44 = vsel %vm301_vm2, %v2306_v38, 0.0 }
 0x413   :  { %2180 = vmatpush3.msra.mxu0 %v1445_v41  ;;  %965 = vadd.xlane.f32.xlu1 %v964_v42 }
 0x414   :  { %v2308_v43 = vpop.eup %2307  ;;  %980 = vadd.xlane.f32.xlu0 %v979_v40  ;;  %2181 = vmatprep.mubr.msk.f32.mxu0 %vm2623_vm1, %v2620_v10 }
 0x415   :  { %2186 = vmatprep.mubr.msk.f32.mxu1 %vm2623_vm1, %v2620_v10  ;;  %v985_v45 = vsel %vm301_vm2, %v2308_v43, 0.0  ;;  %2239 = vmatprep.subr.bf16.mxu0 %v2238_v57 }
 0x416   :  { %2182 = vmatmul.mubr.msk.f32.vlgmr.msra.gmra.mrb[12].mxu0 %vm301_vm2, %v2300_v33  ;;  %2187 = vmatmul.mubr.msk.f32.vlgmr.msra.gmra.mrb[18].mxu1 %vm301_vm2, %v2308_v43  ;;  %v2027_v43 = vld [vmem:[#allocation10] ss:$0 sm:$0xff] }
 0x417   :  { %2241 = vmatpush3.bf16.msra.mxu0 %v2238_v57 }
 0x418   :  { %977 = vadd.xlane.f32.xlu0 %v976_v44  ;;  %2243 = vmatprep.subr.bf16.mxu0 %v2242_v0 }
 0x41b   :  { %2245 = vmatpush3.bf16.msra.mxu0 %v2242_v0  ;;  %v2250_v0 = vpack.c.bf16 %v1786_v63, %v1785_v62 }
 0x41c   :  { %986 = vadd.xlane.f32.xlu0 %v985_v45 }
 0x420   :  { %968 = vadd.xlane.f32.xlu0 %v967_v46 }
 0x472   :  { %v2976_v47 = vpop.f32.mrb[6].mxu0 }
 0x473   :  { %v2153_v48 = vpop.f32.mrb[7].mxu0 }
 0x476   :  { %v2978_v49 = vpop.f32.mrb[12].mxu1 }
 0x477   :  { %v2158_v10 = vpop.f32.mrb[13].mxu1 }
 0x497   :  { %v975_v51 = vpop.xlane.xlu1 %974 }
 0x498   :  { %2309 = vrcp.f32 %v975_v51 }
 0x49b   :  { %v984_v56 = vpop.xlane.xlu1 %983 }
 0x49c   :  { %v972_v50 = vpop.xlane.xlu0 %971 }
 0x49d   :  { %2311 = vrcp.f32 %v972_v50 }
 0x4a0   :  { %v966_v25 = vpop.xlane.xlu1 %965 }
 0x4a1   :  { %v981_v52 = vpop.xlane.xlu0 %980 }
 0x4a2   :  { %2313 = vrcp.f32 %v981_v52  ;;  %v2310_v58 = vpop.eup %2309 }
 0x4a3   :  { %2315 = vrcp.f32 %v984_v56 }
 0x4a5   :  { %v978_v53 = vpop.xlane.xlu0 %977 }
 0x4a6   :  { %2317 = vrcp.f32 %v978_v53 }
 0x4a7   :  { %v2312_v2 = vpop.eup %2311 }
 0x4a9   :  { %v987_v1 = vpop.xlane.xlu0 %986 }
 0x4aa   :  { %2319 = vrcp.f32 %v987_v1  ;;  %v1877_v1 = vld [vmem:[#allocation17] sm:$0xff] }
 0x4ab   :  { %2321 = vrcp.f32 %v966_v25 }
 0x4ac   :  { %v2314_v8 = vpop.eup %2313 }
 0x4ad   :  { %v2316_v15 = vpop.eup %2315  ;;  %v969_v26 = vpop.xlane.xlu0 %968 }
 0x4ae   :  { %2323 = vrcp.f32 %v969_v26 }
 0x4b0   :  { %v2318_v16 = vpop.eup %2317 }
 0x4b4   :  { %v2320_v23 = vpop.eup %2319 }
 0x4b5   :  { %v2322_v28 = vpop.eup %2321 }
 0x4b6   :  { %v1604_v32 = vmul.f32 %v2322_v28, %v2976_v47 }
 0x4b8   :  { %v2324_v31 = vpop.eup %2323 }
 0x4b9   :  { %v1605_v36 = vmul.f32 %v2324_v31, %v2978_v49 }
 0x4dc   :  { %v1288_v59 = vpop.f32.mrb[14].mxu1 }
 0x4dd   :  { %v1607_v60 = vmul.f32 %v2310_v58, %v1288_v59  ;;  %v2168_v61 = vpop.f32.mrb[15].mxu1 }
 0x4df   :  { %1616 = vrot.lane.b32.xlu0 %v1607_v60, %s2610_s30  ;;  %v1784_v60 = vld [vmem:[#allocation14 + $0x8] sm:$0xff] }
 0x4e1   :  { %v1212_v3 = vpop.f32.mrb[8].mxu0 }
 0x4e2   :  { %v1606_v4 = vmul.f32 %v2312_v2, %v1212_v3  ;;  %v2163_v6 = vpop.f32.mrb[9].mxu0  ;;  %v1878_v2 = vld [vmem:[#allocation17 + $0x8] sm:$0xff]  ;;  %v1879_v3 = vld [vmem:[#allocation17 + $0x10] sm:$0xff] }
 0x4e3   :  { %v1880_v6 = vld [vmem:[#allocation17 + $0x18] sm:$0xff] }
 0x4e4   :  { %1614 = vrot.lane.b32.xlu1 %v1606_v4, %s2610_s30  ;;  %v1440_v9 = vpop.f32.mrb[16].mxu1  ;;  %v2254_v4 = vpack.c.bf16 %v1878_v2, %v1877_v1 }
 0x4e5   :  { %v1364_v11 = vpop.f32.mrb[10].mxu0  ;;  %v1609_v12 = vmul.f32 %v2314_v8, %v1440_v9  ;;  %v2178_v13 = vpop.f32.mrb[17].mxu1  ;;  %v2258_v8 = vpack.c.bf16 %v1880_v6, %v1879_v3  ;;  %v1881_v9 = vld [vmem:[#allocation17 + $0x20] sm:$0xff] }
 0x4e6   :  { %v2173_v14 = vpop.f32.mrb[11].mxu0  ;;  %v1608_v19 = vmul.f32 %v2318_v16, %v1364_v11  ;;  %v1882_v11 = vld [vmem:[#allocation17 + $0x28] sm:$0xff]  ;;  %2255 = vmatprep.subr.bf16.mxu0 %v2254_v4 }
 0x4e8   :  { %1624 = vrot.lane.b32.xlu1 %v1609_v12, %s2627_s12  ;;  %v2262_v12 = vpack.c.bf16 %v1882_v11, %v1881_v9 }
 0x4e9   :  { %v1516_v17 = vpop.f32.mrb[12].mxu0  ;;  %v1592_v18 = vpop.f32.mrb[18].mxu1 }
 0x4ea   :  { %v1610_v20 = vmul.f32 %v2316_v15, %v1516_v17  ;;  %v2183_v21 = vpop.f32.mrb[13].mxu0  ;;  %v2188_v22 = vpop.f32.mrb[19].mxu1  ;;  %v1611_v24 = vmul.f32 %v2320_v23, %v1592_v18 }
 0x4eb   :  { %v2031_v22 = vld [vmem:[#allocation13] ss:$0 sm:$0xff] }
 0x4ec   :  { %1630 = vrot.lane.b32.xlu0 %v1610_v20, %s2628_s5  ;;  %1622 = vrot.lane.b32.xlu1 %v1608_v19, %s2627_s12  ;;  %v2030_v20 = vld [vmem:[#allocation11] ss:$0 sm:$0xff] }
 0x4f0   :  { %1632 = vrot.lane.b32.xlu1 %v1611_v24, %s2628_s5 }
 0x551   :  { %v1617_v29 = vpop.permute.xlu0 %1616 }
 0x552   :  { %v1637_v39 = vsel %vm301_vm2, %v1605_v36, %v1617_v29  ;;  %v1883_v29 = vld [vmem:[#allocation17 + $0x30] sm:$0xff] }
 0x556   :  { %v1615_v27 = vpop.permute.xlu1 %1614 }
 0x557   :  { %v1636_v33 = vsel %vm301_vm2, %v1604_v32, %v1615_v27  ;;  %v2032_v32 = vld [vmem:[#allocation16] ss:$0 sm:$0xff] }
 0x55a   :  { %v1625_v30 = vpop.permute.xlu1 %1624 }
 0x55b   :  { %v1640_v40 = vsel %vm1638_vm4, %v1637_v39, %v1625_v30  ;;  %v1884_v30 = vld [vmem:[#allocation17 + $0x38] sm:$0xff]  ;;  %v2035_v39 = vld [vmem:[#allocation19] ss:$0 sm:$0xff] }
 0x55c   :  { %v2266_v31 = vpack.c.bf16 %v1884_v30, %v1883_v29 }
 0x55e   :  { %v1631_v34 = vpop.permute.xlu0 %1630  ;;  %v1623_v35 = vpop.permute.xlu1 %1622 }
 0x55f   :  { %v1639_v37 = vsel %vm1638_vm4, %v1636_v33, %v1623_v35 }
 0x560   :  { %v1642_v38 = vsel %vm1641_vm3, %v1639_v37, %v1631_v34 }
 0x561   :  { %2197 = vmatprep.mubr.msk.f32.mxu0 %vm189_vm0, %v1642_v38 }
 0x562   :  { %v1633_v41 = vpop.permute.xlu1 %1632 }
 0x563   :  { %v1643_v42 = vsel %vm1641_vm3, %v1640_v40, %v1633_v41 }
 0x564   :  { %2198 = vmatmul.mubr.msk.f32.vlgmr.msra.gmra.mrb[14].mxu0 %vm189_vm0, %v1643_v42 }
 0x565   :  { %2257 = vmatpush3.bf16.msra.mxu0 %v2254_v4 }
 0x566   :  { %2259 = vmatprep.subr.bf16.mxu0 %v2258_v8 }
 0x569   :  { %2261 = vmatpush3.bf16.msra.mxu0 %v2258_v8 }
 0x56a   :  { %2263 = vmatprep.subr.bf16.mxu0 %v2262_v12 }
 0x56d   :  { %2265 = vmatpush3.bf16.msra.mxu0 %v2262_v12 }
 0x56e   :  { %2267 = vmatprep.subr.bf16.mxu0 %v2266_v31 }
 0x571   :  { %2269 = vmatpush3.bf16.msra.mxu0 %v2266_v31 }
 0x637   :  { %v2199_v44 = vpop.f32.mrb[14].mxu0 }
 0x638   :  { %v1733_v45 = vadd.f32 %v2199_v44, %v2027_v43  ;;  %v1727_v46 = vpop.f32.mrb[15].mxu0 }
 0x639   :  { %v1728_v47 = vadd.f32 %v2027_v43, %v1727_v46 }
 0x63a   :  { %v1737_v48 = vadd.f32 %v1733_v45, %v2862_v7 }
 0x63b   :  { %v1736_v49 = vadd.f32 %v1728_v47, %v2858_v5  ;;  %v1783_v5 = vld [vmem:[#allocation14] sm:$0xff] }
 0x63c   :  { %v1741_v10 = vsel %vm189_vm0, %v1737_v48, 0.0  ;;  %v2246_v61 = vpack.c.bf16 %v1784_v60, %v1783_v5 }
 0x63d   :  { %1742 = vadd.xlane.f32.xlu1 %v1741_v10  ;;  %v1738_v50 = vsel %vm189_vm0, %v1736_v49, 0.0 }
 0x63e   :  { %1739 = vadd.xlane.f32.xlu0 %v1738_v50  ;;  %2247 = vmatprep.subr.bf16.mxu1 %v2246_v61 }
 0x63f   :  { %2249 = vmatpush3.bf16.msra.mxu1 %v2246_v61 }
 0x640   :  { %2251 = vmatprep.subr.bf16.mxu1 %v2250_v0 }
 0x643   :  { %2253 = vmatpush3.bf16.msra.mxu1 %v2250_v0 }
 0x6ca   :  { %v1743_v51 = vpop.xlane.xlu1 %1742 }
 0x6cb   :  { %v1746_v52 = vmul.f32 0.03125, %v1743_v51  ;;  %v1740_v53 = vpop.xlane.xlu0 %1739 }
 0x6cc   :  { %v1745_v54 = vmul.f32 0.03125, %v1740_v53 }
 0x6cd   :  { %v1748_v55 = vsub.f32 %v1737_v48, %v1746_v52 }
 0x6ce   :  { %v1747_v56 = vsub.f32 %v1736_v49, %v1745_v54 }
 0x6cf   :  { %v1750_v59 = vmul.f32 %v1748_v55, %v1748_v55 }
 0x6d0   :  { %v1749_v57 = vmul.f32 %v1747_v56, %v1747_v56 }
 0x6d1   :  { %v1754_v7 = vsel %vm189_vm0, %v1750_v59, 0.0 }
 0x6d2   :  { %v1751_v58 = vsel %vm189_vm0, %v1749_v57, 0.0 }
 0x6d3   :  { %1752 = vadd.xlane.f32.xlu0 %v1751_v58 }
 0x6d7   :  { %1755 = vadd.xlane.f32.xlu0 %v1754_v7 }
 0x760   :  { %v1753_v13 = vpop.xlane.xlu0 %1752 }
 0x761   :  { %v1757_v14 = vmul.f32 0.03125, %v1753_v13 }
 0x763   :  { %v1759_v15 = vadd.f32 1e-05, %v1757_v14 }
 0x764   :  { %v1756_v16 = vpop.xlane.xlu0 %1755 }
 0x765   :  { %2325 = vrsqrt.f32 %v1759_v15  ;;  %v1758_v17 = vmul.f32 0.03125, %v1756_v16 }
 0x767   :  { %v1760_v18 = vadd.f32 1e-05, %v1758_v17 }
 0x769   :  { %2327 = vrsqrt.f32 %v1760_v18 }
 0x76f   :  { %v2326_v19 = vpop.eup %2325 }
 0x770   :  { %v1763_v21 = vmul.f32 %v2326_v19, %v1747_v56 }
 0x772   :  { %v1772_v23 = vmul.f32 %v2030_v20, %v1763_v21 }
 0x773   :  { %v2328_v24 = vpop.eup %2327 }
 0x774   :  { %v1764_v25 = vmul.f32 %v2328_v24, %v1748_v55  ;;  %v1781_v26 = vadd.f32 %v2031_v22, %v1772_v23 }
 0x776   :  { %v1773_v27 = vmul.f32 %v2030_v20, %v1764_v25  ;;  %2208 = vmatprep.mubr.msk.f32.mxu1 %vm189_vm0, %v1781_v26 }
 0x778   :  { %v1782_v28 = vadd.f32 %v2031_v22, %v1773_v27 }
 0x77a   :  { %2209 = vmatmul.mubr.msk.f32.vlgmr.msra.gmra.mrb[20].mxu1 %vm189_vm0, %v1782_v28 }
 0x84d   :  { %v2210_v33 = vpop.f32.mrb[20].mxu1 }
 0x84e   :  { %v1872_v34 = vadd.f32 %v2210_v33, %v2032_v32  ;;  %v1866_v35 = vpop.f32.mrb[21].mxu1 }
 0x84f   :  { %v1867_v36 = vadd.f32 %v2032_v32, %v1866_v35 }
 0x850   :  { %v1876_v38 = vmax.f32 %v1872_v34, 0.0 }
 0x851   :  { %v1875_v37 = vmax.f32 %v1867_v36, 0.0 }
 0x853   :  { %2227 = vmatprep.mubr.msk.f32.mxu0 %vm1892_vm5, %v1875_v37 }
 0x854   :  { %2228 = vmatmul.mubr.msk.f32.vlgmr.msra.gmra.mrb[16].mxu0 %vm1892_vm5, %v1876_v38 }
 0x927   :  { %v2229_v40 = vpop.f32.mrb[16].mxu0 }
 0x928   :  { %v1971_v41 = vadd.f32 %v2229_v40, %v2035_v39  ;;  %v1965_v42 = vpop.f32.mrb[17].mxu0 }
 0x929   :  { %v1966_v43 = vadd.f32 %v2035_v39, %v1965_v42 }
 0x92a   :  { %v1975_v44 = vadd.f32 %v1971_v41, %v1782_v28 }
 0x92b   :  { %v1974_v45 = vadd.f32 %v1966_v43, %v1781_v26 }
 0x92c   :  { %1977 = vst.msk [vmem:[#allocation20 + $0x8] sm:$0xff] %vm189_vm0, %v1975_v44 }
 0x92d   :  { %1976 = vst.msk [vmem:[#allocation20] sm:$0xff] %vm189_vm0, %v1974_v45 }
 0x92e   :  { %2582 = shalt.err (!%p2579_p8)
}
 0x92f   :  { %s2583_s2 = scalar_lea.hbm %s3024_s11, 256 }
 0x930   :  { %p2584_p9 = scmp.ne.s32.totalorder %s3024_s11, %s2583_s2  ;;  %p2587_p10 = scmp.lt.u32.totalorder %s2583_s2, %s3024_s11 }
 0x932   :  { %p2589_p11 = pnand %p2587_p10, %p2584_p9 }
 0x934   :  { %2592 = shalt.err (!%p2589_p11)
}
 0x935   :  { %1989 = dma.vmem_to_hbm [thread:$0]  %s1984_s13, 256, %s3024_s11, [#allocation4], %s2609_s29, %s2609_s29, %s2610_s30  }
 0x936   :  { %2605 = dma.done.wait [#allocation4], 256  }
 0x937   :  { %2606 = vsyncadd [#allocation4], 4294967040 }
 0x938   :  { %1993 = vsyncpa [#allocation3], 1 }
 0x939   :  { %1994 = vsyncpa [#allocation6], 1 }
 0x93a   :  { %1995 = vsyncpa [#allocation9], 1 }
 0x93b   :  { %1996 = vsyncpa [#allocation12], 1 }
 0x93c   :  { %1997 = vsyncpa [#allocation15], 1 }
 0x93d   :  { %1998 = vsyncpa [#allocation18], 1 }
 0x93e   :  { %1999 = vsyncpa [#allocation4], 1 }

</bundles_post_ra>
